<compile_context>
chip_gen: v7x
topology: tpu7x:2x2x1
jax: 0.10.0
libtpu: 0.0.40
codegen_flags: <defaults>
</compile_context>

<pallas_src>
import functools
import math

import jax
import jax.numpy as jnp
import numpy as np
from jax.experimental import pallas as pl
from jax.experimental.pallas import tpu as pltpu

LANE = 128


# ----------------------------- Pallas kernel ------------------------------- #

def fused_forward_kernel(x_ref, w_in_ref, b_in_ref, a_ref,
                         w_rel_ref, w_root_ref, b_conv_ref, gamma_ref, beta_ref,
                         w_att1_ref, b_att1_ref, w_att2_ref, b_att2_ref,
                         w_out_ref, b_out_ref, o_ref,
                         *, num_layers, num_relations, eps, neg_slope):
    n = x_ref.shape[0]
    inv_n = 1.0 / n

    # ---- input projection (bf16 operands, f32 accumulation) ------------------
    h = (jnp.dot(x_ref[...], w_in_ref[...], preferred_element_type=jnp.float32)
         + b_in_ref[...])

    # Online-softmax accumulators over the L scales.  Scores are lane-broadcast
    # (every lane of a row carries the same score), so all the softmax /
    # weighting below is pure VPU elementwise work.
    m_run = jnp.full(h.shape, -jnp.inf, dtype=jnp.float32)
    den = jnp.zeros(h.shape, dtype=jnp.float32)
    acc = jnp.zeros(h.shape, dtype=jnp.float32)

    for l in range(num_layers):
        h_bf = h.astype(jnp.bfloat16)

        # RGCNConv: root term + per-relation accumulate (no restack / shuffles)
        z = (jnp.dot(h_bf, w_root_ref[l], preferred_element_type=jnp.float32)
             + b_conv_ref[l])
        for r in range(num_relations):
            msg = jnp.dot(h_bf, w_rel_ref[l * num_relations + r],
                          preferred_element_type=jnp.float32)
            z = z + jnp.dot(a_ref[r], msg.astype(jnp.bfloat16),
                            preferred_element_type=jnp.float32)

        # BatchNorm1d (batch stats, single pass: var = E[z^2] - E[z]^2), f32.
        mean = jnp.sum(z, axis=0, keepdims=True) * inv_n
        mean_sq = jnp.sum(z * z, axis=0, keepdims=True) * inv_n
        var = mean_sq - mean * mean
        zn = (z - mean) * jax.lax.rsqrt(var + eps) * gamma_ref[l] + beta_ref[l]

        # LeakyReLU(0.1)
        h = jnp.where(zn >= 0, zn, neg_slope * zn)
        # TODO(synk): F.dropout(p=0.2, training=True) is stochastic; identity here.

        # ---- scale-attention score for this layer, lane-broadcast via MXU ----
        h_bf = h.astype(jnp.bfloat16)
        hid = jnp.maximum(
            jnp.dot(h_bf, w_att1_ref[...], preferred_element_type=jnp.float32)
            + b_att1_ref[...], 0.0)
        s = (jnp.dot(hid.astype(jnp.bfloat16), w_att2_ref[...],
                     preferred_element_type=jnp.float32) + b_att2_ref[...])

        # online softmax over scales (all elementwise, exp on EUP)
        m_new = jnp.maximum(m_run, s)
        alpha = jnp.exp(m_run - m_new)
        p = jnp.exp(s - m_new)
        den = alpha * den + p
        acc = alpha * acc + p * h
        m_run = m_new

    emb = acc * pl.reciprocal(den, approx=True)

    # ---- output projection + L2 normalize (F.normalize eps=1e-12) ------------
    out = (jnp.dot(emb.astype(jnp.bfloat16), w_out_ref[...],
                   preferred_element_type=jnp.float32) + b_out_ref[...])
    sq = jnp.sum(out * out, axis=1, keepdims=True)
    o_ref[...] = out * jax.lax.rsqrt(jnp.maximum(sq, 1e-24))


# ------------------------------ Host wrapper ------------------------------- #

def _full_spec(shape):
    nd = len(shape)
    return pl.BlockSpec(shape, lambda i, _nd=nd: (0,) * _nd)


def _ceil_to(v, m):
    return ((v + m - 1) // m) * m


def _pad_last2(a, rows, cols):
    pads = [(0, 0)] * (a.ndim - 2) + [(0, rows - a.shape[-2]),
                                      (0, cols - a.shape[-1])]
    return jnp.pad(a, pads)


def multiscale_rgcn_forward(params, x, a_norm, num_layers):
    num_relations, n, _ = a_norm.shape
    in_dim, dh = params["w_in"].shape
    att_h = params["w_att1"].shape[1]
    d_out = params["w_out"].shape[1]

    din_p = _ceil_to(in_dim, LANE)
    dh_p = _ceil_to(dh, LANE)
    datt_p = _ceil_to(att_h, LANE)
    dout_p = _ceil_to(d_out, LANE)

    f32, bf16 = jnp.float32, jnp.bfloat16

    # Zero-pad all lane dimensions to 128 and cast MXU operands to bf16.
    x_p = _pad_last2(x, n, din_p).astype(bf16)
    w_in = _pad_last2(params["w_in"], din_p, dh_p).astype(bf16)
    b_in = _pad_last2(params["b_in"], 1, dh_p).astype(f32)
    a_bf = a_norm.astype(bf16)

    w_rel = _pad_last2(
        jnp.stack(params["w_rel"], axis=0).reshape(num_layers * num_relations,
                                                   dh, dh),
        dh_p, dh_p).astype(bf16)                                   # (L*R, 128, 128)
    w_root = _pad_last2(jnp.stack(params["w_root"], 0), dh_p, dh_p).astype(bf16)
    b_conv = _pad_last2(jnp.stack(params["b_conv"], 0), 1, dh_p).astype(f32)
    gamma = _pad_last2(jnp.stack(params["gamma"], 0), 1, dh_p).astype(f32)
    beta = _pad_last2(jnp.stack(params["beta"], 0), 1, dh_p).astype(f32)

    w_att1 = _pad_last2(params["w_att1"], dh_p, datt_p).astype(bf16)
    b_att1 = _pad_last2(params["b_att1"], 1, datt_p).astype(f32)
    # Broadcast the single attention-score column across all 128 output lanes so
    # the per-node score leaves the MXU already lane-dense (no 1-lane extracts).
    w_att2_col = _pad_last2(params["w_att2"], datt_p, 1)
    w_att2 = jnp.broadcast_to(w_att2_col, (datt_p, dh_p)).astype(bf16)
    b_att2 = jnp.broadcast_to(params["b_att2"], (1, dh_p)).astype(f32)

    w_out = _pad_last2(params["w_out"], dh_p, dout_p).astype(bf16)
    b_out = _pad_last2(params["b_out"], 1, dout_p).astype(f32)

    kern = functools.partial(fused_forward_kernel,
                             num_layers=num_layers,
                             num_relations=num_relations,
                             eps=1e-5, neg_slope=0.1)

    args = (x_p, w_in, b_in, a_bf, w_rel, w_root, b_conv, gamma, beta,
            w_att1, b_att1, w_att2, b_att2, w_out, b_out)

    out_p = pl.pallas_call(
        kern,
        out_shape=jax.ShapeDtypeStruct((n, dout_p), jnp.float32),
        grid=(1,),
        in_specs=[_full_spec(a.shape) for a in args],
        out_specs=pl.BlockSpec((n, dout_p), lambda i: (0, 0)),
        compiler_params=pltpu.CompilerParams(
            dimension_semantics=("arbitrary",),
            vmem_limit_bytes=32 * 1024 * 1024),
    )(*args)

    # Padded output lanes are exactly zero, so the L2 norm is unaffected; slice.
    return out_p[:, :d_out]


# --------------------------- Model (parameters) ---------------------------- #

def xavier_uniform(key, shape, fan_in, fan_out):
    bound = math.sqrt(6.0 / (fan_in + fan_out))
    return jax.random.uniform(key, shape, jnp.float32, -bound, bound)


def init_params(key, in_dim, hidden_dim, out_dim, num_relations, num_layers):
    keys = jax.random.split(key, 4 + 2 * num_layers)
    p = {}
    p["w_in"] = xavier_uniform(keys[0], (in_dim, hidden_dim), in_dim, hidden_dim)
    p["b_in"] = jnp.zeros((1, hidden_dim), jnp.float32)
    p["w_rel"], p["w_root"], p["b_conv"], p["gamma"], p["beta"] = [], [], [], [], []
    for l in range(num_layers):
        p["w_rel"].append(xavier_uniform(keys[4 + 2 * l],
                                         (num_relations, hidden_dim, hidden_dim),
                                         hidden_dim, hidden_dim))
        p["w_root"].append(xavier_uniform(keys[5 + 2 * l],
                                          (hidden_dim, hidden_dim),
                                          hidden_dim, hidden_dim))
        p["b_conv"].append(jnp.zeros((1, hidden_dim), jnp.float32))
        p["gamma"].append(jnp.ones((1, hidden_dim), jnp.float32))
        p["beta"].append(jnp.zeros((1, hidden_dim), jnp.float32))
    att_hidden = hidden_dim // 4
    p["w_att1"] = xavier_uniform(keys[1], (hidden_dim, att_hidden), hidden_dim, att_hidden)
    p["b_att1"] = jnp.zeros((1, att_hidden), jnp.float32)
    p["w_att2"] = xavier_uniform(keys[2], (att_hidden, 1), att_hidden, 1)
    p["b_att2"] = jnp.zeros((1, 1), jnp.float32)
    p["w_out"] = xavier_uniform(keys[3], (hidden_dim, out_dim), hidden_dim, out_dim)
    p["b_out"] = jnp.zeros((1, out_dim), jnp.float32)
    return p


def build_dense_adjacency(edge_index, edge_type, num_nodes, num_relations):
    """Densify the graph: A[r, dst, src] with per-(node, relation) mean normalization."""
    src, dst = edge_index[0], edge_index[1]
    a = jnp.zeros((num_relations, num_nodes, num_nodes), jnp.float32)
    a = a.at[edge_type, dst, src].add(1.0)
    deg = jnp.sum(a, axis=2, keepdims=True)
    return a / jnp.maximum(deg, 1.0)


# --------------------------------- Reference -------------------------------- #

def reference_forward(params, x, a_norm, num_layers):
    h = x @ params["w_in"] + params["b_in"]
    reps = []
    for l in range(num_layers):
        z = h @ params["w_root"][l] + params["b_conv"][l]
        for r in range(a_norm.shape[0]):
            z = z + a_norm[r] @ (h @ params["w_rel"][l][r])
        mean = jnp.mean(z, axis=0, keepdims=True)
        var = jnp.mean((z - mean) ** 2, axis=0, keepdims=True)
        zn = (z - mean) / jnp.sqrt(var + 1e-5) * params["gamma"][l] + params["beta"][l]
        h = jnp.where(zn >= 0, zn, 0.1 * zn)
        reps.append(h)
    scores = []
    for rep in reps:
        hid = jnp.maximum(rep @ params["w_att1"] + params["b_att1"], 0.0)
        scores.append(hid @ params["w_att2"] + params["b_att2"])
    sc = jnp.concatenate(scores, axis=1)
    w = jax.nn.softmax(sc, axis=1)
    emb = jnp.zeros_like(reps[0])
    for l, rep in enumerate(reps):
        emb = emb + rep * w[:, l:l + 1]
    out = emb @ params["w_out"] + params["b_out"]
    norm = jnp.sqrt(jnp.sum(out * out, axis=1, keepdims=True))
    return out / jnp.maximum(norm, 1e-12)


# ----------------------------------- Main ----------------------------------- #

if __name__ == "__main__":
    N, IN_DIM, HIDDEN, OUT_DIM = 64, 16, 32, 8
    NUM_RELATIONS, NUM_LAYERS, NUM_EDGES = 3, 3, 256

    key = jax.random.PRNGKey(0)
    k_x, k_src, k_dst, k_et, k_par = jax.random.split(key, 5)

    x = jax.random.normal(k_x, (N, IN_DIM), jnp.float32)
    src = jax.random.randint(k_src, (NUM_EDGES,), 0, N)
    dst = jax.random.randint(k_dst, (NUM_EDGES,), 0, N)
    edge_index = jnp.stack([src, dst], axis=0)                     # (2, E)
    edge_type = jax.random.randint(k_et, (NUM_EDGES,), 0, NUM_RELATIONS)

    params = init_params(k_par, IN_DIM, HIDDEN, OUT_DIM, NUM_RELATIONS, NUM_LAYERS)
    a_norm = build_dense_adjacency(edge_index, edge_type, N, NUM_RELATIONS)

    out = multiscale_rgcn_forward(params, x, a_norm, NUM_LAYERS)
    out = jax.block_until_ready(out)

    ref = jax.block_until_ready(reference_forward(params, x, a_norm, NUM_LAYERS))
    # Tolerance loosened vs the f32 version: MXU operands are bf16 (per perf
    # review); stats/softmax/normalize are f32, so error stays small & relative.
    np.testing.assert_allclose(np.asarray(out), np.asarray(ref),
                               rtol=5e-2, atol=5e-2)

    print("KERNEL_OK")
</pallas_src>

<mosaic_0001>
module attributes {stable_mosaic.version = 11 : i64} {
  func.func @fused_forward_kernel(%arg0: i32, %arg1: memref<64x128xbf16, #tpu.memory_space<vmem>>, %arg2: memref<128x128xbf16, #tpu.memory_space<vmem>>, %arg3: memref<1x128xf32, #tpu.memory_space<vmem>>, %arg4: memref<3x64x64xbf16, #tpu.memory_space<vmem>>, %arg5: memref<9x128x128xbf16, #tpu.memory_space<vmem>>, %arg6: memref<3x128x128xbf16, #tpu.memory_space<vmem>>, %arg7: memref<3x1x128xf32, #tpu.memory_space<vmem>>, %arg8: memref<3x1x128xf32, #tpu.memory_space<vmem>>, %arg9: memref<3x1x128xf32, #tpu.memory_space<vmem>>, %arg10: memref<128x128xbf16, #tpu.memory_space<vmem>>, %arg11: memref<1x128xf32, #tpu.memory_space<vmem>>, %arg12: memref<128x128xbf16, #tpu.memory_space<vmem>>, %arg13: memref<1x128xf32, #tpu.memory_space<vmem>>, %arg14: memref<128x128xbf16, #tpu.memory_space<vmem>>, %arg15: memref<1x128xf32, #tpu.memory_space<vmem>>, %arg16: memref<64x128xf32, #tpu.memory_space<vmem>>) attributes {dimension_semantics = [#tpu.dimension_semantics<arbitrary>], iteration_bounds = array<i64: 1>, scalar_prefetch = 0 : i64, scratch_operands = 0 : i64, tpu.core_type = #tpu.core_type<tc>, window_params = [{pipeline_mode = #tpu.pipeline_mode<synchronous>, transform_indices = @transform_0, window_bounds = array<i64: 64, 128>}, {pipeline_mode = #tpu.pipeline_mode<synchronous>, transform_indices = @transform_1, window_bounds = array<i64: 128, 128>}, {pipeline_mode = #tpu.pipeline_mode<synchronous>, transform_indices = @transform_2, window_bounds = array<i64: 1, 128>}, {pipeline_mode = #tpu.pipeline_mode<synchronous>, transform_indices = @transform_3, window_bounds = array<i64: 3, 64, 64>}, {pipeline_mode = #tpu.pipeline_mode<synchronous>, transform_indices = @transform_4, window_bounds = array<i64: 9, 128, 128>}, {pipeline_mode = #tpu.pipeline_mode<synchronous>, transform_indices = @transform_5, window_bounds = array<i64: 3, 128, 128>}, {pipeline_mode = #tpu.pipeline_mode<synchronous>, transform_indices = @transform_6, window_bounds = array<i64: 3, 1, 128>}, {pipeline_mode = #tpu.pipeline_mode<synchronous>, transform_indices = @transform_7, window_bounds = array<i64: 3, 1, 128>}, {pipeline_mode = #tpu.pipeline_mode<synchronous>, transform_indices = @transform_8, window_bounds = array<i64: 3, 1, 128>}, {pipeline_mode = #tpu.pipeline_mode<synchronous>, transform_indices = @transform_9, window_bounds = array<i64: 128, 128>}, {pipeline_mode = #tpu.pipeline_mode<synchronous>, transform_indices = @transform_10, window_bounds = array<i64: 1, 128>}, {pipeline_mode = #tpu.pipeline_mode<synchronous>, transform_indices = @transform_11, window_bounds = array<i64: 128, 128>}, {pipeline_mode = #tpu.pipeline_mode<synchronous>, transform_indices = @transform_12, window_bounds = array<i64: 1, 128>}, {pipeline_mode = #tpu.pipeline_mode<synchronous>, transform_indices = @transform_13, window_bounds = array<i64: 128, 128>}, {pipeline_mode = #tpu.pipeline_mode<synchronous>, transform_indices = @transform_14, window_bounds = array<i64: 1, 128>}, {pipeline_mode = #tpu.pipeline_mode<synchronous>, transform_indices = @transform_15, window_bounds = array<i64: 64, 128>}]} {
    %c0 = arith.constant 0 : index
    %c0_0 = arith.constant 0 : index
    %0 = vector.load %arg1[%c0, %c0_0] : memref<64x128xbf16, #tpu.memory_space<vmem>>, vector<64x128xbf16>
    %c0_1 = arith.constant 0 : index
    %c0_2 = arith.constant 0 : index
    %1 = vector.load %arg2[%c0_1, %c0_2] : memref<128x128xbf16, #tpu.memory_space<vmem>>, vector<128x128xbf16>
    %cst = arith.constant dense<0.000000e+00> : vector<64x128xf32>
    %2 = tpu.matmul %0, %1, %cst {dimension_numbers = #tpu.dot_dimension_numbers<[1], [0], [0], [1], [0, 0, 1, 1], [], []>} : vector<64x128xbf16>, vector<128x128xbf16>, vector<64x128xf32> -> vector<64x128xf32>
    %c0_3 = arith.constant 0 : index
    %c0_4 = arith.constant 0 : index
    %3 = vector.load %arg3[%c0_3, %c0_4] : memref<1x128xf32, #tpu.memory_space<vmem>>, vector<1x128xf32>
    %4 = vector.broadcast %3 : vector<1x128xf32> to vector<64x128xf32>
    %5 = arith.addf %2, %4 : vector<64x128xf32>
    %cst_5 = arith.constant 0xFF800000 : f32
    %6 = vector.broadcast %cst_5 : f32 to vector<64x128xf32>
    %cst_6 = arith.constant 0.000000e+00 : f32
    %7 = vector.broadcast %cst_6 : f32 to vector<64x128xf32>
    %cst_7 = arith.constant 0.000000e+00 : f32
    %8 = vector.broadcast %cst_7 : f32 to vector<64x128xf32>
    %9 = arith.truncf %5 : vector<64x128xf32> to vector<64x128xbf16>
    %c0_8 = arith.constant 0 : index
    %c0_9 = arith.constant 0 : index
    %c0_10 = arith.constant 0 : index
    %10 = vector.load %arg6[%c0_8, %c0_9, %c0_10] : memref<3x128x128xbf16, #tpu.memory_space<vmem>>, vector<1x128x128xbf16>
    %11 = vector.shape_cast %10 : vector<1x128x128xbf16> to vector<128x128xbf16>
    %cst_11 = arith.constant dense<0.000000e+00> : vector<64x128xf32>
    %12 = tpu.matmul %9, %11, %cst_11 {dimension_numbers = #tpu.dot_dimension_numbers<[1], [0], [0], [1], [0, 0, 1, 1], [], []>} : vector<64x128xbf16>, vector<128x128xbf16>, vector<64x128xf32> -> vector<64x128xf32>
    %c0_12 = arith.constant 0 : index
    %c0_13 = arith.constant 0 : index
    %c0_14 = arith.constant 0 : index
    %13 = vector.load %arg7[%c0_12, %c0_13, %c0_14] : memref<3x1x128xf32, #tpu.memory_space<vmem>>, vector<1x1x128xf32>
    %14 = vector.shape_cast %13 : vector<1x1x128xf32> to vector<1x128xf32>
    %15 = vector.broadcast %14 : vector<1x128xf32> to vector<64x128xf32>
    %16 = arith.addf %12, %15 : vector<64x128xf32>
    %c0_15 = arith.constant 0 : index
    %c0_16 = arith.constant 0 : index
    %c0_17 = arith.constant 0 : index
    %17 = vector.load %arg5[%c0_15, %c0_16, %c0_17] : memref<9x128x128xbf16, #tpu.memory_space<vmem>>, vector<1x128x128xbf16>
    %18 = vector.shape_cast %17 : vector<1x128x128xbf16> to vector<128x128xbf16>
    %cst_18 = arith.constant dense<0.000000e+00> : vector<64x128xf32>
    %19 = tpu.matmul %9, %18, %cst_18 {dimension_numbers = #tpu.dot_dimension_numbers<[1], [0], [0], [1], [0, 0, 1, 1], [], []>} : vector<64x128xbf16>, vector<128x128xbf16>, vector<64x128xf32> -> vector<64x128xf32>
    %c0_19 = arith.constant 0 : index
    %c0_20 = arith.constant 0 : index
    %c0_21 = arith.constant 0 : index
    %20 = vector.load %arg4[%c0_19, %c0_20, %c0_21] : memref<3x64x64xbf16, #tpu.memory_space<vmem>>, vector<1x64x64xbf16>
    %21 = vector.shape_cast %20 : vector<1x64x64xbf16> to vector<64x64xbf16>
    %22 = arith.truncf %19 : vector<64x128xf32> to vector<64x128xbf16>
    %cst_22 = arith.constant dense<0.000000e+00> : vector<64x128xf32>
    %23 = tpu.matmul %21, %22, %cst_22 {dimension_numbers = #tpu.dot_dimension_numbers<[1], [0], [0], [1], [0, 0, 1, 1], [], []>} : vector<64x64xbf16>, vector<64x128xbf16>, vector<64x128xf32> -> vector<64x128xf32>
    %24 = arith.addf %16, %23 : vector<64x128xf32>
    %c1 = arith.constant 1 : index
    %c0_23 = arith.constant 0 : index
    %c0_24 = arith.constant 0 : index
    %25 = vector.load %arg5[%c1, %c0_23, %c0_24] : memref<9x128x128xbf16, #tpu.memory_space<vmem>>, vector<1x128x128xbf16>
    %26 = vector.shape_cast %25 : vector<1x128x128xbf16> to vector<128x128xbf16>
    %cst_25 = arith.constant dense<0.000000e+00> : vector<64x128xf32>
    %27 = tpu.matmul %9, %26, %cst_25 {dimension_numbers = #tpu.dot_dimension_numbers<[1], [0], [0], [1], [0, 0, 1, 1], [], []>} : vector<64x128xbf16>, vector<128x128xbf16>, vector<64x128xf32> -> vector<64x128xf32>
    %c1_26 = arith.constant 1 : index
    %c0_27 = arith.constant 0 : index
    %c0_28 = arith.constant 0 : index
    %28 = vector.load %arg4[%c1_26, %c0_27, %c0_28] : memref<3x64x64xbf16, #tpu.memory_space<vmem>>, vector<1x64x64xbf16>
    %29 = vector.shape_cast %28 : vector<1x64x64xbf16> to vector<64x64xbf16>
    %30 = arith.truncf %27 : vector<64x128xf32> to vector<64x128xbf16>
    %cst_29 = arith.constant dense<0.000000e+00> : vector<64x128xf32>
    %31 = tpu.matmul %29, %30, %cst_29 {dimension_numbers = #tpu.dot_dimension_numbers<[1], [0], [0], [1], [0, 0, 1, 1], [], []>} : vector<64x64xbf16>, vector<64x128xbf16>, vector<64x128xf32> -> vector<64x128xf32>
    %32 = arith.addf %24, %31 : vector<64x128xf32>
    %c2 = arith.constant 2 : index
    %c0_30 = arith.constant 0 : index
    %c0_31 = arith.constant 0 : index
    %33 = vector.load %arg5[%c2, %c0_30, %c0_31] : memref<9x128x128xbf16, #tpu.memory_space<vmem>>, vector<1x128x128xbf16>
    %34 = vector.shape_cast %33 : vector<1x128x128xbf16> to vector<128x128xbf16>
    %cst_32 = arith.constant dense<0.000000e+00> : vector<64x128xf32>
    %35 = tpu.matmul %9, %34, %cst_32 {dimension_numbers = #tpu.dot_dimension_numbers<[1], [0], [0], [1], [0, 0, 1, 1], [], []>} : vector<64x128xbf16>, vector<128x128xbf16>, vector<64x128xf32> -> vector<64x128xf32>
    %c2_33 = arith.constant 2 : index
    %c0_34 = arith.constant 0 : index
    %c0_35 = arith.constant 0 : index
    %36 = vector.load %arg4[%c2_33, %c0_34, %c0_35] : memref<3x64x64xbf16, #tpu.memory_space<vmem>>, vector<1x64x64xbf16>
    %37 = vector.shape_cast %36 : vector<1x64x64xbf16> to vector<64x64xbf16>
    %38 = arith.truncf %35 : vector<64x128xf32> to vector<64x128xbf16>
    %cst_36 = arith.constant dense<0.000000e+00> : vector<64x128xf32>
    %39 = tpu.matmul %37, %38, %cst_36 {dimension_numbers = #tpu.dot_dimension_numbers<[1], [0], [0], [1], [0, 0, 1, 1], [], []>} : vector<64x64xbf16>, vector<64x128xbf16>, vector<64x128xf32> -> vector<64x128xf32>
    %40 = arith.addf %32, %39 : vector<64x128xf32>
    %cst_37 = arith.constant dense<0.000000e+00> : vector<128xf32>
    %41 = vector.multi_reduction <add>, %40, %cst_37 [0] : vector<64x128xf32> to vector<128xf32>
    %42 = vector.shape_cast %41 : vector<128xf32> to vector<1x128xf32>
    %cst_38 = arith.constant 1.562500e-02 : f32
    %43 = vector.broadcast %cst_38 : f32 to vector<1x128xf32>
    %44 = arith.mulf %42, %43 : vector<1x128xf32>
    %45 = arith.mulf %40, %40 : vector<64x128xf32>
    %cst_39 = arith.constant dense<0.000000e+00> : vector<128xf32>
    %46 = vector.multi_reduction <add>, %45, %cst_39 [0] : vector<64x128xf32> to vector<128xf32>
    %47 = vector.shape_cast %46 : vector<128xf32> to vector<1x128xf32>
    %cst_40 = arith.constant 1.562500e-02 : f32
    %48 = vector.broadcast %cst_40 : f32 to vector<1x128xf32>
    %49 = arith.mulf %47, %48 : vector<1x128xf32>
    %50 = arith.mulf %44, %44 : vector<1x128xf32>
    %51 = arith.subf %49, %50 : vector<1x128xf32>
    %52 = vector.broadcast %44 : vector<1x128xf32> to vector<64x128xf32>
    %53 = arith.subf %40, %52 : vector<64x128xf32>
    %cst_41 = arith.constant 9.99999974E-6 : f32
    %54 = vector.broadcast %cst_41 : f32 to vector<1x128xf32>
    %55 = arith.addf %51, %54 : vector<1x128xf32>
    %56 = math.rsqrt %55 : vector<1x128xf32>
    %57 = vector.broadcast %56 : vector<1x128xf32> to vector<64x128xf32>
    %58 = arith.mulf %53, %57 : vector<64x128xf32>
    %c0_42 = arith.constant 0 : index
    %c0_43 = arith.constant 0 : index
    %c0_44 = arith.constant 0 : index
    %59 = vector.load %arg8[%c0_42, %c0_43, %c0_44] : memref<3x1x128xf32, #tpu.memory_space<vmem>>, vector<1x1x128xf32>
    %60 = vector.shape_cast %59 : vector<1x1x128xf32> to vector<1x128xf32>
    %61 = vector.broadcast %60 : vector<1x128xf32> to vector<64x128xf32>
    %62 = arith.mulf %58, %61 : vector<64x128xf32>
    %c0_45 = arith.constant 0 : index
    %c0_46 = arith.constant 0 : index
    %c0_47 = arith.constant 0 : index
    %63 = vector.load %arg9[%c0_45, %c0_46, %c0_47] : memref<3x1x128xf32, #tpu.memory_space<vmem>>, vector<1x1x128xf32>
    %64 = vector.shape_cast %63 : vector<1x1x128xf32> to vector<1x128xf32>
    %65 = vector.broadcast %64 : vector<1x128xf32> to vector<64x128xf32>
    %66 = arith.addf %62, %65 : vector<64x128xf32>
    %cst_48 = arith.constant 0.000000e+00 : f32
    %67 = vector.broadcast %cst_48 : f32 to vector<64x128xf32>
    %68 = arith.cmpf oge, %66, %67 : vector<64x128xf32>
    %cst_49 = arith.constant 1.000000e-01 : f32
    %69 = vector.broadcast %cst_49 : f32 to vector<64x128xf32>
    %70 = arith.mulf %69, %66 : vector<64x128xf32>
    %71 = arith.select %68, %66, %70 : vector<64x128xi1>, vector<64x128xf32>
    %72 = arith.truncf %71 : vector<64x128xf32> to vector<64x128xbf16>
    %c0_50 = arith.constant 0 : index
    %c0_51 = arith.constant 0 : index
    %73 = vector.load %arg10[%c0_50, %c0_51] : memref<128x128xbf16, #tpu.memory_space<vmem>>, vector<128x128xbf16>
    %cst_52 = arith.constant dense<0.000000e+00> : vector<64x128xf32>
    %74 = tpu.matmul %72, %73, %cst_52 {dimension_numbers = #tpu.dot_dimension_numbers<[1], [0], [0], [1], [0, 0, 1, 1], [], []>} : vector<64x128xbf16>, vector<128x128xbf16>, vector<64x128xf32> -> vector<64x128xf32>
    %c0_53 = arith.constant 0 : index
    %c0_54 = arith.constant 0 : index
    %75 = vector.load %arg11[%c0_53, %c0_54] : memref<1x128xf32, #tpu.memory_space<vmem>>, vector<1x128xf32>
    %76 = vector.broadcast %75 : vector<1x128xf32> to vector<64x128xf32>
    %77 = arith.addf %74, %76 : vector<64x128xf32>
    %cst_55 = arith.constant 0.000000e+00 : f32
    %78 = vector.broadcast %cst_55 : f32 to vector<64x128xf32>
    %79 = arith.maximumf %77, %78 : vector<64x128xf32>
    %80 = arith.truncf %79 : vector<64x128xf32> to vector<64x128xbf16>
    %c0_56 = arith.constant 0 : index
    %c0_57 = arith.constant 0 : index
    %81 = vector.load %arg12[%c0_56, %c0_57] : memref<128x128xbf16, #tpu.memory_space<vmem>>, vector<128x128xbf16>
    %cst_58 = arith.constant dense<0.000000e+00> : vector<64x128xf32>
    %82 = tpu.matmul %80, %81, %cst_58 {dimension_numbers = #tpu.dot_dimension_numbers<[1], [0], [0], [1], [0, 0, 1, 1], [], []>} : vector<64x128xbf16>, vector<128x128xbf16>, vector<64x128xf32> -> vector<64x128xf32>
    %c0_59 = arith.constant 0 : index
    %c0_60 = arith.constant 0 : index
    %83 = vector.load %arg13[%c0_59, %c0_60] : memref<1x128xf32, #tpu.memory_space<vmem>>, vector<1x128xf32>
    %84 = vector.broadcast %83 : vector<1x128xf32> to vector<64x128xf32>
    %85 = arith.addf %82, %84 : vector<64x128xf32>
    %86 = arith.maximumf %6, %85 : vector<64x128xf32>
    %87 = arith.subf %6, %86 : vector<64x128xf32>
    %88 = math.exp %87 : vector<64x128xf32>
    %89 = arith.subf %85, %86 : vector<64x128xf32>
    %90 = math.exp %89 : vector<64x128xf32>
    %91 = arith.mulf %88, %7 : vector<64x128xf32>
    %92 = arith.addf %91, %90 : vector<64x128xf32>
    %93 = arith.mulf %88, %8 : vector<64x128xf32>
    %94 = arith.mulf %90, %71 : vector<64x128xf32>
    %95 = arith.addf %93, %94 : vector<64x128xf32>
    %96 = arith.truncf %71 : vector<64x128xf32> to vector<64x128xbf16>
    %c1_61 = arith.constant 1 : index
    %c0_62 = arith.constant 0 : index
    %c0_63 = arith.constant 0 : index
    %97 = vector.load %arg6[%c1_61, %c0_62, %c0_63] : memref<3x128x128xbf16, #tpu.memory_space<vmem>>, vector<1x128x128xbf16>
    %98 = vector.shape_cast %97 : vector<1x128x128xbf16> to vector<128x128xbf16>
    %cst_64 = arith.constant dense<0.000000e+00> : vector<64x128xf32>
    %99 = tpu.matmul %96, %98, %cst_64 {dimension_numbers = #tpu.dot_dimension_numbers<[1], [0], [0], [1], [0, 0, 1, 1], [], []>} : vector<64x128xbf16>, vector<128x128xbf16>, vector<64x128xf32> -> vector<64x128xf32>
    %c1_65 = arith.constant 1 : index
    %c0_66 = arith.constant 0 : index
    %c0_67 = arith.constant 0 : index
    %100 = vector.load %arg7[%c1_65, %c0_66, %c0_67] : memref<3x1x128xf32, #tpu.memory_space<vmem>>, vector<1x1x128xf32>
    %101 = vector.shape_cast %100 : vector<1x1x128xf32> to vector<1x128xf32>
    %102 = vector.broadcast %101 : vector<1x128xf32> to vector<64x128xf32>
    %103 = arith.addf %99, %102 : vector<64x128xf32>
    %c3 = arith.constant 3 : index
    %c0_68 = arith.constant 0 : index
    %c0_69 = arith.constant 0 : index
    %104 = vector.load %arg5[%c3, %c0_68, %c0_69] : memref<9x128x128xbf16, #tpu.memory_space<vmem>>, vector<1x128x128xbf16>
    %105 = vector.shape_cast %104 : vector<1x128x128xbf16> to vector<128x128xbf16>
    %cst_70 = arith.constant dense<0.000000e+00> : vector<64x128xf32>
    %106 = tpu.matmul %96, %105, %cst_70 {dimension_numbers = #tpu.dot_dimension_numbers<[1], [0], [0], [1], [0, 0, 1, 1], [], []>} : vector<64x128xbf16>, vector<128x128xbf16>, vector<64x128xf32> -> vector<64x128xf32>
    %c0_71 = arith.constant 0 : index
    %c0_72 = arith.constant 0 : index
    %c0_73 = arith.constant 0 : index
    %107 = vector.load %arg4[%c0_71, %c0_72, %c0_73] : memref<3x64x64xbf16, #tpu.memory_space<vmem>>, vector<1x64x64xbf16>
    %108 = vector.shape_cast %107 : vector<1x64x64xbf16> to vector<64x64xbf16>
    %109 = arith.truncf %106 : vector<64x128xf32> to vector<64x128xbf16>
    %cst_74 = arith.constant dense<0.000000e+00> : vector<64x128xf32>
    %110 = tpu.matmul %108, %109, %cst_74 {dimension_numbers = #tpu.dot_dimension_numbers<[1], [0], [0], [1], [0, 0, 1, 1], [], []>} : vector<64x64xbf16>, vector<64x128xbf16>, vector<64x128xf32> -> vector<64x128xf32>
    %111 = arith.addf %103, %110 : vector<64x128xf32>
    %c4 = arith.constant 4 : index
    %c0_75 = arith.constant 0 : index
    %c0_76 = arith.constant 0 : index
    %112 = vector.load %arg5[%c4, %c0_75, %c0_76] : memref<9x128x128xbf16, #tpu.memory_space<vmem>>, vector<1x128x128xbf16>
    %113 = vector.shape_cast %112 : vector<1x128x128xbf16> to vector<128x128xbf16>
    %cst_77 = arith.constant dense<0.000000e+00> : vector<64x128xf32>
    %114 = tpu.matmul %96, %113, %cst_77 {dimension_numbers = #tpu.dot_dimension_numbers<[1], [0], [0], [1], [0, 0, 1, 1], [], []>} : vector<64x128xbf16>, vector<128x128xbf16>, vector<64x128xf32> -> vector<64x128xf32>
    %c1_78 = arith.constant 1 : index
    %c0_79 = arith.constant 0 : index
    %c0_80 = arith.constant 0 : index
    %115 = vector.load %arg4[%c1_78, %c0_79, %c0_80] : memref<3x64x64xbf16, #tpu.memory_space<vmem>>, vector<1x64x64xbf16>
    %116 = vector.shape_cast %115 : vector<1x64x64xbf16> to vector<64x64xbf16>
    %117 = arith.truncf %114 : vector<64x128xf32> to vector<64x128xbf16>
    %cst_81 = arith.constant dense<0.000000e+00> : vector<64x128xf32>
    %118 = tpu.matmul %116, %117, %cst_81 {dimension_numbers = #tpu.dot_dimension_numbers<[1], [0], [0], [1], [0, 0, 1, 1], [], []>} : vector<64x64xbf16>, vector<64x128xbf16>, vector<64x128xf32> -> vector<64x128xf32>
    %119 = arith.addf %111, %118 : vector<64x128xf32>
    %c5 = arith.constant 5 : index
    %c0_82 = arith.constant 0 : index
    %c0_83 = arith.constant 0 : index
    %120 = vector.load %arg5[%c5, %c0_82, %c0_83] : memref<9x128x128xbf16, #tpu.memory_space<vmem>>, vector<1x128x128xbf16>
    %121 = vector.shape_cast %120 : vector<1x128x128xbf16> to vector<128x128xbf16>
    %cst_84 = arith.constant dense<0.000000e+00> : vector<64x128xf32>
    %122 = tpu.matmul %96, %121, %cst_84 {dimension_numbers = #tpu.dot_dimension_numbers<[1], [0], [0], [1], [0, 0, 1, 1], [], []>} : vector<64x128xbf16>, vector<128x128xbf16>, vector<64x128xf32> -> vector<64x128xf32>
    %c2_85 = arith.constant 2 : index
    %c0_86 = arith.constant 0 : index
    %c0_87 = arith.constant 0 : index
    %123 = vector.load %arg4[%c2_85, %c0_86, %c0_87] : memref<3x64x64xbf16, #tpu.memory_space<vmem>>, vector<1x64x64xbf16>
    %124 = vector.shape_cast %123 : vector<1x64x64xbf16> to vector<64x64xbf16>
    %125 = arith.truncf %122 : vector<64x128xf32> to vector<64x128xbf16>
    %cst_88 = arith.constant dense<0.000000e+00> : vector<64x128xf32>
    %126 = tpu.matmul %124, %125, %cst_88 {dimension_numbers = #tpu.dot_dimension_numbers<[1], [0], [0], [1], [0, 0, 1, 1], [], []>} : vector<64x64xbf16>, vector<64x128xbf16>, vector<64x128xf32> -> vector<64x128xf32>
    %127 = arith.addf %119, %126 : vector<64x128xf32>
    %cst_89 = arith.constant dense<0.000000e+00> : vector<128xf32>
    %128 = vector.multi_reduction <add>, %127, %cst_89 [0] : vector<64x128xf32> to vector<128xf32>
    %129 = vector.shape_cast %128 : vector<128xf32> to vector<1x128xf32>
    %cst_90 = arith.constant 1.562500e-02 : f32
    %130 = vector.broadcast %cst_90 : f32 to vector<1x128xf32>
    %131 = arith.mulf %129, %130 : vector<1x128xf32>
    %132 = arith.mulf %127, %127 : vector<64x128xf32>
    %cst_91 = arith.constant dense<0.000000e+00> : vector<128xf32>
    %133 = vector.multi_reduction <add>, %132, %cst_91 [0] : vector<64x128xf32> to vector<128xf32>
    %134 = vector.shape_cast %133 : vector<128xf32> to vector<1x128xf32>
    %cst_92 = arith.constant 1.562500e-02 : f32
    %135 = vector.broadcast %cst_92 : f32 to vector<1x128xf32>
    %136 = arith.mulf %134, %135 : vector<1x128xf32>
    %137 = arith.mulf %131, %131 : vector<1x128xf32>
    %138 = arith.subf %136, %137 : vector<1x128xf32>
    %139 = vector.broadcast %131 : vector<1x128xf32> to vector<64x128xf32>
    %140 = arith.subf %127, %139 : vector<64x128xf32>
    %cst_93 = arith.constant 9.99999974E-6 : f32
    %141 = vector.broadcast %cst_93 : f32 to vector<1x128xf32>
    %142 = arith.addf %138, %141 : vector<1x128xf32>
    %143 = math.rsqrt %142 : vector<1x128xf32>
    %144 = vector.broadcast %143 : vector<1x128xf32> to vector<64x128xf32>
    %145 = arith.mulf %140, %144 : vector<64x128xf32>
    %c1_94 = arith.constant 1 : index
    %c0_95 = arith.constant 0 : index
    %c0_96 = arith.constant 0 : index
    %146 = vector.load %arg8[%c1_94, %c0_95, %c0_96] : memref<3x1x128xf32, #tpu.memory_space<vmem>>, vector<1x1x128xf32>
    %147 = vector.shape_cast %146 : vector<1x1x128xf32> to vector<1x128xf32>
    %148 = vector.broadcast %147 : vector<1x128xf32> to vector<64x128xf32>
    %149 = arith.mulf %145, %148 : vector<64x128xf32>
    %c1_97 = arith.constant 1 : index
    %c0_98 = arith.constant 0 : index
    %c0_99 = arith.constant 0 : index
    %150 = vector.load %arg9[%c1_97, %c0_98, %c0_99] : memref<3x1x128xf32, #tpu.memory_space<vmem>>, vector<1x1x128xf32>
    %151 = vector.shape_cast %150 : vector<1x1x128xf32> to vector<1x128xf32>
    %152 = vector.broadcast %151 : vector<1x128xf32> to vector<64x128xf32>
    %153 = arith.addf %149, %152 : vector<64x128xf32>
    %cst_100 = arith.constant 0.000000e+00 : f32
    %154 = vector.broadcast %cst_100 : f32 to vector<64x128xf32>
    %155 = arith.cmpf oge, %153, %154 : vector<64x128xf32>
    %cst_101 = arith.constant 1.000000e-01 : f32
    %156 = vector.broadcast %cst_101 : f32 to vector<64x128xf32>
    %157 = arith.mulf %156, %153 : vector<64x128xf32>
    %158 = arith.select %155, %153, %157 : vector<64x128xi1>, vector<64x128xf32>
    %159 = arith.truncf %158 : vector<64x128xf32> to vector<64x128xbf16>
    %c0_102 = arith.constant 0 : index
    %c0_103 = arith.constant 0 : index
    %160 = vector.load %arg10[%c0_102, %c0_103] : memref<128x128xbf16, #tpu.memory_space<vmem>>, vector<128x128xbf16>
    %cst_104 = arith.constant dense<0.000000e+00> : vector<64x128xf32>
    %161 = tpu.matmul %159, %160, %cst_104 {dimension_numbers = #tpu.dot_dimension_numbers<[1], [0], [0], [1], [0, 0, 1, 1], [], []>} : vector<64x128xbf16>, vector<128x128xbf16>, vector<64x128xf32> -> vector<64x128xf32>
    %c0_105 = arith.constant 0 : index
    %c0_106 = arith.constant 0 : index
    %162 = vector.load %arg11[%c0_105, %c0_106] : memref<1x128xf32, #tpu.memory_space<vmem>>, vector<1x128xf32>
    %163 = vector.broadcast %162 : vector<1x128xf32> to vector<64x128xf32>
    %164 = arith.addf %161, %163 : vector<64x128xf32>
    %cst_107 = arith.constant 0.000000e+00 : f32
    %165 = vector.broadcast %cst_107 : f32 to vector<64x128xf32>
    %166 = arith.maximumf %164, %165 : vector<64x128xf32>
    %167 = arith.truncf %166 : vector<64x128xf32> to vector<64x128xbf16>
    %c0_108 = arith.constant 0 : index
    %c0_109 = arith.constant 0 : index
    %168 = vector.load %arg12[%c0_108, %c0_109] : memref<128x128xbf16, #tpu.memory_space<vmem>>, vector<128x128xbf16>
    %cst_110 = arith.constant dense<0.000000e+00> : vector<64x128xf32>
    %169 = tpu.matmul %167, %168, %cst_110 {dimension_numbers = #tpu.dot_dimension_numbers<[1], [0], [0], [1], [0, 0, 1, 1], [], []>} : vector<64x128xbf16>, vector<128x128xbf16>, vector<64x128xf32> -> vector<64x128xf32>
    %c0_111 = arith.constant 0 : index
    %c0_112 = arith.constant 0 : index
    %170 = vector.load %arg13[%c0_111, %c0_112] : memref<1x128xf32, #tpu.memory_space<vmem>>, vector<1x128xf32>
    %171 = vector.broadcast %170 : vector<1x128xf32> to vector<64x128xf32>
    %172 = arith.addf %169, %171 : vector<64x128xf32>
    %173 = arith.maximumf %86, %172 : vector<64x128xf32>
    %174 = arith.subf %86, %173 : vector<64x128xf32>
    %175 = math.exp %174 : vector<64x128xf32>
    %176 = arith.subf %172, %173 : vector<64x128xf32>
    %177 = math.exp %176 : vector<64x128xf32>
    %178 = arith.mulf %175, %92 : vector<64x128xf32>
    %179 = arith.addf %178, %177 : vector<64x128xf32>
    %180 = arith.mulf %175, %95 : vector<64x128xf32>
    %181 = arith.mulf %177, %158 : vector<64x128xf32>
    %182 = arith.addf %180, %181 : vector<64x128xf32>
    %183 = arith.truncf %158 : vector<64x128xf32> to vector<64x128xbf16>
    %c2_113 = arith.constant 2 : index
    %c0_114 = arith.constant 0 : index
    %c0_115 = arith.constant 0 : index
    %184 = vector.load %arg6[%c2_113, %c0_114, %c0_115] : memref<3x128x128xbf16, #tpu.memory_space<vmem>>, vector<1x128x128xbf16>
    %185 = vector.shape_cast %184 : vector<1x128x128xbf16> to vector<128x128xbf16>
    %cst_116 = arith.constant dense<0.000000e+00> : vector<64x128xf32>
    %186 = tpu.matmul %183, %185, %cst_116 {dimension_numbers = #tpu.dot_dimension_numbers<[1], [0], [0], [1], [0, 0, 1, 1], [], []>} : vector<64x128xbf16>, vector<128x128xbf16>, vector<64x128xf32> -> vector<64x128xf32>
    %c2_117 = arith.constant 2 : index
    %c0_118 = arith.constant 0 : index
    %c0_119 = arith.constant 0 : index
    %187 = vector.load %arg7[%c2_117, %c0_118, %c0_119] : memref<3x1x128xf32, #tpu.memory_space<vmem>>, vector<1x1x128xf32>
    %188 = vector.shape_cast %187 : vector<1x1x128xf32> to vector<1x128xf32>
    %189 = vector.broadcast %188 : vector<1x128xf32> to vector<64x128xf32>
    %190 = arith.addf %186, %189 : vector<64x128xf32>
    %c6 = arith.constant 6 : index
    %c0_120 = arith.constant 0 : index
    %c0_121 = arith.constant 0 : index
    %191 = vector.load %arg5[%c6, %c0_120, %c0_121] : memref<9x128x128xbf16, #tpu.memory_space<vmem>>, vector<1x128x128xbf16>
    %192 = vector.shape_cast %191 : vector<1x128x128xbf16> to vector<128x128xbf16>
    %cst_122 = arith.constant dense<0.000000e+00> : vector<64x128xf32>
    %193 = tpu.matmul %183, %192, %cst_122 {dimension_numbers = #tpu.dot_dimension_numbers<[1], [0], [0], [1], [0, 0, 1, 1], [], []>} : vector<64x128xbf16>, vector<128x128xbf16>, vector<64x128xf32> -> vector<64x128xf32>
    %c0_123 = arith.constant 0 : index
    %c0_124 = arith.constant 0 : index
    %c0_125 = arith.constant 0 : index
    %194 = vector.load %arg4[%c0_123, %c0_124, %c0_125] : memref<3x64x64xbf16, #tpu.memory_space<vmem>>, vector<1x64x64xbf16>
    %195 = vector.shape_cast %194 : vector<1x64x64xbf16> to vector<64x64xbf16>
    %196 = arith.truncf %193 : vector<64x128xf32> to vector<64x128xbf16>
    %cst_126 = arith.constant dense<0.000000e+00> : vector<64x128xf32>
    %197 = tpu.matmul %195, %196, %cst_126 {dimension_numbers = #tpu.dot_dimension_numbers<[1], [0], [0], [1], [0, 0, 1, 1], [], []>} : vector<64x64xbf16>, vector<64x128xbf16>, vector<64x128xf32> -> vector<64x128xf32>
    %198 = arith.addf %190, %197 : vector<64x128xf32>
    %c7 = arith.constant 7 : index
    %c0_127 = arith.constant 0 : index
    %c0_128 = arith.constant 0 : index
    %199 = vector.load %arg5[%c7, %c0_127, %c0_128] : memref<9x128x128xbf16, #tpu.memory_space<vmem>>, vector<1x128x128xbf16>
    %200 = vector.shape_cast %199 : vector<1x128x128xbf16> to vector<128x128xbf16>
    %cst_129 = arith.constant dense<0.000000e+00> : vector<64x128xf32>
    %201 = tpu.matmul %183, %200, %cst_129 {dimension_numbers = #tpu.dot_dimension_numbers<[1], [0], [0], [1], [0, 0, 1, 1], [], []>} : vector<64x128xbf16>, vector<128x128xbf16>, vector<64x128xf32> -> vector<64x128xf32>
    %c1_130 = arith.constant 1 : index
    %c0_131 = arith.constant 0 : index
    %c0_132 = arith.constant 0 : index
    %202 = vector.load %arg4[%c1_130, %c0_131, %c0_132] : memref<3x64x64xbf16, #tpu.memory_space<vmem>>, vector<1x64x64xbf16>
    %203 = vector.shape_cast %202 : vector<1x64x64xbf16> to vector<64x64xbf16>
    %204 = arith.truncf %201 : vector<64x128xf32> to vector<64x128xbf16>
    %cst_133 = arith.constant dense<0.000000e+00> : vector<64x128xf32>
    %205 = tpu.matmul %203, %204, %cst_133 {dimension_numbers = #tpu.dot_dimension_numbers<[1], [0], [0], [1], [0, 0, 1, 1], [], []>} : vector<64x64xbf16>, vector<64x128xbf16>, vector<64x128xf32> -> vector<64x128xf32>
    %206 = arith.addf %198, %205 : vector<64x128xf32>
    %c8 = arith.constant 8 : index
    %c0_134 = arith.constant 0 : index
    %c0_135 = arith.constant 0 : index
    %207 = vector.load %arg5[%c8, %c0_134, %c0_135] : memref<9x128x128xbf16, #tpu.memory_space<vmem>>, vector<1x128x128xbf16>
    %208 = vector.shape_cast %207 : vector<1x128x128xbf16> to vector<128x128xbf16>
    %cst_136 = arith.constant dense<0.000000e+00> : vector<64x128xf32>
    %209 = tpu.matmul %183, %208, %cst_136 {dimension_numbers = #tpu.dot_dimension_numbers<[1], [0], [0], [1], [0, 0, 1, 1], [], []>} : vector<64x128xbf16>, vector<128x128xbf16>, vector<64x128xf32> -> vector<64x128xf32>
    %c2_137 = arith.constant 2 : index
    %c0_138 = arith.constant 0 : index
    %c0_139 = arith.constant 0 : index
    %210 = vector.load %arg4[%c2_137, %c0_138, %c0_139] : memref<3x64x64xbf16, #tpu.memory_space<vmem>>, vector<1x64x64xbf16>
    %211 = vector.shape_cast %210 : vector<1x64x64xbf16> to vector<64x64xbf16>
    %212 = arith.truncf %209 : vector<64x128xf32> to vector<64x128xbf16>
    %cst_140 = arith.constant dense<0.000000e+00> : vector<64x128xf32>
    %213 = tpu.matmul %211, %212, %cst_140 {dimension_numbers = #tpu.dot_dimension_numbers<[1], [0], [0], [1], [0, 0, 1, 1], [], []>} : vector<64x64xbf16>, vector<64x128xbf16>, vector<64x128xf32> -> vector<64x128xf32>
    %214 = arith.addf %206, %213 : vector<64x128xf32>
    %cst_141 = arith.constant dense<0.000000e+00> : vector<128xf32>
    %215 = vector.multi_reduction <add>, %214, %cst_141 [0] : vector<64x128xf32> to vector<128xf32>
    %216 = vector.shape_cast %215 : vector<128xf32> to vector<1x128xf32>
    %cst_142 = arith.constant 1.562500e-02 : f32
    %217 = vector.broadcast %cst_142 : f32 to vector<1x128xf32>
    %218 = arith.mulf %216, %217 : vector<1x128xf32>
    %219 = arith.mulf %214, %214 : vector<64x128xf32>
    %cst_143 = arith.constant dense<0.000000e+00> : vector<128xf32>
    %220 = vector.multi_reduction <add>, %219, %cst_143 [0] : vector<64x128xf32> to vector<128xf32>
    %221 = vector.shape_cast %220 : vector<128xf32> to vector<1x128xf32>
    %cst_144 = arith.constant 1.562500e-02 : f32
    %222 = vector.broadcast %cst_144 : f32 to vector<1x128xf32>
    %223 = arith.mulf %221, %222 : vector<1x128xf32>
    %224 = arith.mulf %218, %218 : vector<1x128xf32>
    %225 = arith.subf %223, %224 : vector<1x128xf32>
    %226 = vector.broadcast %218 : vector<1x128xf32> to vector<64x128xf32>
    %227 = arith.subf %214, %226 : vector<64x128xf32>
    %cst_145 = arith.constant 9.99999974E-6 : f32
    %228 = vector.broadcast %cst_145 : f32 to vector<1x128xf32>
    %229 = arith.addf %225, %228 : vector<1x128xf32>
    %230 = math.rsqrt %229 : vector<1x128xf32>
    %231 = vector.broadcast %230 : vector<1x128xf32> to vector<64x128xf32>
    %232 = arith.mulf %227, %231 : vector<64x128xf32>
    %c2_146 = arith.constant 2 : index
    %c0_147 = arith.constant 0 : index
    %c0_148 = arith.constant 0 : index
    %233 = vector.load %arg8[%c2_146, %c0_147, %c0_148] : memref<3x1x128xf32, #tpu.memory_space<vmem>>, vector<1x1x128xf32>
    %234 = vector.shape_cast %233 : vector<1x1x128xf32> to vector<1x128xf32>
    %235 = vector.broadcast %234 : vector<1x128xf32> to vector<64x128xf32>
    %236 = arith.mulf %232, %235 : vector<64x128xf32>
    %c2_149 = arith.constant 2 : index
    %c0_150 = arith.constant 0 : index
    %c0_151 = arith.constant 0 : index
    %237 = vector.load %arg9[%c2_149, %c0_150, %c0_151] : memref<3x1x128xf32, #tpu.memory_space<vmem>>, vector<1x1x128xf32>
    %238 = vector.shape_cast %237 : vector<1x1x128xf32> to vector<1x128xf32>
    %239 = vector.broadcast %238 : vector<1x128xf32> to vector<64x128xf32>
    %240 = arith.addf %236, %239 : vector<64x128xf32>
    %cst_152 = arith.constant 0.000000e+00 : f32
    %241 = vector.broadcast %cst_152 : f32 to vector<64x128xf32>
    %242 = arith.cmpf oge, %240, %241 : vector<64x128xf32>
    %cst_153 = arith.constant 1.000000e-01 : f32
    %243 = vector.broadcast %cst_153 : f32 to vector<64x128xf32>
    %244 = arith.mulf %243, %240 : vector<64x128xf32>
    %245 = arith.select %242, %240, %244 : vector<64x128xi1>, vector<64x128xf32>
    %246 = arith.truncf %245 : vector<64x128xf32> to vector<64x128xbf16>
    %c0_154 = arith.constant 0 : index
    %c0_155 = arith.constant 0 : index
    %247 = vector.load %arg10[%c0_154, %c0_155] : memref<128x128xbf16, #tpu.memory_space<vmem>>, vector<128x128xbf16>
    %cst_156 = arith.constant dense<0.000000e+00> : vector<64x128xf32>
    %248 = tpu.matmul %246, %247, %cst_156 {dimension_numbers = #tpu.dot_dimension_numbers<[1], [0], [0], [1], [0, 0, 1, 1], [], []>} : vector<64x128xbf16>, vector<128x128xbf16>, vector<64x128xf32> -> vector<64x128xf32>
    %c0_157 = arith.constant 0 : index
    %c0_158 = arith.constant 0 : index
    %249 = vector.load %arg11[%c0_157, %c0_158] : memref<1x128xf32, #tpu.memory_space<vmem>>, vector<1x128xf32>
    %250 = vector.broadcast %249 : vector<1x128xf32> to vector<64x128xf32>
    %251 = arith.addf %248, %250 : vector<64x128xf32>
    %cst_159 = arith.constant 0.000000e+00 : f32
    %252 = vector.broadcast %cst_159 : f32 to vector<64x128xf32>
    %253 = arith.maximumf %251, %252 : vector<64x128xf32>
    %254 = arith.truncf %253 : vector<64x128xf32> to vector<64x128xbf16>
    %c0_160 = arith.constant 0 : index
    %c0_161 = arith.constant 0 : index
    %255 = vector.load %arg12[%c0_160, %c0_161] : memref<128x128xbf16, #tpu.memory_space<vmem>>, vector<128x128xbf16>
    %cst_162 = arith.constant dense<0.000000e+00> : vector<64x128xf32>
    %256 = tpu.matmul %254, %255, %cst_162 {dimension_numbers = #tpu.dot_dimension_numbers<[1], [0], [0], [1], [0, 0, 1, 1], [], []>} : vector<64x128xbf16>, vector<128x128xbf16>, vector<64x128xf32> -> vector<64x128xf32>
    %c0_163 = arith.constant 0 : index
    %c0_164 = arith.constant 0 : index
    %257 = vector.load %arg13[%c0_163, %c0_164] : memref<1x128xf32, #tpu.memory_space<vmem>>, vector<1x128xf32>
    %258 = vector.broadcast %257 : vector<1x128xf32> to vector<64x128xf32>
    %259 = arith.addf %256, %258 : vector<64x128xf32>
    %260 = arith.maximumf %173, %259 : vector<64x128xf32>
    %261 = arith.subf %173, %260 : vector<64x128xf32>
    %262 = math.exp %261 : vector<64x128xf32>
    %263 = arith.subf %259, %260 : vector<64x128xf32>
    %264 = math.exp %263 : vector<64x128xf32>
    %265 = arith.mulf %262, %179 : vector<64x128xf32>
    %266 = arith.addf %265, %264 : vector<64x128xf32>
    %267 = arith.mulf %262, %182 : vector<64x128xf32>
    %268 = arith.mulf %264, %245 : vector<64x128xf32>
    %269 = arith.addf %267, %268 : vector<64x128xf32>
    %270 = tpu.reciprocal %266 {approx = true} : vector<64x128xf32> -> vector<64x128xf32>
    %271 = arith.mulf %269, %270 : vector<64x128xf32>
    %272 = arith.truncf %271 : vector<64x128xf32> to vector<64x128xbf16>
    %c0_165 = arith.constant 0 : index
    %c0_166 = arith.constant 0 : index
    %273 = vector.load %arg14[%c0_165, %c0_166] : memref<128x128xbf16, #tpu.memory_space<vmem>>, vector<128x128xbf16>
    %cst_167 = arith.constant dense<0.000000e+00> : vector<64x128xf32>
    %274 = tpu.matmul %272, %273, %cst_167 {dimension_numbers = #tpu.dot_dimension_numbers<[1], [0], [0], [1], [0, 0, 1, 1], [], []>} : vector<64x128xbf16>, vector<128x128xbf16>, vector<64x128xf32> -> vector<64x128xf32>
    %c0_168 = arith.constant 0 : index
    %c0_169 = arith.constant 0 : index
    %275 = vector.load %arg15[%c0_168, %c0_169] : memref<1x128xf32, #tpu.memory_space<vmem>>, vector<1x128xf32>
    %276 = vector.broadcast %275 : vector<1x128xf32> to vector<64x128xf32>
    %277 = arith.addf %274, %276 : vector<64x128xf32>
    %278 = arith.mulf %277, %277 : vector<64x128xf32>
    %cst_170 = arith.constant dense<0.000000e+00> : vector<64xf32>
    %279 = vector.multi_reduction <add>, %278, %cst_170 [1] : vector<64x128xf32> to vector<64xf32>
    %280 = vector.shape_cast %279 : vector<64xf32> to vector<64x1xf32>
    %cst_171 = arith.constant 1.000000e-24 : f32
    %281 = vector.broadcast %cst_171 : f32 to vector<64x1xf32>
    %282 = arith.maximumf %280, %281 : vector<64x1xf32>
    %283 = math.rsqrt %282 : vector<64x1xf32>
    %284 = vector.broadcast %283 : vector<64x1xf32> to vector<64x128xf32>
    %285 = arith.mulf %277, %284 : vector<64x128xf32>
    %c0_172 = arith.constant 0 : index
    %c0_173 = arith.constant 0 : index
    %286 = vector.load %arg16[%c0_172, %c0_173] : memref<64x128xf32, #tpu.memory_space<vmem>>, vector<64x128xf32>
    tpu.vector_store %arg16[%c0_172, %c0_173], %285 {strides = array<i32>} : memref<64x128xf32, #tpu.memory_space<vmem>>, vector<64x128xf32>,
    return
  }
  func.func @transform_0(%arg0: i32) -> (i32, i32) {
    %c0_i32 = arith.constant 0 : i32
    %c0_i32_0 = arith.constant 0 : i32
    %c0_i32_1 = arith.constant 0 : i32
    return %c0_i32, %c0_i32_0 : i32, i32
  }
  func.func @transform_1(%arg0: i32) -> (i32, i32) {
    %c0_i32 = arith.constant 0 : i32
    %c0_i32_0 = arith.constant 0 : i32
    %c0_i32_1 = arith.constant 0 : i32
    return %c0_i32, %c0_i32_0 : i32, i32
  }
  func.func @transform_2(%arg0: i32) -> (i32, i32) {
    %c0_i32 = arith.constant 0 : i32
    %c0_i32_0 = arith.constant 0 : i32
    %c0_i32_1 = arith.constant 0 : i32
    return %c0_i32, %c0_i32_0 : i32, i32
  }
  func.func @transform_3(%arg0: i32) -> (i32, i32, i32) {
    %c0_i32 = arith.constant 0 : i32
    %c0_i32_0 = arith.constant 0 : i32
    %c0_i32_1 = arith.constant 0 : i32
    %c0_i32_2 = arith.constant 0 : i32
    return %c0_i32, %c0_i32_0, %c0_i32_1 : i32, i32, i32
  }
  func.func @transform_4(%arg0: i32) -> (i32, i32, i32) {
    %c0_i32 = arith.constant 0 : i32
    %c0_i32_0 = arith.constant 0 : i32
    %c0_i32_1 = arith.constant 0 : i32
    %c0_i32_2 = arith.constant 0 : i32
    return %c0_i32, %c0_i32_0, %c0_i32_1 : i32, i32, i32
  }
  func.func @transform_5(%arg0: i32) -> (i32, i32, i32) {
    %c0_i32 = arith.constant 0 : i32
    %c0_i32_0 = arith.constant 0 : i32
    %c0_i32_1 = arith.constant 0 : i32
    %c0_i32_2 = arith.constant 0 : i32
    return %c0_i32, %c0_i32_0, %c0_i32_1 : i32, i32, i32
  }
  func.func @transform_6(%arg0: i32) -> (i32, i32, i32) {
    %c0_i32 = arith.constant 0 : i32
    %c0_i32_0 = arith.constant 0 : i32
    %c0_i32_1 = arith.constant 0 : i32
    %c0_i32_2 = arith.constant 0 : i32
    return %c0_i32, %c0_i32_0, %c0_i32_1 : i32, i32, i32
  }
  func.func @transform_7(%arg0: i32) -> (i32, i32, i32) {
    %c0_i32 = arith.constant 0 : i32
    %c0_i32_0 = arith.constant 0 : i32
    %c0_i32_1 = arith.constant 0 : i32
    %c0_i32_2 = arith.constant 0 : i32
    return %c0_i32, %c0_i32_0, %c0_i32_1 : i32, i32, i32
  }
  func.func @transform_8(%arg0: i32) -> (i32, i32, i32) {
    %c0_i32 = arith.constant 0 : i32
    %c0_i32_0 = arith.constant 0 : i32
    %c0_i32_1 = arith.constant 0 : i32
    %c0_i32_2 = arith.constant 0 : i32
    return %c0_i32, %c0_i32_0, %c0_i32_1 : i32, i32, i32
  }
  func.func @transform_9(%arg0: i32) -> (i32, i32) {
    %c0_i32 = arith.constant 0 : i32
    %c0_i32_0 = arith.constant 0 : i32
    %c0_i32_1 = arith.constant 0 : i32
    return %c0_i32, %c0_i32_0 : i32, i32
  }
  func.func @transform_10(%arg0: i32) -> (i32, i32) {
    %c0_i32 = arith.constant 0 : i32
    %c0_i32_0 = arith.constant 0 : i32
    %c0_i32_1 = arith.constant 0 : i32
    return %c0_i32, %c0_i32_0 : i32, i32
  }
  func.func @transform_11(%arg0: i32) -> (i32, i32) {
    %c0_i32 = arith.constant 0 : i32
    %c0_i32_0 = arith.constant 0 : i32
    %c0_i32_1 = arith.constant 0 : i32
    return %c0_i32, %c0_i32_0 : i32, i32
  }
  func.func @transform_12(%arg0: i32) -> (i32, i32) {
    %c0_i32 = arith.constant 0 : i32
    %c0_i32_0 = arith.constant 0 : i32
    %c0_i32_1 = arith.constant 0 : i32
    return %c0_i32, %c0_i32_0 : i32, i32
  }
  func.func @transform_13(%arg0: i32) -> (i32, i32) {
    %c0_i32 = arith.constant 0 : i32
    %c0_i32_0 = arith.constant 0 : i32
    %c0_i32_1 = arith.constant 0 : i32
    return %c0_i32, %c0_i32_0 : i32, i32
  }
  func.func @transform_14(%arg0: i32) -> (i32, i32) {
    %c0_i32 = arith.constant 0 : i32
    %c0_i32_0 = arith.constant 0 : i32
    %c0_i32_1 = arith.constant 0 : i32
    return %c0_i32, %c0_i32_0 : i32, i32
  }
  func.func @transform_15(%arg0: i32) -> (i32, i32) {
    %c0_i32 = arith.constant 0 : i32
    %c0_i32_0 = arith.constant 0 : i32
    %c0_i32_1 = arith.constant 0 : i32
    return %c0_i32, %c0_i32_0 : i32, i32
  }
}

</mosaic_0001>

<bundles_post_ra>
// kernel: tpu_custom_call.1
= control target key start
LH: loop header
LB: loop body
LE: loop exit
PB: predicated region body
PF: predicated region fallthrough
CT: control target
= control target key end

     0   :  { %20 = vsyncpa [#allocation3], 0  ;;  %s6911_s0 = inlined_call_operand.hbm [shape: bf16[64,128], index: 0, kind: input, shape index: {}]   ;;  %s6912_s1 = inlined_call_operand.hbm [shape: bf16[128,128], index: 1, kind: input, shape index: {}]   ;;  %s6913_s2 = inlined_call_operand.vmem [shape: f32[1,128], index: 2, kind: input, shape index: {}]   ;;  %s6914_s3 = inlined_call_operand.hbm [shape: bf16[3,64,64], index: 3, kind: input, shape index: {}]   ;;  %s6915_s4 = inlined_call_operand.hbm [shape: bf16[9,128,128], index: 4, kind: input, shape index: {}]   ;;  %s6916_s5 = inlined_call_operand.hbm [shape: bf16[3,128,128], index: 5, kind: input, shape index: {}]   ;;  %s6917_s6 = inlined_call_operand.vmem [shape: f32[3,1,128], index: 6, kind: input, shape index: {}]   ;;  %s6918_s7 = inlined_call_operand.vmem [shape: f32[3,1,128], index: 7, kind: input, shape index: {}]   ;;  %s6919_s8 = inlined_call_operand.vmem [shape: f32[3,1,128], index: 8, kind: input, shape index: {}]   ;;  %s6920_s9 = inlined_call_operand.hbm [shape: bf16[128,128], index: 9, kind: input, shape index: {}]   ;;  %s6921_s10 = inlined_call_operand.vmem [shape: f32[1,128], index: 10, kind: input, shape index: {}]   ;;  %s6922_s11 = inlined_call_operand.hbm [shape: bf16[128,128], index: 11, kind: input, shape index: {}]   ;;  %s6923_s12 = inlined_call_operand.vmem [shape: f32[1,128], index: 12, kind: input, shape index: {}]   ;;  %s6924_s13 = inlined_call_operand.hbm [shape: bf16[128,128], index: 13, kind: input, shape index: {}]   ;;  %s6925_s14 = inlined_call_operand.vmem [shape: f32[1,128], index: 14, kind: input, shape index: {}]   ;;  %s6926_s15 = inlined_call_operand.hbm [shape: f32[64,128], index: 15, kind: output, shape index: {}]  }
   0x1   :  { %21 = vsyncpa [#allocation6], 0 }
   0x2   :  { %22 = vsyncpa [#allocation9], 0 }
   0x3   :  { %23 = vsyncpa [#allocation12], 0 }
   0x4   :  { %24 = vsyncpa [#allocation15], 0 }
   0x5   :  { %25 = vsyncpa [#allocation4], 0  ;;  %s5911_s18 = smov [#allocation5]   ;;  %s5912_s20 = smov [#allocation8]  }
   0x6   :  { %s43_s19 = sshll.u32 %s5911_s18, 4  ;;  %s69_s21 = sshll.u32 %s5912_s20, 4  ;;  %s44_s19 = int_to_ptr.vmem [resolvable:$true] %s43_s19  ;;  %s6004_s21 = int_to_ptr.vmem [resolvable:$true] %s69_s21 }
   0x7   :  { %s5701_s24 = scalar_lea.hbm %s6912_s1, 1024 }
   0x8   :  { %p5702_p0 = scmp.ne.s32.totalorder %s6912_s1, %s5701_s24  ;;  %p5705_p1 = scmp.lt.u32.totalorder %s5701_s24, %s6912_s1 }
   0xa   :  { %p5707_p2 = pnand %p5705_p1, %p5702_p0 }
   0xc   :  { %5710 = shalt.err (!%p5707_p2)
}
   0xd   :  { %s5711_s29 = scalar_lea.vmem %s44_s19, 1024  ;;  %p5716_p4 = scmp.lt.s32.totalorder %s44_s19, %s44_s19 }
   0xe   :  { %p5712_p3 = scmp.ne.s32.totalorder %s44_s19, %s5711_s29  ;;  %p5717_p5 = scmp.lt.s32.totalorder %s5711_s29, %s5711_s29 }
  0x10   :  { %p5718_p6 = por %p5717_p5, %p5716_p4 }
  0x12   :  { %p5719_p7 = pnand %p5718_p6, %p5712_p3 }
  0x14   :  { %5722 = shalt.err (!%p5719_p7)
}
  0x15   :  { %s5913_s30 = smov 64   ;;  %s5914_s16 = smov 4  }
  0x16   :  { %49 = dma.hbm_to_vmem [thread:$0]  %s6912_s1, 1024, %s44_s19, [#allocation6], %s5913_s30, %s5913_s30, %s5914_s16  }
  0x17   :  { %s5723_s23 = scalar_lea.hbm %s6915_s4, 9216 }
  0x18   :  { %p5724_p8 = scmp.ne.s32.totalorder %s6915_s4, %s5723_s23  ;;  %p5727_p9 = scmp.lt.u32.totalorder %s5723_s23, %s6915_s4 }
  0x1a   :  { %p5729_p10 = pnand %p5727_p9, %p5724_p8 }
  0x1c   :  { %5732 = shalt.err (!%p5729_p10)
}
  0x1d   :  { %s5733_s28 = scalar_lea.vmem %s6004_s21, 9216  ;;  %p5738_p12 = scmp.lt.s32.totalorder %s6004_s21, %s6004_s21 }
  0x1e   :  { %p5734_p11 = scmp.ne.s32.totalorder %s6004_s21, %s5733_s28  ;;  %p5739_p13 = scmp.lt.s32.totalorder %s5733_s28, %s5733_s28 }
  0x20   :  { %p5740_p0 = por %p5739_p13, %p5738_p12 }
  0x22   :  { %p5741_p1 = pnand %p5740_p0, %p5734_p11 }
  0x24   :  { %5744 = shalt.err (!%p5741_p1)
}
  0x25   :  { %75 = dma.hbm_to_vmem [thread:$0]  %s6915_s4, 9216, %s6004_s21, [#allocation9], %s5913_s30, %s5913_s30, %s5914_s16  }
  0x26   :  { %s5915_s29 = smov [#allocation11]   ;;  %s5916_s18 = smov [#allocation2]  }
  0x27   :  { %s99_s17 = sshll.u32 %s5915_s29, 4  ;;  %s31_s20 = sshll.u32 %s5916_s18, 4  ;;  %s100_s17 = int_to_ptr.vmem [resolvable:$true] %s99_s17  ;;  %s6041_s20 = int_to_ptr.vmem [resolvable:$true] %s31_s20 }
  0x28   :  { %s5745_s24 = scalar_lea.hbm %s6920_s9, 1024 }
  0x29   :  { %p5746_p2 = scmp.ne.s32.totalorder %s6920_s9, %s5745_s24  ;;  %p5749_p3 = scmp.lt.u32.totalorder %s5745_s24, %s6920_s9 }
  0x2b   :  { %p5751_p4 = pnand %p5749_p3, %p5746_p2 }
  0x2d   :  { %5754 = shalt.err (!%p5751_p4)
}
  0x2e   :  { %s5755_s4 = scalar_lea.vmem %s100_s17, 1024  ;;  %p5760_p6 = scmp.lt.s32.totalorder %s100_s17, %s100_s17 }
  0x2f   :  { %p5756_p5 = scmp.ne.s32.totalorder %s100_s17, %s5755_s4  ;;  %p5761_p7 = scmp.lt.s32.totalorder %s5755_s4, %s5755_s4 }
  0x31   :  { %p5762_p8 = por %p5761_p7, %p5760_p6 }
  0x33   :  { %p5763_p9 = pnand %p5762_p8, %p5756_p5 }
  0x35   :  { %5766 = shalt.err (!%p5763_p9)
}
  0x36   :  { %105 = dma.hbm_to_vmem [thread:$0]  %s6920_s9, 1024, %s100_s17, [#allocation12], %s5913_s30, %s5913_s30, %s5914_s16  }
  0x37   :  { %s5767_s18 = scalar_lea.hbm %s6911_s0, 512 }
  0x38   :  { %p5768_p10 = scmp.ne.s32.totalorder %s6911_s0, %s5767_s18  ;;  %p5771_p11 = scmp.lt.u32.totalorder %s5767_s18, %s6911_s0 }
  0x3a   :  { %p5773_p12 = pnand %p5771_p11, %p5768_p10 }
  0x3c   :  { %5776 = shalt.err (!%p5773_p12)
}
  0x3d   :  { %s5777_s26 = scalar_lea.vmem %s6041_s20, 512  ;;  %p5782_p0 = scmp.lt.s32.totalorder %s6041_s20, %s6041_s20 }
  0x3e   :  { %p5778_p13 = scmp.ne.s32.totalorder %s6041_s20, %s5777_s26  ;;  %p5783_p1 = scmp.lt.s32.totalorder %s5777_s26, %s5777_s26 }
  0x40   :  { %p5784_p2 = por %p5783_p1, %p5782_p0 }
  0x42   :  { %p5785_p3 = pnand %p5784_p2, %p5778_p13 }
  0x44   :  { %5788 = shalt.err (!%p5785_p3)
}
  0x45   :  { %37 = dma.hbm_to_vmem [thread:$0]  %s6911_s0, 512, %s6041_s20, [#allocation3], %s5913_s30, %s5913_s30, %s5914_s16  }
  0x46   :  { %s5917_s27 = smov [#allocation7]   ;;  %s5918_s4 = smov [#allocation10]  }
  0x47   :  { %s57_s28 = sshll.u32 %s5917_s27, 4  ;;  %s81_s21 = sshll.u32 %s5918_s4, 4  ;;  %s58_s28 = int_to_ptr.vmem [resolvable:$true] %s57_s28  ;;  %s6078_s21 = int_to_ptr.vmem [resolvable:$true] %s81_s21 }
  0x48   :  { %s5789_s29 = scalar_lea.hbm %s6914_s3, 1536 }
  0x49   :  { %p5790_p4 = scmp.ne.s32.totalorder %s6914_s3, %s5789_s29  ;;  %p5793_p5 = scmp.lt.u32.totalorder %s5789_s29, %s6914_s3 }
  0x4b   :  { %p5795_p6 = pnand %p5793_p5, %p5790_p4 }
  0x4d   :  { %5798 = shalt.err (!%p5795_p6)
}
  0x4e   :  { %s5799_s0 = scalar_lea.vmem %s58_s28, 1536  ;;  %p5804_p8 = scmp.lt.s32.totalorder %s58_s28, %s58_s28 }
  0x4f   :  { %p5800_p7 = scmp.ne.s32.totalorder %s58_s28, %s5799_s0  ;;  %p5805_p9 = scmp.lt.s32.totalorder %s5799_s0, %s5799_s0 }
  0x51   :  { %p5806_p10 = por %p5805_p9, %p5804_p8 }
  0x53   :  { %p5807_p11 = pnand %p5806_p10, %p5800_p7 }
  0x55   :  { %5810 = shalt.err (!%p5807_p11)
}
  0x56   :  { %63 = dma.hbm_to_vmem [thread:$0]  %s6914_s3, 1536, %s58_s28, [#allocation6], %s5913_s30, %s5913_s30, %s5914_s16  }
  0x57   :  { %s5811_s17 = scalar_lea.hbm %s6916_s5, 3072 }
  0x58   :  { %p5812_p12 = scmp.ne.s32.totalorder %s6916_s5, %s5811_s17  ;;  %p5815_p13 = scmp.lt.u32.totalorder %s5811_s17, %s6916_s5 }
  0x5a   :  { %p5817_p0 = pnand %p5815_p13, %p5812_p12 }
  0x5c   :  { %5820 = shalt.err (!%p5817_p0)
}
  0x5d   :  { %s5821_s29 = scalar_lea.vmem %s6078_s21, 3072  ;;  %p5826_p2 = scmp.lt.s32.totalorder %s6078_s21, %s6078_s21 }
  0x5e   :  { %p5822_p1 = scmp.ne.s32.totalorder %s6078_s21, %s5821_s29  ;;  %p5827_p3 = scmp.lt.s32.totalorder %s5821_s29, %s5821_s29 }
  0x60   :  { %p5828_p4 = por %p5827_p3, %p5826_p2 }
  0x62   :  { %p5829_p5 = pnand %p5828_p4, %p5822_p1 }
  0x64   :  { %5832 = shalt.err (!%p5829_p5)
}
  0x65   :  { %87 = dma.hbm_to_vmem [thread:$0]  %s6916_s5, 3072, %s6078_s21, [#allocation9], %s5913_s30, %s5913_s30, %s5914_s16  }
  0x66   :  { %s5919_s18 = smov [#allocation13]   ;;  %s5920_s23 = smov [#allocation14]  }
  0x67   :  { %s113_s22 = sshll.u32 %s5919_s18, 4  ;;  %s127_s24 = sshll.u32 %s5920_s23, 4  ;;  %s114_s22 = int_to_ptr.vmem [resolvable:$true] %s113_s22  ;;  %s6115_s24 = int_to_ptr.vmem [resolvable:$true] %s127_s24 }
  0x68   :  { %s5833_s25 = scalar_lea.hbm %s6922_s11, 1024 }
  0x69   :  { %p5834_p6 = scmp.ne.s32.totalorder %s6922_s11, %s5833_s25  ;;  %p5837_p7 = scmp.lt.u32.totalorder %s5833_s25, %s6922_s11 }
  0x6b   :  { %p5839_p8 = pnand %p5837_p7, %p5834_p6 }
  0x6d   :  { %5842 = shalt.err (!%p5839_p8)
}
  0x6e   :  { %s5843_s5 = scalar_lea.vmem %s114_s22, 1024  ;;  %p5848_p10 = scmp.lt.s32.totalorder %s114_s22, %s114_s22 }
  0x6f   :  { %p5844_p9 = scmp.ne.s32.totalorder %s114_s22, %s5843_s5  ;;  %p5849_p11 = scmp.lt.s32.totalorder %s5843_s5, %s5843_s5 }
  0x71   :  { %p5850_p12 = por %p5849_p11, %p5848_p10 }
  0x73   :  { %p5851_p13 = pnand %p5850_p12, %p5844_p9 }
  0x75   :  { %5854 = shalt.err (!%p5851_p13)
}
  0x76   :  { %119 = dma.hbm_to_vmem [thread:$0]  %s6922_s11, 1024, %s114_s22, [#allocation12], %s5913_s30, %s5913_s30, %s5914_s16  }
  0x77   :  { %s5855_s29 = scalar_lea.hbm %s6924_s13, 1024 }
  0x78   :  { %p5856_p0 = scmp.ne.s32.totalorder %s6924_s13, %s5855_s29  ;;  %p5859_p1 = scmp.lt.u32.totalorder %s5855_s29, %s6924_s13 }
  0x7a   :  { %p5861_p2 = pnand %p5859_p1, %p5856_p0 }
  0x7c   :  { %5864 = shalt.err (!%p5861_p2)
}
  0x7d   :  { %s5865_s0 = scalar_lea.vmem %s6115_s24, 1024  ;;  %p5870_p4 = scmp.lt.s32.totalorder %s6115_s24, %s6115_s24 }
  0x7e   :  { %p5866_p3 = scmp.ne.s32.totalorder %s6115_s24, %s5865_s0  ;;  %p5871_p5 = scmp.lt.s32.totalorder %s5865_s0, %s5865_s0 }
  0x80   :  { %p5872_p6 = por %p5871_p5, %p5870_p4 }
  0x82   :  { %p5873_p7 = pnand %p5872_p6, %p5866_p3 }
  0x84   :  { %5876 = shalt.err (!%p5873_p7)
}
  0x85   :  { %133 = dma.hbm_to_vmem [thread:$0]  %s6924_s13, 1024, %s6115_s24, [#allocation15], %s5913_s30, %s5913_s30, %s5914_s16  }
  0x86   :  { %5899 = dma.done.wait [#allocation3], 512  }
  0x87   :  { %5900 = vsyncadd [#allocation3], 4294966784 }
  0x88   :  { %5901 = dma.done.wait [#allocation6], 2560  }
  0x89   :  { %5902 = vsyncadd [#allocation6], 4294964736 }
  0x8a   :  { %5903 = dma.done.wait [#allocation9], 12288  }
  0x8b   :  { %5904 = vsyncadd [#allocation9], 4294955008 }
  0x8c   :  { %5905 = dma.done.wait [#allocation12], 2048  }
  0x8d   :  { %5906 = vsyncadd [#allocation12], 4294965248 }
  0x8e   :  { %5907 = dma.done.wait [#allocation15], 1024  }
  0x8f   :  { %5908 = vsyncadd [#allocation15], 4294966272  ;;  %v5393_v0 = vld [vmem:[#allocation5] sm:$0xff]   ;;  %v5394_v1 = vld [vmem:[#allocation5 + $0x8] sm:$0xff]   ;;  %vm630_vm0 = vcmask 523264  }
  0x90   :  { %4660 = vmatprep.subr.bf16.mxu0 %v5393_v0  ;;  %v5395_v2 = vld [vmem:[#allocation5 + $0x10] sm:$0xff]   ;;  %v5396_v3 = vld [vmem:[#allocation5 + $0x18] sm:$0xff]   ;;  %v5401_v4 = vld [vmem:[#allocation2] sm:$0xff]  }
  0x91   :  { %4661 = vmatpush3.bf16.msra.mxu0 %v5393_v0  ;;  %4676 = vmatprep.mubr.bf16.mxu0 %v5401_v4  ;;  %v5397_v5 = vld [vmem:[#allocation5 + $0x20] sm:$0xff]   ;;  %v5408_v7 = vld [vmem:[#allocation10 + $0x8] sm:$0xff]   ;;  %v5410_v9 = vld [vmem:[#allocation10 + $0x10] sm:$0xff]  }
  0x92   :  { %4662 = vmatprep.subr.bf16.mxu0 %v5394_v1  ;;  %v5406_v6 = vld [vmem:[#allocation10] sm:$0xff]   ;;  %v5398_v8 = vld [vmem:[#allocation5 + $0x28] sm:$0xff]   ;;  %v5399_v10 = vld [vmem:[#allocation5 + $0x30] sm:$0xff]  }
  0x93   :  { %4684 = vmatprep.subr.bf16.mxu1 %v5406_v6  ;;  %v5412_v11 = vld [vmem:[#allocation10 + $0x18] sm:$0xff]   ;;  %v5414_v13 = vld [vmem:[#allocation10 + $0x20] sm:$0xff]   ;;  %v5416_v15 = vld [vmem:[#allocation10 + $0x28] sm:$0xff]  }
  0x94   :  { %4685 = vmatpush3.bf16.msra.mxu1 %v5406_v6  ;;  %v5400_v12 = vld [vmem:[#allocation5 + $0x38] sm:$0xff]   ;;  %v5405_v14 = vld [vmem:[#allocation8] sm:$0xff]   ;;  %v5402_v16 = vld [vmem:[#allocation2 + $0x8] sm:$0xff]  }
  0x95   :  { %4663 = vmatpush3.bf16.msra.mxu0 %v5394_v1  ;;  %4686 = vmatprep.subr.bf16.mxu1 %v5408_v7  ;;  %v5403_v17 = vld [vmem:[#allocation2 + $0x10] sm:$0xff]   ;;  %v5407_v18 = vld [vmem:[#allocation8 + $0x8] sm:$0xff]   ;;  %v5404_v20 = vld [vmem:[#allocation2 + $0x18] sm:$0xff]  }
  0x96   :  { %4664 = vmatprep.subr.bf16.mxu0 %v5395_v2  ;;  %v5409_v19 = vld [vmem:[#allocation8 + $0x10] sm:$0xff]   ;;  %v5411_v21 = vld [vmem:[#allocation8 + $0x18] sm:$0xff]   ;;  %v5413_v22 = vld [vmem:[#allocation8 + $0x20] sm:$0xff]  }
  0x97   :  { %v5415_v23 = vld [vmem:[#allocation8 + $0x28] sm:$0xff]   ;;  %v5417_v24 = vld [vmem:[#allocation8 + $0x30] sm:$0xff]   ;;  %v5419_v26 = vld [vmem:[#allocation8 + $0x38] sm:$0xff]  }
  0x98   :  { %4687 = vmatpush3.bf16.msra.mxu1 %v5408_v7  ;;  %v5418_v25 = vld [vmem:[#allocation10 + $0x30] sm:$0xff]   ;;  %v5420_v27 = vld [vmem:[#allocation10 + $0x38] sm:$0xff]   ;;  %v5421_v28 = vld [vmem:[#allocation8 + $0x80] sm:$0xff]  }
  0x99   :  { %4665 = vmatpush3.bf16.msra.mxu0 %v5395_v2  ;;  %4688 = vmatprep.subr.bf16.mxu1 %v5410_v9  ;;  %v4149_v30 = vld [vmem:[%s6913_s2] ss:$0 sm:$0xff]  ;;  %v5422_v40 = vld [vmem:[#allocation8 + $0x88] sm:$0xff]   ;;  %v5423_v47 = vld [vmem:[#allocation8 + $0x90] sm:$0xff]  }
  0x9a   :  { %4666 = vmatprep.subr.bf16.mxu0 %v5396_v3  ;;  %v5424_v52 = vld [vmem:[#allocation8 + $0x98] sm:$0xff]   ;;  %v5425_v53 = vld [vmem:[#allocation8 + $0xa0] sm:$0xff]   ;;  %v5426_v54 = vld [vmem:[#allocation8 + $0xa8] sm:$0xff]  }
  0x9b   :  { %v5427_v55 = vld [vmem:[#allocation8 + $0xb0] sm:$0xff]   ;;  %v5428_v56 = vld [vmem:[#allocation8 + $0xb8] sm:$0xff]   ;;  %v6175_v57 = vld [vmem:[#allocation7] sm:$0xff]  }
  0x9c   :  { %4689 = vmatpush3.bf16.msra.mxu1 %v5410_v9  ;;  %v5431_v6 = vld [vmem:[#allocation8 + $0x40] sm:$0xff]   ;;  %v6179_v7 = vld [vmem:[#allocation7 + $0x8] sm:$0xff]  }
  0x9d   :  { %4667 = vmatpush3.bf16.msra.mxu0 %v5396_v3  ;;  %4690 = vmatprep.subr.bf16.mxu1 %v5412_v11  ;;  %v5432_v9 = vld [vmem:[#allocation8 + $0x48] sm:$0xff]  }
  0x9e   :  { %4668 = vmatprep.subr.bf16.mxu0 %v5397_v5 }
  0xa0   :  { %4691 = vmatpush3.bf16.msra.mxu1 %v5412_v11  ;;  %v6187_v11 = vld [vmem:[#allocation7 + $0x18] sm:$0xff]  }
  0xa1   :  { %4669 = vmatpush3.bf16.msra.mxu0 %v5397_v5  ;;  %4692 = vmatprep.subr.bf16.mxu1 %v5414_v13 }
  0xa2   :  { %4670 = vmatprep.subr.bf16.mxu0 %v5398_v8 }
  0xa4   :  { %4693 = vmatpush3.bf16.msra.mxu1 %v5414_v13 }
  0xa5   :  { %4671 = vmatpush3.bf16.msra.mxu0 %v5398_v8  ;;  %4694 = vmatprep.subr.bf16.mxu1 %v5416_v15  ;;  %v6181_v8 = vld [vmem:[#allocation7 + $0x10] sm:$0xff]  }
  0xa6   :  { %4672 = vmatprep.subr.bf16.mxu0 %v5399_v10 }
  0xa8   :  { %4695 = vmatpush3.bf16.msra.mxu1 %v5416_v15 }
  0xa9   :  { %4673 = vmatpush3.bf16.msra.mxu0 %v5399_v10  ;;  %4696 = vmatprep.subr.bf16.mxu1 %v5418_v25  ;;  %v5435_v10 = vld [vmem:[#allocation8 + $0x50] sm:$0xff]  }
  0xaa   :  { %4674 = vmatprep.subr.bf16.mxu0 %v5400_v12 }
  0xac   :  { %4697 = vmatpush3.bf16.msra.mxu1 %v5418_v25 }
  0xad   :  { %4675 = vmatpush3.bf16.msra.mxu0 %v5400_v12  ;;  %4698 = vmatprep.subr.bf16.mxu1 %v5420_v27  ;;  %v5436_v12 = vld [vmem:[#allocation8 + $0x58] sm:$0xff]  }
  0xae   :  { %4708 = vmatprep.subr.bf16.mxu0 %v5405_v14 }
  0xb0   :  { %4677 = vmatmul.mubr.bf16.vlgmr.msra.gmra.mrb[0].mxu0 %v5402_v16  ;;  %4699 = vmatpush3.bf16.msra.mxu1 %v5420_v27 }
  0xb1   :  { %4680 = vmatprep.mubr.bf16.mxu0 %v5403_v17  ;;  %4709 = vmatpush3.bf16.msra.mxu0 %v5405_v14  ;;  %v5437_v14 = vld [vmem:[#allocation8 + $0x60] sm:$0xff]  }
  0xb2   :  { %4710 = vmatprep.subr.bf16.mxu0 %v5407_v18 }
  0xb5   :  { %4711 = vmatpush3.bf16.msra.mxu0 %v5407_v18 }
  0xb6   :  { %4712 = vmatprep.subr.bf16.mxu0 %v5409_v19 }
  0xb8   :  { %4681 = vmatmul.mubr.bf16.gmra.mrb[4].mxu0 %v5404_v20  ;;  %v5438_v20 = vld [vmem:[#allocation8 + $0x68] sm:$0xff]  }
  0xb9   :  { %4713 = vmatpush3.bf16.msra.mxu0 %v5409_v19 }
  0xba   :  { %4714 = vmatprep.subr.bf16.mxu0 %v5411_v21 }
  0xbd   :  { %4715 = vmatpush3.bf16.msra.mxu0 %v5411_v21 }
  0xbe   :  { %4716 = vmatprep.subr.bf16.mxu0 %v5413_v22 }
  0xc1   :  { %4717 = vmatpush3.bf16.msra.mxu0 %v5413_v22  ;;  %v5439_v22 = vld [vmem:[#allocation8 + $0x70] sm:$0xff]  }
  0xc2   :  { %4718 = vmatprep.subr.bf16.mxu0 %v5415_v23 }
  0xc5   :  { %4719 = vmatpush3.bf16.msra.mxu0 %v5415_v23 }
  0xc6   :  { %4720 = vmatprep.subr.bf16.mxu0 %v5417_v24 }
  0xc9   :  { %4721 = vmatpush3.bf16.msra.mxu0 %v5417_v24 }
  0xca   :  { %4722 = vmatprep.subr.bf16.mxu0 %v5419_v26 }
  0xcd   :  { %4723 = vmatpush3.bf16.msra.mxu0 %v5419_v26 }
  0xce   :  { %4788 = vmatprep.subr.bf16.mxu0 %v5421_v28 }
 0x183   :  { %v4678_v29 = vpop.f32.mrb[0].mxu0 }
 0x184   :  { %v298_v31 = vpop.f32.mrb[1].mxu0  ;;  %v307_v33 = vadd.f32 %v4678_v29, %v4149_v30  ;;  %v6195_v29 = vld [vmem:[#allocation7 + $0x20] sm:$0xff]  }
 0x185   :  { %v4679_v32 = vpop.f32.mrb[2].mxu0  ;;  %v299_v36 = vadd.f32 %v4149_v30, %v298_v31 }
 0x186   :  { %v310_v34 = vadd.f32 %v4679_v32, %v4149_v30  ;;  %v301_v35 = vpop.f32.mrb[3].mxu0 }
 0x187   :  { %v302_v37 = vadd.f32 %v4149_v30, %v301_v35 }
 0x188   :  { %v6155_v38 = vpack.c.bf16 %v310_v34, %v307_v33 }
 0x189   :  { %v6157_v39 = vpack.c.bf16 %v302_v37, %v299_v36 }
 0x18b   :  { %v4682_v41 = vpop.f32.mrb[4].mxu0  ;;  %4700 = vmatprep.mubr.bf16.mxu1 %v6157_v39  ;;  %4724 = vmatprep.mubr.bf16.mxu0 %v6157_v39 }
 0x18c   :  { %v314_v42 = vpop.f32.mrb[5].mxu0  ;;  %4701 = vmatmul.mubr.bf16.vlgmr.msra.gmra.mrb[0].mxu1 %v6155_v38  ;;  %4725 = vmatmul.mubr.bf16.vlgmr.msra.gmra.mrb[8].mxu0 %v6155_v38  ;;  %v323_v44 = vadd.f32 %v4682_v41, %v4149_v30 }
 0x18d   :  { %4789 = vmatpush3.bf16.msra.mxu0 %v5421_v28  ;;  %v4683_v43 = vpop.f32.mrb[6].mxu0  ;;  %v315_v48 = vadd.f32 %v4149_v30, %v314_v42  ;;  %v5440_v28 = vld [vmem:[#allocation8 + $0x78] sm:$0xff]   ;;  %v6199_v42 = vld [vmem:[#allocation7 + $0x28] sm:$0xff]  }
 0x18e   :  { %v326_v45 = vadd.f32 %v4683_v43, %v4149_v30  ;;  %v317_v46 = vpop.f32.mrb[7].mxu0  ;;  %4790 = vmatprep.subr.bf16.mxu0 %v5422_v40  ;;  %v6201_v43 = vld [vmem:[#allocation7 + $0x30] sm:$0xff]  }
 0x18f   :  { %v318_v49 = vadd.f32 %v4149_v30, %v317_v46  ;;  %v6215_v46 = vld [vmem:[#allocation7 + $0x48] sm:$0xff]  }
 0x190   :  { %v6163_v50 = vpack.c.bf16 %v326_v45, %v323_v44  ;;  %v6207_v44 = vld [vmem:[#allocation7 + $0x38] sm:$0xff]   ;;  %v6209_v45 = vld [vmem:[#allocation7 + $0x40] sm:$0xff]  }
 0x191   :  { %v6165_v51 = vpack.c.bf16 %v318_v49, %v315_v48  ;;  %4791 = vmatpush3.bf16.msra.mxu0 %v5422_v40  ;;  %v6223_v48 = vld [vmem:[#allocation7 + $0x58] sm:$0xff]   ;;  %v6227_v49 = vld [vmem:[#allocation11] sm:$0xff]  }
 0x192   :  { %4792 = vmatprep.subr.bf16.mxu0 %v5423_v47 }
 0x193   :  { %4704 = vmatprep.mubr.bf16.mxu1 %v6165_v51  ;;  %4728 = vmatprep.mubr.bf16.mxu0 %v6165_v51 }
 0x194   :  { %4705 = vmatmul.mubr.bf16.gmra.mrb[4].mxu1 %v6163_v50  ;;  %4729 = vmatmul.mubr.bf16.gmra.mrb[12].mxu0 %v6163_v50 }
 0x195   :  { %4793 = vmatpush3.bf16.msra.mxu0 %v5423_v47  ;;  %4804 = vmatprep.mubr.bf16.mxu0 %v6157_v39  ;;  %v6217_v47 = vld [vmem:[#allocation7 + $0x50] sm:$0xff]  }
 0x196   :  { %4794 = vmatprep.subr.bf16.mxu0 %v5424_v52  ;;  %4740 = vmatprep.mubr.msk.bf16.mxu1 %vm630_vm0, %v6175_v57 }
 0x199   :  { %4795 = vmatpush3.bf16.msra.mxu0 %v5424_v52  ;;  %v6239_v52 = vld [vmem:[#allocation11 + $0x18] sm:$0xff]  }
 0x19a   :  { %4796 = vmatprep.subr.bf16.mxu0 %v5425_v53 }
 0x19d   :  { %4797 = vmatpush3.bf16.msra.mxu0 %v5425_v53  ;;  %v6243_v53 = vld [vmem:[#allocation11 + $0x20] sm:$0xff]  }
 0x19e   :  { %4798 = vmatprep.subr.bf16.mxu0 %v5426_v54 }
 0x1a1   :  { %4799 = vmatpush3.bf16.msra.mxu0 %v5426_v54  ;;  %v6247_v54 = vld [vmem:[#allocation11 + $0x28] sm:$0xff]  }
 0x1a2   :  { %4800 = vmatprep.subr.bf16.mxu0 %v5427_v55 }
 0x1a5   :  { %4801 = vmatpush3.bf16.msra.mxu0 %v5427_v55  ;;  %v6251_v55 = vld [vmem:[#allocation11 + $0x30] sm:$0xff]  }
 0x1a6   :  { %4802 = vmatprep.subr.bf16.mxu0 %v5428_v56 }
 0x1a9   :  { %4803 = vmatpush3.bf16.msra.mxu0 %v5428_v56  ;;  %v6255_v56 = vld [vmem:[#allocation11 + $0x38] sm:$0xff]  }
 0x1aa   :  { %4828 = vmatprep.subr.bf16.mxu0 %v6227_v49 }
 0x1ac   :  { %4805 = vmatmul.mubr.bf16.vlgmr.msra.gmra.mrb[16].mxu0 %v6155_v38 }
 0x1ad   :  { %4808 = vmatprep.mubr.bf16.mxu0 %v6165_v51  ;;  %4829 = vmatpush3.bf16.msra.mxu0 %v6227_v49 }
 0x1b4   :  { %4809 = vmatmul.mubr.bf16.gmra.mrb[20].mxu0 %v6163_v50 }
 0x25f   :  { %v4726_v58 = vpop.f32.mrb[8].mxu0 }
 0x260   :  { %v567_v59 = vpop.f32.mrb[9].mxu0 }
 0x261   :  { %v4727_v60 = vpop.f32.mrb[10].mxu0 }
 0x262   :  { %v607_v61 = vpack.c.bf16 %v4727_v60, %v4726_v58  ;;  %v570_v62 = vpop.f32.mrb[11].mxu0  ;;  %v6259_v58 = vld [vmem:[#allocation10 + $0x40] sm:$0xff]   ;;  %v6264_v60 = vld [vmem:[#allocation13 + $0x8] sm:$0xff]  }
 0x263   :  { %v606_v63 = vpack.c.bf16 %v570_v62, %v567_v59  ;;  %v6262_v59 = vld [vmem:[#allocation13] sm:$0xff]   ;;  %v6273_v62 = vld [vmem:[#allocation13 + $0x18] sm:$0xff]  }
 0x265   :  { %4732 = vmatprep.subr.bf16.mxu1 %v606_v63 }
 0x266   :  { %4733 = vmatpush3.bf16.msra.mxu1 %v606_v63  ;;  %v6277_v63 = vld [vmem:[#allocation13 + $0x20] sm:$0xff]  }
 0x267   :  { %v4730_v0 = vpop.f32.mrb[12].mxu0  ;;  %4734 = vmatprep.subr.bf16.mxu1 %v607_v61 }
 0x268   :  { %v583_v1 = vpop.f32.mrb[13].mxu0 }
 0x269   :  { %v4731_v2 = vpop.f32.mrb[14].mxu0 }
 0x26a   :  { %v609_v3 = vpack.c.bf16 %v4731_v2, %v4730_v0  ;;  %v586_v4 = vpop.f32.mrb[15].mxu0  ;;  %4735 = vmatpush3.bf16.msra.mxu1 %v607_v61  ;;  %v6269_v61 = vld [vmem:[#allocation13 + $0x10] sm:$0xff]   ;;  %v6281_v0 = vld [vmem:[#allocation13 + $0x28] sm:$0xff]  }
 0x26b   :  { %v608_v5 = vpack.c.bf16 %v586_v4, %v583_v1  ;;  %v4162_v1 = vld [vmem:[%s6917_s6] ss:$0 sm:$0xff] }
 0x26d   :  { %4736 = vmatprep.subr.bf16.mxu1 %v608_v5 }
 0x26e   :  { %4737 = vmatpush3.bf16.msra.mxu1 %v608_v5 }
 0x26f   :  { %4738 = vmatprep.subr.bf16.mxu1 %v609_v3 }
 0x272   :  { %4739 = vmatpush3.bf16.msra.mxu1 %v609_v3 }
 0x273   :  { %4748 = vmatprep.subr.bf16.mxu1 %v5431_v6 }
 0x275   :  { %4741 = vmatmul.mubr.msk.bf16.vlgmr.msra.gmra.mrb[0].mxu1 %vm630_vm0, %v6179_v7 }
 0x276   :  { %4749 = vmatpush3.bf16.msra.mxu1 %v5431_v6  ;;  %4744 = vmatprep.mubr.msk.bf16.mxu1 %vm630_vm0, %v6181_v8 }
 0x277   :  { %4750 = vmatprep.subr.bf16.mxu1 %v5432_v9 }
 0x27a   :  { %4751 = vmatpush3.bf16.msra.mxu1 %v5432_v9 }
 0x27b   :  { %4752 = vmatprep.subr.bf16.mxu1 %v5435_v10 }
 0x27d   :  { %4745 = vmatmul.mubr.msk.bf16.gmra.mrb[4].mxu1 %vm630_vm0, %v6187_v11 }
 0x27e   :  { %4753 = vmatpush3.bf16.msra.mxu1 %v5435_v10  ;;  %4764 = vmatprep.mubr.bf16.mxu1 %v6157_v39 }
 0x27f   :  { %v4806_v13 = vpop.f32.mrb[16].mxu0  ;;  %4754 = vmatprep.subr.bf16.mxu1 %v5436_v12 }
 0x280   :  { %v1063_v15 = vpop.f32.mrb[17].mxu0 }
 0x281   :  { %v4807_v16 = vpop.f32.mrb[18].mxu0 }
 0x282   :  { %v1104_v17 = vpack.c.bf16 %v4807_v16, %v4806_v13  ;;  %v1066_v18 = vpop.f32.mrb[19].mxu0  ;;  %4755 = vmatpush3.bf16.msra.mxu1 %v5436_v12 }
 0x283   :  { %v1103_v19 = vpack.c.bf16 %v1066_v18, %v1063_v15  ;;  %4756 = vmatprep.subr.bf16.mxu1 %v5437_v14 }
 0x286   :  { %4757 = vmatpush3.bf16.msra.mxu1 %v5437_v14 }
 0x287   :  { %v4810_v21 = vpop.f32.mrb[20].mxu0  ;;  %4758 = vmatprep.subr.bf16.mxu1 %v5438_v20 }
 0x288   :  { %v1079_v23 = vpop.f32.mrb[21].mxu0 }
 0x289   :  { %v4811_v24 = vpop.f32.mrb[22].mxu0 }
 0x28a   :  { %v1106_v25 = vpack.c.bf16 %v4811_v24, %v4810_v21  ;;  %v1082_v26 = vpop.f32.mrb[23].mxu0  ;;  %4759 = vmatpush3.bf16.msra.mxu1 %v5438_v20 }
 0x28b   :  { %v1105_v27 = vpack.c.bf16 %v1082_v26, %v1079_v23  ;;  %4760 = vmatprep.subr.bf16.mxu1 %v5439_v22 }
 0x28e   :  { %4761 = vmatpush3.bf16.msra.mxu1 %v5439_v22 }
 0x28f   :  { %4762 = vmatprep.subr.bf16.mxu1 %v5440_v28 }
 0x292   :  { %4763 = vmatpush3.bf16.msra.mxu1 %v5440_v28 }
 0x295   :  { %4765 = vmatmul.mubr.bf16.vlgmr.msra.gmra.mrb[8].mxu1 %v6155_v38 }
 0x296   :  { %4768 = vmatprep.mubr.bf16.mxu1 %v6165_v51  ;;  %v6235_v51 = vld [vmem:[#allocation11 + $0x10] sm:$0xff]  }
 0x29d   :  { %4769 = vmatmul.mubr.bf16.gmra.mrb[12].mxu1 %v6163_v50  ;;  %v6231_v50 = vld [vmem:[#allocation11 + $0x8] sm:$0xff]  }
 0x29e   :  { %4780 = vmatprep.mubr.msk.bf16.mxu1 %vm630_vm0, %v6195_v29  ;;  %4830 = vmatprep.subr.bf16.mxu0 %v6231_v50 }
 0x29f   :  { %4831 = vmatpush3.bf16.msra.mxu0 %v6231_v50 }
 0x2a0   :  { %4832 = vmatprep.subr.bf16.mxu0 %v6235_v51 }
 0x2a3   :  { %4833 = vmatpush3.bf16.msra.mxu0 %v6235_v51 }
 0x2a4   :  { %4834 = vmatprep.subr.bf16.mxu0 %v6239_v52 }
 0x2a7   :  { %4835 = vmatpush3.bf16.msra.mxu0 %v6239_v52 }
 0x2a8   :  { %4836 = vmatprep.subr.bf16.mxu0 %v6243_v53 }
 0x2ab   :  { %4837 = vmatpush3.bf16.msra.mxu0 %v6243_v53 }
 0x2ac   :  { %4838 = vmatprep.subr.bf16.mxu0 %v6247_v54 }
 0x2af   :  { %4839 = vmatpush3.bf16.msra.mxu0 %v6247_v54 }
 0x2b0   :  { %4840 = vmatprep.subr.bf16.mxu0 %v6251_v55 }
 0x2b3   :  { %4841 = vmatpush3.bf16.msra.mxu0 %v6251_v55 }
 0x2b4   :  { %4842 = vmatprep.subr.bf16.mxu0 %v6255_v56 }
 0x2b7   :  { %4843 = vmatpush3.bf16.msra.mxu0 %v6255_v56 }
 0x2b8   :  { %4876 = vmatprep.subr.bf16.mxu0 %v6259_v58 }
 0x368   :  { %v4766_v30 = vpop.f32.mrb[8].mxu1 }
 0x369   :  { %v815_v31 = vpop.f32.mrb[9].mxu1 }
 0x36a   :  { %v4767_v32 = vpop.f32.mrb[10].mxu1 }
 0x36b   :  { %v856_v33 = vpack.c.bf16 %v4767_v32, %v4766_v30  ;;  %v818_v34 = vpop.f32.mrb[11].mxu1 }
 0x36c   :  { %v855_v35 = vpack.c.bf16 %v818_v34, %v815_v31 }
 0x36e   :  { %4772 = vmatprep.subr.bf16.mxu1 %v855_v35 }
 0x36f   :  { %4773 = vmatpush3.bf16.msra.mxu1 %v855_v35 }
 0x370   :  { %v4770_v36 = vpop.f32.mrb[12].mxu1  ;;  %4774 = vmatprep.subr.bf16.mxu1 %v856_v33 }
 0x371   :  { %v831_v37 = vpop.f32.mrb[13].mxu1 }
 0x372   :  { %v4771_v38 = vpop.f32.mrb[14].mxu1 }
 0x373   :  { %v858_v39 = vpack.c.bf16 %v4771_v38, %v4770_v36  ;;  %v834_v40 = vpop.f32.mrb[15].mxu1  ;;  %4775 = vmatpush3.bf16.msra.mxu1 %v856_v33 }
 0x374   :  { %v857_v41 = vpack.c.bf16 %v834_v40, %v831_v37 }
 0x376   :  { %4776 = vmatprep.subr.bf16.mxu1 %v857_v41 }
 0x377   :  { %4777 = vmatpush3.bf16.msra.mxu1 %v857_v41 }
 0x378   :  { %4778 = vmatprep.subr.bf16.mxu1 %v858_v39 }
 0x37b   :  { %4779 = vmatpush3.bf16.msra.mxu1 %v858_v39 }
 0x37c   :  { %4812 = vmatprep.subr.bf16.mxu1 %v1103_v19 }
 0x37e   :  { %4781 = vmatmul.mubr.msk.bf16.vlgmr.msra.gmra.mrb[0].mxu1 %vm630_vm0, %v6199_v42 }
 0x37f   :  { %4813 = vmatpush3.bf16.msra.mxu1 %v1103_v19  ;;  %4784 = vmatprep.mubr.msk.bf16.mxu1 %vm630_vm0, %v6201_v43 }
 0x380   :  { %4814 = vmatprep.subr.bf16.mxu1 %v1104_v17 }
 0x383   :  { %4815 = vmatpush3.bf16.msra.mxu1 %v1104_v17 }
 0x384   :  { %4816 = vmatprep.subr.bf16.mxu1 %v1105_v27 }
 0x386   :  { %4785 = vmatmul.mubr.msk.bf16.gmra.mrb[4].mxu1 %vm630_vm0, %v6207_v44 }
 0x387   :  { %4817 = vmatpush3.bf16.msra.mxu1 %v1105_v27  ;;  %4820 = vmatprep.mubr.msk.bf16.mxu1 %vm630_vm0, %v6209_v45 }
 0x388   :  { %4818 = vmatprep.subr.bf16.mxu1 %v1106_v25 }
 0x38b   :  { %4819 = vmatpush3.bf16.msra.mxu1 %v1106_v25 }
 0x38c   :  { %4852 = vmatprep.subr.bf16.mxu1 %v6262_v59 }
 0x38e   :  { %4821 = vmatmul.mubr.msk.bf16.vlgmr.msra.gmra.mrb[0].mxu1 %vm630_vm0, %v6215_v46 }
 0x38f   :  { %4824 = vmatprep.mubr.msk.bf16.mxu1 %vm630_vm0, %v6217_v47  ;;  %4853 = vmatpush3.bf16.msra.mxu1 %v6262_v59 }
 0x390   :  { %4854 = vmatprep.subr.bf16.mxu1 %v6264_v60 }
 0x393   :  { %4855 = vmatpush3.bf16.msra.mxu1 %v6264_v60 }
 0x394   :  { %4856 = vmatprep.subr.bf16.mxu1 %v6269_v61 }
 0x396   :  { %4825 = vmatmul.mubr.msk.bf16.gmra.mrb[4].mxu1 %vm630_vm0, %v6223_v48 }
 0x397   :  { %4857 = vmatpush3.bf16.msra.mxu1 %v6269_v61 }
 0x398   :  { %4858 = vmatprep.subr.bf16.mxu1 %v6273_v62 }
 0x39b   :  { %4859 = vmatpush3.bf16.msra.mxu1 %v6273_v62 }
 0x39c   :  { %4860 = vmatprep.subr.bf16.mxu1 %v6277_v63 }
 0x39f   :  { %4861 = vmatpush3.bf16.msra.mxu1 %v6277_v63 }
 0x3a0   :  { %4862 = vmatprep.subr.bf16.mxu1 %v6281_v0 }
 0x3a3   :  { %4863 = vmatpush3.bf16.msra.mxu1 %v6281_v0 }
 0x461   :  { %v4822_v2 = vpop.f32.mrb[0].mxu1 }
 0x462   :  { %v1173_v3 = vpop.f32.mrb[1].mxu1  ;;  %v6291_v9 = vadd.f32 %v4822_v2, %v4162_v1 }
 0x463   :  { %v6289_v4 = vadd.f32 %v4162_v1, %v1173_v3  ;;  %v4823_v5 = vpop.f32.mrb[2].mxu1 }
 0x464   :  { %v1176_v6 = vpop.f32.mrb[3].mxu1  ;;  %v6297_v13 = vadd.f32 %v4823_v5, %v4162_v1  ;;  %v1228_v16 = vmul.f32 %v6291_v9, %v6291_v9 }
 0x465   :  { %v6293_v10 = vadd.f32 %v4162_v1, %v1176_v6  ;;  %v1226_v12 = vmul.f32 %v6289_v4, %v6289_v4 }
 0x466   :  { %v1229_v21 = vmul.f32 %v6297_v13, %v6297_v13 }
 0x467   :  { %v1212_v14 = vadd.f32 %v6293_v10, %v6289_v4  ;;  %v1227_v15 = vmul.f32 %v6293_v10, %v6293_v10 }
 0x469   :  { %v1213_v17 = vadd.f32 %v6291_v9, %v1212_v14  ;;  %v1234_v18 = vadd.f32 %v1227_v15, %v1226_v12  ;;  %v4826_v19 = vpop.f32.mrb[4].mxu1 }
 0x46a   :  { %v1189_v20 = vpop.f32.mrb[5].mxu1  ;;  %v5288_v26 = vadd.f32 %v4826_v19, %v4162_v1 }
 0x46b   :  { %v1235_v22 = vadd.f32 %v1234_v18, %v1228_v16  ;;  %v5289_v23 = vadd.f32 %v4162_v1, %v1189_v20  ;;  %v1214_v24 = vadd.f32 %v6297_v13, %v1213_v17  ;;  %v4827_v25 = vpop.f32.mrb[6].mxu1 }
 0x46c   :  { %v1192_v27 = vpop.f32.mrb[7].mxu1  ;;  %v5290_v34 = vadd.f32 %v4827_v25, %v4162_v1  ;;  %v1232_v37 = vmul.f32 %v5288_v26, %v5288_v26 }
 0x46d   :  { %v1215_v28 = vadd.f32 %v5289_v23, %v1214_v24  ;;  %v1230_v30 = vmul.f32 %v5289_v23, %v5289_v23  ;;  %v1236_v31 = vadd.f32 %v1235_v22, %v1229_v21  ;;  %v5291_v32 = vadd.f32 %v4162_v1, %v1192_v27 }
 0x46e   :  { %v1233_v40 = vmul.f32 %v5290_v34, %v5290_v34 }
 0x46f   :  { %v1237_v33 = vadd.f32 %v1236_v31, %v1230_v30  ;;  %v1216_v35 = vadd.f32 %v5291_v32, %v1215_v28  ;;  %v1231_v36 = vmul.f32 %v5291_v32, %v5291_v32 }
 0x471   :  { %v1217_v38 = vadd.f32 %v5288_v26, %v1216_v35  ;;  %v1238_v39 = vadd.f32 %v1237_v33, %v1231_v36 }
 0x473   :  { %v1218_v41 = vadd.f32 %v5290_v34, %v1217_v38  ;;  %v1239_v2 = vadd.f32 %v1238_v39, %v1232_v37 }
 0x475   :  { %v1219_v3 = vrot.slane %v1218_v41, 4  ;;  %v1240_v5 = vadd.f32 %v1239_v2, %v1233_v40 }
 0x477   :  { %v1220_v6 = vadd.f32 %v1219_v3, %v1218_v41  ;;  %v1241_v12 = vrot.slane %v1240_v5, 4  ;;  %v4219_v41 = vld [vmem:[%s6918_s7] ss:$0 sm:$0xff] }
 0x479   :  { %v1221_v14 = vrot.slane %v1220_v6, 2  ;;  %v1242_v15 = vadd.f32 %v1241_v12, %v1240_v5 }
 0x47b   :  { %v1222_v16 = vadd.f32 %v1221_v14, %v1220_v6  ;;  %v1243_v17 = vrot.slane %v1242_v15, 2 }
 0x47d   :  { %v1223_v18 = vrot.slane %v1222_v16, 1  ;;  %v1244_v19 = vadd.f32 %v1243_v17, %v1242_v15 }
 0x47f   :  { %v1224_v20 = vadd.f32 %v1223_v18, %v1222_v16  ;;  %v1245_v1 = vrot.slane %v1244_v19, 1 }
 0x481   :  { %v1225_v21 = vmul.f32 0.015625, %v1224_v20  ;;  %v1246_v22 = vadd.f32 %v1245_v1, %v1244_v19 }
 0x483   :  { %v1247_v24 = vmul.f32 0.015625, %v1246_v22  ;;  %v1248_v25 = vmul.f32 %v1225_v21, %v1225_v21  ;;  %v1255_v27 = vsub.f32 %v5291_v32, %v1225_v21  ;;  %v1250_v28 = vsub.f32 %v6289_v4, %v1225_v21 }
 0x484   :  { %v1251_v30 = vsub.f32 %v6293_v10, %v1225_v21  ;;  %v1252_v31 = vsub.f32 %v6291_v9, %v1225_v21  ;;  %v1253_v33 = vsub.f32 %v6297_v13, %v1225_v21  ;;  %v1254_v35 = vsub.f32 %v5289_v23, %v1225_v21  ;;  %v4220_v9 = vld [vmem:[%s6919_s8] ss:$0 sm:$0xff] }
 0x485   :  { %v1249_v36 = vsub.f32 %v1247_v24, %v1248_v25  ;;  %v1256_v37 = vsub.f32 %v5288_v26, %v1225_v21  ;;  %v1257_v38 = vsub.f32 %v5290_v34, %v1225_v21 }
 0x487   :  { %v1258_v39 = vadd.f32 1e-05, %v1249_v36 }
 0x489   :  { %5537 = vrsqrt.f32 %v1258_v39 }
 0x493   :  { %v5538_v40 = vpop.eup %5537 }
 0x494   :  { %v1265_v32 = vmul.f32 %v5538_v40, %v1255_v27  ;;  %v1260_v2 = vmul.f32 %v5538_v40, %v1250_v28  ;;  %v1261_v4 = vmul.f32 %v5538_v40, %v1251_v30  ;;  %v1262_v3 = vmul.f32 %v5538_v40, %v1252_v31 }
 0x495   :  { %v1263_v10 = vmul.f32 %v5538_v40, %v1253_v33  ;;  %v1264_v13 = vmul.f32 %v5538_v40, %v1254_v35  ;;  %v1266_v23 = vmul.f32 %v5538_v40, %v1256_v37  ;;  %v1267_v26 = vmul.f32 %v5538_v40, %v1257_v38 }
 0x496   :  { %v1280_v34 = vmul.f32 %v4219_v41, %v1265_v32  ;;  %v1275_v5 = vmul.f32 %v4219_v41, %v1260_v2  ;;  %v1276_v6 = vmul.f32 %v4219_v41, %v1261_v4  ;;  %v1277_v12 = vmul.f32 %v4219_v41, %v1262_v3  ;;  %v5458_v4 = vld [vmem:[#allocation10 + $0x48] sm:$0xff]  }
 0x497   :  { %v1278_v14 = vmul.f32 %v4219_v41, %v1263_v10  ;;  %v1279_v15 = vmul.f32 %v4219_v41, %v1264_v13  ;;  %v1281_v16 = vmul.f32 %v4219_v41, %v1266_v23  ;;  %v1282_v17 = vmul.f32 %v4219_v41, %v1267_v26  ;;  %v5459_v13 = vld [vmem:[#allocation10 + $0x50] sm:$0xff]  }
 0x498   :  { %v1295_v18 = vadd.f32 %v4220_v9, %v1280_v34  ;;  %v1290_v19 = vadd.f32 %v4220_v9, %v1275_v5  ;;  %v1291_v20 = vadd.f32 %v4220_v9, %v1276_v6  ;;  %v1292_v1 = vadd.f32 %v4220_v9, %v1277_v12  ;;  %v5460_v5 = vld [vmem:[#allocation10 + $0x58] sm:$0xff]   ;;  %v5462_v6 = vld [vmem:[#allocation10 + $0x68] sm:$0xff]   ;;  %v5463_v12 = vld [vmem:[#allocation10 + $0x70] sm:$0xff]  }
 0x499   :  { %v1293_v21 = vadd.f32 %v4220_v9, %v1278_v14  ;;  %v1294_v22 = vadd.f32 %v4220_v9, %v1279_v15  ;;  %v1296_v24 = vadd.f32 %v4220_v9, %v1281_v16  ;;  %v1297_v25 = vadd.f32 %v4220_v9, %v1282_v17  ;;  %v5464_v14 = vld [vmem:[#allocation10 + $0x78] sm:$0xff]   ;;  %v6362_v15 = vld [vmem:[#allocation13 + $0x30] sm:$0xff]   ;;  %v5473_v17 = vld [vmem:[#allocation8 + $0xc0] sm:$0xff]  }
 0x49a   :  { %v1311_v27 = vmul.f32 0.1, %v1295_v18  ;;  %vm1298_vm1 = vcmp.ge.f32.partialorder %v1290_v19, 0.0  ;;  %vm1299_vm2 = vcmp.ge.f32.partialorder %v1291_v20, 0.0  ;;  %v1306_v28 = vmul.f32 0.1, %v1290_v19  ;;  %4864 = vmatprep.subr.bf16.mxu1 %v6362_v15 }
 0x49b   :  { %v1307_v30 = vmul.f32 0.1, %v1291_v20  ;;  %vm1300_vm3 = vcmp.ge.f32.partialorder %v1292_v1, 0.0  ;;  %vm1301_vm4 = vcmp.ge.f32.partialorder %v1293_v21, 0.0  ;;  %v1308_v31 = vmul.f32 0.1, %v1292_v1  ;;  %4865 = vmatpush3.bf16.msra.mxu1 %v6362_v15 }
 0x49c   :  { %v6319_v33 = vsel %vm1298_vm1, %v1290_v19, %v1306_v28  ;;  %v1309_v35 = vmul.f32 0.1, %v1293_v21  ;;  %vm1302_vm5 = vcmp.ge.f32.partialorder %v1294_v22, 0.0  ;;  %vm1303_vm6 = vcmp.ge.f32.partialorder %v1295_v18, 0.0  ;;  %v6366_v16 = vld [vmem:[#allocation13 + $0x38] sm:$0xff]  }
 0x49d   :  { %v6321_v36 = vsel %vm1299_vm2, %v1291_v20, %v1307_v30  ;;  %v6323_v37 = vsel %vm1300_vm3, %v1292_v1, %v1308_v31  ;;  %v1310_v38 = vmul.f32 0.1, %v1294_v22  ;;  %v6325_v39 = vsel %vm1303_vm6, %v1295_v18, %v1311_v27  ;;  %4866 = vmatprep.subr.bf16.mxu1 %v6366_v16  ;;  %v6373_v18 = vld [vmem:[%s6921_s10] ss:$0 sm:$0xff] }
 0x49e   :  { %v6329_v40 = vpack.c.bf16 %v6321_v36, %v6319_v33  ;;  %v6331_v41 = vsel %vm1301_vm4, %v1293_v21, %v1309_v35  ;;  %v1312_v9 = vmul.f32 0.1, %v1296_v24  ;;  %v1313_v10 = vmul.f32 0.1, %v1297_v25 }
 0x49f   :  { %v6335_v32 = vpack.c.bf16 %v6331_v41, %v6323_v37  ;;  %v6337_v2 = vsel %vm1302_vm5, %v1294_v22, %v1310_v38  ;;  %vm1304_vm7 = vcmp.ge.f32.partialorder %v1296_v24, 0.0  ;;  %vm1305_vm8 = vcmp.ge.f32.partialorder %v1297_v25, 0.0  ;;  %4867 = vmatpush3.bf16.msra.mxu1 %v6366_v16 }
 0x4a0   :  { %4844 = vmatprep.mubr.bf16.mxu0 %v6329_v40  ;;  %v6342_v3 = vpack.c.bf16 %v6325_v39, %v6337_v2  ;;  %v6347_v23 = vsel %vm1304_vm7, %v1296_v24, %v1312_v9  ;;  %v6349_v26 = vsel %vm1305_vm8, %v1297_v25, %v1313_v10  ;;  %4900 = vmatprep.subr.bf16.mxu1 %v5473_v17 }
 0x4a1   :  { %4845 = vmatmul.mubr.bf16.vlgmr.msra.gmra.mrb[24].mxu0 %v6335_v32  ;;  %v6353_v34 = vpack.c.bf16 %v6349_v26, %v6347_v23 }
 0x4a2   :  { %4877 = vmatpush3.bf16.msra.mxu0 %v6259_v58  ;;  %4848 = vmatprep.mubr.bf16.mxu0 %v6342_v3  ;;  %v5461_v58 = vld [vmem:[#allocation10 + $0x60] sm:$0xff]  }
 0x4a3   :  { %4878 = vmatprep.subr.bf16.mxu0 %v5458_v4 }
 0x4a6   :  { %4879 = vmatpush3.bf16.msra.mxu0 %v5458_v4 }
 0x4a7   :  { %4880 = vmatprep.subr.bf16.mxu0 %v5459_v13 }
 0x4a9   :  { %4849 = vmatmul.mubr.bf16.gmra.mrb[28].mxu0 %v6353_v34 }
 0x4aa   :  { %4881 = vmatpush3.bf16.msra.mxu0 %v5459_v13  ;;  %4892 = vmatprep.mubr.bf16.mxu0 %v6329_v40  ;;  %v5474_v13 = vld [vmem:[#allocation8 + $0xc8] sm:$0xff]  }
 0x4ab   :  { %4882 = vmatprep.subr.bf16.mxu0 %v5460_v5 }
 0x4ae   :  { %4883 = vmatpush3.bf16.msra.mxu0 %v5460_v5 }
 0x4af   :  { %4884 = vmatprep.subr.bf16.mxu0 %v5461_v58 }
 0x4b2   :  { %4885 = vmatpush3.bf16.msra.mxu0 %v5461_v58 }
 0x4b3   :  { %4886 = vmatprep.subr.bf16.mxu0 %v5462_v6 }
 0x4b6   :  { %4887 = vmatpush3.bf16.msra.mxu0 %v5462_v6 }
 0x4b7   :  { %4888 = vmatprep.subr.bf16.mxu0 %v5463_v12 }
 0x4ba   :  { %4889 = vmatpush3.bf16.msra.mxu0 %v5463_v12 }
 0x4bb   :  { %4890 = vmatprep.subr.bf16.mxu0 %v5464_v14 }
 0x4be   :  { %4891 = vmatpush3.bf16.msra.mxu0 %v5464_v14 }
 0x4c1   :  { %4893 = vmatmul.mubr.bf16.vlgmr.msra.gmra.mrb[32].mxu0 %v6335_v32 }
 0x4c2   :  { %4896 = vmatprep.mubr.bf16.mxu0 %v6342_v3 }
 0x4c9   :  { %4897 = vmatmul.mubr.bf16.gmra.mrb[36].mxu0 %v6353_v34 }
 0x4ca   :  { %4932 = vmatprep.mubr.msk.bf16.mxu0 %vm630_vm0, %v6175_v57 }
 0x574   :  { %v4846_v57 = vpop.f32.mrb[24].mxu0 }
 0x575   :  { %v1440_v19 = vadd.f32 %v4846_v57, %v6373_v18  ;;  %v1431_v20 = vpop.f32.mrb[25].mxu0 }
 0x576   :  { %v1432_v1 = vadd.f32 %v6373_v18, %v1431_v20  ;;  %v4847_v21 = vpop.f32.mrb[26].mxu0  ;;  %v5475_v20 = vld [vmem:[#allocation8 + $0xd0] sm:$0xff]  }
 0x577   :  { %v1443_v22 = vadd.f32 %v4847_v21, %v6373_v18  ;;  %v1434_v24 = vpop.f32.mrb[27].mxu0  ;;  %v1464_v27 = vmax.f32 %v1440_v19, 0.0 }
 0x578   :  { %v1435_v25 = vadd.f32 %v6373_v18, %v1434_v24  ;;  %v1462_v30 = vmax.f32 %v1432_v1, 0.0 }
 0x579   :  { %v1465_v28 = vmax.f32 %v1443_v22, 0.0 }
 0x57a   :  { %v1463_v31 = vmax.f32 %v1435_v25, 0.0  ;;  %v5476_v25 = vld [vmem:[#allocation8 + $0xd8] sm:$0xff]  }
 0x57b   :  { %v1471_v35 = vpack.c.bf16 %v1465_v28, %v1464_v27  ;;  %v5477_v27 = vld [vmem:[#allocation8 + $0xe0] sm:$0xff]   ;;  %v5479_v28 = vld [vmem:[#allocation8 + $0xf0] sm:$0xff]  }
 0x57c   :  { %v1470_v38 = vpack.c.bf16 %v1463_v31, %v1462_v30  ;;  %v4850_v4 = vpop.f32.mrb[28].mxu0  ;;  %v5480_v30 = vld [vmem:[#allocation8 + $0xf8] sm:$0xff]   ;;  %v5481_v31 = vld [vmem:[#allocation8 + $0x140] sm:$0xff]  }
 0x57d   :  { %v1456_v9 = vadd.f32 %v4850_v4, %v6373_v18  ;;  %v1447_v10 = vpop.f32.mrb[29].mxu0  ;;  %v5484_v4 = vld [vmem:[#allocation8 + $0x158] sm:$0xff]  }
 0x57e   :  { %v1448_v5 = vadd.f32 %v6373_v18, %v1447_v10  ;;  %v4851_v58 = vpop.f32.mrb[30].mxu0  ;;  %4868 = vmatprep.mubr.bf16.mxu1 %v1470_v38  ;;  %v5483_v38 = vld [vmem:[#allocation8 + $0x150] sm:$0xff]   ;;  %v5486_v10 = vld [vmem:[#allocation8 + $0x168] sm:$0xff]  }
 0x57f   :  { %v1459_v6 = vadd.f32 %v4851_v58, %v6373_v18  ;;  %v1450_v12 = vpop.f32.mrb[31].mxu0  ;;  %4869 = vmatmul.mubr.bf16.vlgmr.msra.gmra.mrb[16].mxu1 %v1471_v35  ;;  %v1468_v57 = vmax.f32 %v1456_v9, 0.0  ;;  %v5482_v35 = vld [vmem:[#allocation8 + $0x148] sm:$0xff]   ;;  %v5485_v9 = vld [vmem:[#allocation8 + $0x160] sm:$0xff]  }
 0x580   :  { %v1451_v14 = vadd.f32 %v6373_v18, %v1450_v12  ;;  %4901 = vmatpush3.bf16.msra.mxu1 %v5473_v17  ;;  %v1466_v1 = vmax.f32 %v1448_v5, 0.0  ;;  %v5478_v17 = vld [vmem:[#allocation8 + $0xe8] sm:$0xff]   ;;  %v5488_v5 = vld [vmem:[#allocation8 + $0x178] sm:$0xff]  }
 0x581   :  { %v1469_v19 = vmax.f32 %v1459_v6, 0.0  ;;  %4902 = vmatprep.subr.bf16.mxu1 %v5474_v13 }
 0x582   :  { %v1467_v21 = vmax.f32 %v1451_v14, 0.0 }
 0x583   :  { %v1473_v22 = vpack.c.bf16 %v1469_v19, %v1468_v57 }
 0x584   :  { %v1472_v24 = vpack.c.bf16 %v1467_v21, %v1466_v1  ;;  %4903 = vmatpush3.bf16.msra.mxu1 %v5474_v13  ;;  %v5487_v13 = vld [vmem:[#allocation8 + $0x170] sm:$0xff]  }
 0x585   :  { %4904 = vmatprep.subr.bf16.mxu1 %v5475_v20 }
 0x586   :  { %4872 = vmatprep.mubr.bf16.mxu1 %v1472_v24 }
 0x587   :  { %4873 = vmatmul.mubr.bf16.gmra.mrb[20].mxu1 %v1473_v22 }
 0x588   :  { %4905 = vmatpush3.bf16.msra.mxu1 %v5475_v20  ;;  %4916 = vmatprep.mubr.bf16.mxu1 %v6329_v40 }
 0x589   :  { %4906 = vmatprep.subr.bf16.mxu1 %v5476_v25 }
 0x58c   :  { %4907 = vmatpush3.bf16.msra.mxu1 %v5476_v25 }
 0x58d   :  { %4908 = vmatprep.subr.bf16.mxu1 %v5477_v27 }
 0x590   :  { %4909 = vmatpush3.bf16.msra.mxu1 %v5477_v27  ;;  %v5489_v27 = vld [vmem:[#allocation8 + $0x100] sm:$0xff]  }
 0x591   :  { %4910 = vmatprep.subr.bf16.mxu1 %v5478_v17 }
 0x594   :  { %4911 = vmatpush3.bf16.msra.mxu1 %v5478_v17  ;;  %v5490_v17 = vld [vmem:[#allocation8 + $0x108] sm:$0xff]  }
 0x595   :  { %4912 = vmatprep.subr.bf16.mxu1 %v5479_v28 }
 0x598   :  { %4913 = vmatpush3.bf16.msra.mxu1 %v5479_v28  ;;  %v5491_v28 = vld [vmem:[#allocation8 + $0x110] sm:$0xff]  }
 0x599   :  { %4914 = vmatprep.subr.bf16.mxu1 %v5480_v30 }
 0x59c   :  { %4915 = vmatpush3.bf16.msra.mxu1 %v5480_v30  ;;  %v5492_v30 = vld [vmem:[#allocation8 + $0x118] sm:$0xff]  }
 0x59d   :  { %4980 = vmatprep.subr.bf16.mxu1 %v5481_v31 }
 0x59f   :  { %4917 = vmatmul.mubr.bf16.vlgmr.msra.gmra.mrb[24].mxu1 %v6335_v32 }
 0x5a0   :  { %4920 = vmatprep.mubr.bf16.mxu1 %v6342_v3  ;;  %4981 = vmatpush3.bf16.msra.mxu1 %v5481_v31 }
 0x5a1   :  { %4982 = vmatprep.subr.bf16.mxu1 %v5482_v35 }
 0x5a4   :  { %4983 = vmatpush3.bf16.msra.mxu1 %v5482_v35  ;;  %v5493_v35 = vld [vmem:[#allocation8 + $0x120] sm:$0xff]  }
 0x5a5   :  { %4984 = vmatprep.subr.bf16.mxu1 %v5483_v38 }
 0x5a7   :  { %4921 = vmatmul.mubr.bf16.gmra.mrb[28].mxu1 %v6353_v34 }
 0x5a8   :  { %4985 = vmatpush3.bf16.msra.mxu1 %v5483_v38  ;;  %4996 = vmatprep.mubr.bf16.mxu1 %v6329_v40 }
 0x5a9   :  { %4986 = vmatprep.subr.bf16.mxu1 %v5484_v4 }
 0x5ac   :  { %4987 = vmatpush3.bf16.msra.mxu1 %v5484_v4 }
 0x5ad   :  { %4988 = vmatprep.subr.bf16.mxu1 %v5485_v9 }
 0x5b0   :  { %4989 = vmatpush3.bf16.msra.mxu1 %v5485_v9 }
 0x5b1   :  { %4990 = vmatprep.subr.bf16.mxu1 %v5486_v10 }
 0x5b4   :  { %4991 = vmatpush3.bf16.msra.mxu1 %v5486_v10  ;;  %v5494_v10 = vld [vmem:[#allocation8 + $0x128] sm:$0xff]  }
 0x5b5   :  { %4992 = vmatprep.subr.bf16.mxu1 %v5487_v13 }
 0x5b8   :  { %4993 = vmatpush3.bf16.msra.mxu1 %v5487_v13 }
 0x5b9   :  { %4994 = vmatprep.subr.bf16.mxu1 %v5488_v5 }
 0x5bc   :  { %4995 = vmatpush3.bf16.msra.mxu1 %v5488_v5  ;;  %v5495_v5 = vld [vmem:[#allocation8 + $0x130] sm:$0xff]  }
 0x5bd   :  { %5020 = vmatprep.subr.bf16.mxu1 %v6227_v49 }
 0x5bf   :  { %4997 = vmatmul.mubr.bf16.vlgmr.msra.gmra.mrb[32].mxu1 %v6335_v32 }
 0x5c0   :  { %5000 = vmatprep.mubr.bf16.mxu1 %v6342_v3  ;;  %5021 = vmatpush3.bf16.msra.mxu1 %v6227_v49 }
 0x5c1   :  { %5022 = vmatprep.subr.bf16.mxu1 %v6231_v50 }
 0x5c4   :  { %5023 = vmatpush3.bf16.msra.mxu1 %v6231_v50 }
 0x5c5   :  { %5024 = vmatprep.subr.bf16.mxu1 %v6235_v51 }
 0x5c7   :  { %5001 = vmatmul.mubr.bf16.gmra.mrb[36].mxu1 %v6353_v34 }
 0x5c8   :  { %5025 = vmatpush3.bf16.msra.mxu1 %v6235_v51 }
 0x5c9   :  { %5026 = vmatprep.subr.bf16.mxu1 %v6239_v52 }
 0x5cc   :  { %5027 = vmatpush3.bf16.msra.mxu1 %v6239_v52 }
 0x5cd   :  { %5028 = vmatprep.subr.bf16.mxu1 %v6243_v53 }
 0x5d0   :  { %5029 = vmatpush3.bf16.msra.mxu1 %v6243_v53 }
 0x5d1   :  { %5030 = vmatprep.subr.bf16.mxu1 %v6247_v54 }
 0x5d4   :  { %5031 = vmatpush3.bf16.msra.mxu1 %v6247_v54 }
 0x5d5   :  { %5032 = vmatprep.subr.bf16.mxu1 %v6251_v55 }
 0x5d8   :  { %5033 = vmatpush3.bf16.msra.mxu1 %v6251_v55 }
 0x5d9   :  { %5034 = vmatprep.subr.bf16.mxu1 %v6255_v56 }
 0x5dc   :  { %5035 = vmatpush3.bf16.msra.mxu1 %v6255_v56 }
 0x652   :  { %v6407_v49 = vpop.f32.mrb[16].mxu1 }
 0x653   :  { %v6409_v50 = vpop.f32.mrb[17].mxu1 }
 0x654   :  { %v6411_v51 = vpop.f32.mrb[18].mxu1 }
 0x655   :  { %v6413_v52 = vpop.f32.mrb[19].mxu1 }
 0x65a   :  { %v6415_v53 = vpop.f32.mrb[20].mxu1 }
 0x65b   :  { %v6417_v58 = vpop.f32.mrb[21].mxu1 }
 0x65c   :  { %v6419_v54 = vpop.f32.mrb[22].mxu1 }
 0x65d   :  { %v6421_v6 = vpop.f32.mrb[23].mxu1 }
 0x672   :  { %v4918_v55 = vpop.f32.mrb[24].mxu1 }
 0x673   :  { %v1927_v12 = vpop.f32.mrb[25].mxu1 }
 0x674   :  { %v4919_v14 = vpop.f32.mrb[26].mxu1 }
 0x675   :  { %v1959_v56 = vpack.c.bf16 %v4919_v14, %v4918_v55  ;;  %v1930_v57 = vpop.f32.mrb[27].mxu1 }
 0x676   :  { %v1958_v19 = vpack.c.bf16 %v1930_v57, %v1927_v12 }
 0x678   :  { %4924 = vmatprep.subr.bf16.mxu0 %v1958_v19 }
 0x679   :  { %4925 = vmatpush3.bf16.msra.mxu0 %v1958_v19 }
 0x67a   :  { %v4922_v20 = vpop.f32.mrb[28].mxu1  ;;  %4926 = vmatprep.subr.bf16.mxu0 %v1959_v56 }
 0x67b   :  { %v1943_v1 = vpop.f32.mrb[29].mxu1 }
 0x67c   :  { %v4923_v21 = vpop.f32.mrb[30].mxu1 }
 0x67d   :  { %v1961_v22 = vpack.c.bf16 %v4923_v21, %v4922_v20  ;;  %v1946_v24 = vpop.f32.mrb[31].mxu1  ;;  %4927 = vmatpush3.bf16.msra.mxu0 %v1959_v56  ;;  %v5496_v56 = vld [vmem:[#allocation8 + $0x138] sm:$0xff]  }
 0x67e   :  { %v1960_v25 = vpack.c.bf16 %v1946_v24, %v1943_v1 }
 0x680   :  { %4928 = vmatprep.subr.bf16.mxu0 %v1960_v25 }
 0x681   :  { %4929 = vmatpush3.bf16.msra.mxu0 %v1960_v25 }
 0x682   :  { %4930 = vmatprep.subr.bf16.mxu0 %v1961_v22 }
 0x685   :  { %4931 = vmatpush3.bf16.msra.mxu0 %v1961_v22 }
 0x686   :  { %4940 = vmatprep.subr.bf16.mxu0 %v5489_v27 }
 0x688   :  { %4933 = vmatmul.mubr.msk.bf16.vlgmr.msra.gmra.mrb[32].mxu0 %vm630_vm0, %v6179_v7 }
 0x689   :  { %4941 = vmatpush3.bf16.msra.mxu0 %v5489_v27  ;;  %4936 = vmatprep.mubr.msk.bf16.mxu0 %vm630_vm0, %v6181_v8 }
 0x68a   :  { %4942 = vmatprep.subr.bf16.mxu0 %v5490_v17 }
 0x68d   :  { %4943 = vmatpush3.bf16.msra.mxu0 %v5490_v17 }
 0x68e   :  { %4944 = vmatprep.subr.bf16.mxu0 %v5491_v28 }
 0x690   :  { %4937 = vmatmul.mubr.msk.bf16.gmra.mrb[36].mxu0 %vm630_vm0, %v6187_v11 }
 0x691   :  { %4945 = vmatpush3.bf16.msra.mxu0 %v5491_v28  ;;  %4956 = vmatprep.mubr.bf16.mxu0 %v6329_v40 }
 0x692   :  { %v4998_v31 = vpop.f32.mrb[32].mxu1  ;;  %4946 = vmatprep.subr.bf16.mxu0 %v5492_v30 }
 0x693   :  { %v2341_v38 = vpop.f32.mrb[33].mxu1 }
 0x694   :  { %v4999_v7 = vpop.f32.mrb[34].mxu1 }
 0x695   :  { %v2373_v4 = vpack.c.bf16 %v4999_v7, %v4998_v31  ;;  %4947 = vmatpush3.bf16.msra.mxu0 %v5492_v30  ;;  %v2344_v9 = vpop.f32.mrb[35].mxu1 }
 0x696   :  { %v2372_v8 = vpack.c.bf16 %v2344_v9, %v2341_v38  ;;  %4948 = vmatprep.subr.bf16.mxu0 %v5493_v35 }
 0x699   :  { %4949 = vmatpush3.bf16.msra.mxu0 %v5493_v35 }
 0x69a   :  { %v5002_v13 = vpop.f32.mrb[36].mxu1  ;;  %4950 = vmatprep.subr.bf16.mxu0 %v5494_v10 }
 0x69b   :  { %v2357_v55 = vpop.f32.mrb[37].mxu1 }
 0x69c   :  { %v5003_v11 = vpop.f32.mrb[38].mxu1 }
 0x69d   :  { %v2375_v12 = vpack.c.bf16 %v5003_v11, %v5002_v13  ;;  %4951 = vmatpush3.bf16.msra.mxu0 %v5494_v10  ;;  %v2360_v40 = vpop.f32.mrb[39].mxu1 }
 0x69e   :  { %v2374_v14 = vpack.c.bf16 %v2360_v40, %v2357_v55  ;;  %4952 = vmatprep.subr.bf16.mxu0 %v5495_v5 }
 0x6a1   :  { %4953 = vmatpush3.bf16.msra.mxu0 %v5495_v5 }
 0x6a2   :  { %4954 = vmatprep.subr.bf16.mxu0 %v5496_v56 }
 0x6a5   :  { %4955 = vmatpush3.bf16.msra.mxu0 %v5496_v56 }
 0x6a8   :  { %4957 = vmatmul.mubr.bf16.vlgmr.msra.gmra.mrb[40].mxu0 %v6335_v32 }
 0x6a9   :  { %4960 = vmatprep.mubr.bf16.mxu0 %v6342_v3 }
 0x6b0   :  { %4961 = vmatmul.mubr.bf16.gmra.mrb[44].mxu0 %v6353_v34 }
 0x6b1   :  { %4972 = vmatprep.mubr.msk.bf16.mxu0 %vm630_vm0, %v6195_v29  ;;  %v6465_v29 = vld [vmem:[#allocation10 + $0x80] sm:$0xff]  }
 0x6b2   :  { %5068 = vmatprep.subr.bf16.mxu1 %v6465_v29 }
 0x77b   :  { %v4958_v57 = vpop.f32.mrb[40].mxu0 }
 0x77c   :  { %v2134_v19 = vpop.f32.mrb[41].mxu0 }
 0x77d   :  { %v4959_v20 = vpop.f32.mrb[42].mxu0 }
 0x77e   :  { %v2166_v1 = vpack.c.bf16 %v4959_v20, %v4958_v57  ;;  %v2137_v21 = vpop.f32.mrb[43].mxu0 }
 0x77f   :  { %v2165_v22 = vpack.c.bf16 %v2137_v21, %v2134_v19 }
 0x781   :  { %4964 = vmatprep.subr.bf16.mxu0 %v2165_v22 }
 0x782   :  { %4965 = vmatpush3.bf16.msra.mxu0 %v2165_v22 }
 0x783   :  { %v4962_v24 = vpop.f32.mrb[44].mxu0  ;;  %4966 = vmatprep.subr.bf16.mxu0 %v2166_v1 }
 0x784   :  { %v2150_v25 = vpop.f32.mrb[45].mxu0 }
 0x785   :  { %v4963_v27 = vpop.f32.mrb[46].mxu0 }
 0x786   :  { %v2168_v32 = vpack.c.bf16 %v4963_v27, %v4962_v24  ;;  %v2153_v17 = vpop.f32.mrb[47].mxu0  ;;  %4967 = vmatpush3.bf16.msra.mxu0 %v2166_v1 }
 0x787   :  { %v2167_v3 = vpack.c.bf16 %v2153_v17, %v2150_v25 }
 0x789   :  { %4968 = vmatprep.subr.bf16.mxu0 %v2167_v3 }
 0x78a   :  { %4969 = vmatpush3.bf16.msra.mxu0 %v2167_v3 }
 0x78b   :  { %4970 = vmatprep.subr.bf16.mxu0 %v2168_v32 }
 0x78e   :  { %4971 = vmatpush3.bf16.msra.mxu0 %v2168_v32 }
 0x78f   :  { %5004 = vmatprep.subr.bf16.mxu0 %v2372_v8 }
 0x791   :  { %4973 = vmatmul.mubr.msk.bf16.vlgmr.msra.gmra.mrb[32].mxu0 %vm630_vm0, %v6199_v42  ;;  %v4240_v42 = vld [vmem:[%s6917_s6 + $0x1] ss:$0 sm:$0xff] }
 0x792   :  { %5005 = vmatpush3.bf16.msra.mxu0 %v2372_v8  ;;  %4976 = vmatprep.mubr.msk.bf16.mxu0 %vm630_vm0, %v6201_v43 }
 0x793   :  { %5006 = vmatprep.subr.bf16.mxu0 %v2373_v4 }
 0x796   :  { %5007 = vmatpush3.bf16.msra.mxu0 %v2373_v4 }
 0x797   :  { %5008 = vmatprep.subr.bf16.mxu0 %v2374_v14 }
 0x799   :  { %4977 = vmatmul.mubr.msk.bf16.gmra.mrb[36].mxu0 %vm630_vm0, %v6207_v44 }
 0x79a   :  { %5009 = vmatpush3.bf16.msra.mxu0 %v2374_v14  ;;  %5012 = vmatprep.mubr.msk.bf16.mxu0 %vm630_vm0, %v6209_v45 }
 0x79b   :  { %5010 = vmatprep.subr.bf16.mxu0 %v2375_v12 }
 0x79e   :  { %5011 = vmatpush3.bf16.msra.mxu0 %v2375_v12 }
 0x79f   :  { %5044 = vmatprep.subr.bf16.mxu0 %v6262_v59 }
 0x7a1   :  { %5013 = vmatmul.mubr.msk.bf16.vlgmr.msra.gmra.mrb[32].mxu0 %vm630_vm0, %v6215_v46 }
 0x7a2   :  { %5016 = vmatprep.mubr.msk.bf16.mxu0 %vm630_vm0, %v6217_v47  ;;  %5045 = vmatpush3.bf16.msra.mxu0 %v6262_v59 }
 0x7a3   :  { %5046 = vmatprep.subr.bf16.mxu0 %v6264_v60 }
 0x7a6   :  { %5047 = vmatpush3.bf16.msra.mxu0 %v6264_v60 }
 0x7a7   :  { %5048 = vmatprep.subr.bf16.mxu0 %v6269_v61 }
 0x7a9   :  { %5017 = vmatmul.mubr.msk.bf16.gmra.mrb[36].mxu0 %vm630_vm0, %v6223_v48 }
 0x7aa   :  { %5049 = vmatpush3.bf16.msra.mxu0 %v6269_v61 }
 0x7ab   :  { %5050 = vmatprep.subr.bf16.mxu0 %v6273_v62 }
 0x7ae   :  { %5051 = vmatpush3.bf16.msra.mxu0 %v6273_v62 }
 0x7af   :  { %5052 = vmatprep.subr.bf16.mxu0 %v6277_v63 }
 0x7b2   :  { %5053 = vmatpush3.bf16.msra.mxu0 %v6277_v63 }
 0x7b3   :  { %5054 = vmatprep.subr.bf16.mxu0 %v6281_v0 }
 0x7b6   :  { %5055 = vmatpush3.bf16.msra.mxu0 %v6281_v0 }
 0x7b7   :  { %5056 = vmatprep.subr.bf16.mxu0 %v6362_v15 }
 0x7ba   :  { %5057 = vmatpush3.bf16.msra.mxu0 %v6362_v15 }
 0x7bb   :  { %5058 = vmatprep.subr.bf16.mxu0 %v6366_v16 }
 0x7be   :  { %5059 = vmatpush3.bf16.msra.mxu0 %v6366_v16 }
 0x874   :  { %v5014_v43 = vpop.f32.mrb[32].mxu0 }
 0x875   :  { %v2410_v44 = vpop.f32.mrb[33].mxu0  ;;  %v6473_v48 = vadd.f32 %v5014_v43, %v4240_v42 }
 0x876   :  { %v6471_v45 = vadd.f32 %v4240_v42, %v2410_v44  ;;  %v5015_v46 = vpop.f32.mrb[34].mxu0 }
 0x877   :  { %v2413_v47 = vpop.f32.mrb[35].mxu0  ;;  %v6479_v61 = vadd.f32 %v5015_v46, %v4240_v42  ;;  %v2465_v0 = vmul.f32 %v6473_v48, %v6473_v48 }
 0x878   :  { %v6475_v59 = vadd.f32 %v4240_v42, %v2413_v47  ;;  %v2463_v60 = vmul.f32 %v6471_v45, %v6471_v45 }
 0x879   :  { %v2466_v30 = vmul.f32 %v6479_v61, %v6479_v61 }
 0x87a   :  { %v2449_v62 = vadd.f32 %v6475_v59, %v6471_v45  ;;  %v2464_v63 = vmul.f32 %v6475_v59, %v6475_v59 }
 0x87c   :  { %v2450_v34 = vadd.f32 %v6473_v48, %v2449_v62  ;;  %v2471_v15 = vadd.f32 %v2464_v63, %v2463_v60  ;;  %v5018_v16 = vpop.f32.mrb[36].mxu0 }
 0x87d   :  { %v2426_v28 = vpop.f32.mrb[37].mxu0  ;;  %v5296_v4 = vadd.f32 %v5018_v16, %v4240_v42 }
 0x87e   :  { %v2472_v31 = vadd.f32 %v2471_v15, %v2465_v0  ;;  %v5297_v35 = vadd.f32 %v4240_v42, %v2426_v28  ;;  %v2451_v38 = vadd.f32 %v6479_v61, %v2450_v34  ;;  %v5019_v7 = vpop.f32.mrb[38].mxu0 }
 0x87f   :  { %v2429_v9 = vpop.f32.mrb[39].mxu0  ;;  %v5298_v11 = vadd.f32 %v5019_v7, %v4240_v42  ;;  %v2469_v14 = vmul.f32 %v5296_v4, %v5296_v4 }
 0x880   :  { %v2452_v8 = vadd.f32 %v5297_v35, %v2451_v38  ;;  %v2467_v10 = vmul.f32 %v5297_v35, %v5297_v35  ;;  %v2473_v13 = vadd.f32 %v2472_v31, %v2466_v30  ;;  %v5299_v5 = vadd.f32 %v4240_v42, %v2429_v9 }
 0x881   :  { %v2470_v19 = vmul.f32 %v5298_v11, %v5298_v11 }
 0x882   :  { %v2474_v55 = vadd.f32 %v2473_v13, %v2467_v10  ;;  %v2453_v12 = vadd.f32 %v5299_v5, %v2452_v8  ;;  %v2468_v40 = vmul.f32 %v5299_v5, %v5299_v5  ;;  %v4286_v10 = vld [vmem:[%s6918_s7 + $0x1] ss:$0 sm:$0xff] }
 0x884   :  { %v2454_v56 = vadd.f32 %v5296_v4, %v2453_v12  ;;  %v2475_v57 = vadd.f32 %v2474_v55, %v2468_v40 }
 0x886   :  { %v2455_v20 = vadd.f32 %v5298_v11, %v2454_v56  ;;  %v2476_v1 = vadd.f32 %v2475_v57, %v2469_v14 }
 0x888   :  { %v2456_v21 = vrot.slane %v2455_v20, 4  ;;  %v2477_v22 = vadd.f32 %v2476_v1, %v2470_v19 }
 0x88a   :  { %v2457_v24 = vadd.f32 %v2456_v21, %v2455_v20  ;;  %v2478_v25 = vrot.slane %v2477_v22, 4 }
 0x88c   :  { %v2458_v27 = vrot.slane %v2457_v24, 2  ;;  %v2479_v32 = vadd.f32 %v2478_v25, %v2477_v22 }
 0x88e   :  { %v2459_v17 = vadd.f32 %v2458_v27, %v2457_v24  ;;  %v2480_v3 = vrot.slane %v2479_v32, 2 }
 0x890   :  { %v2460_v43 = vrot.slane %v2459_v17, 1  ;;  %v2481_v44 = vadd.f32 %v2480_v3, %v2479_v32 }
 0x892   :  { %v2461_v46 = vadd.f32 %v2460_v43, %v2459_v17  ;;  %v2482_v42 = vrot.slane %v2481_v44, 1 }
 0x894   :  { %v2462_v47 = vmul.f32 0.015625, %v2461_v46  ;;  %v2483_v60 = vadd.f32 %v2482_v42, %v2481_v44 }
 0x896   :  { %v2484_v62 = vmul.f32 0.015625, %v2483_v60  ;;  %v2485_v63 = vmul.f32 %v2462_v47, %v2462_v47  ;;  %v2492_v0 = vsub.f32 %v5299_v5, %v2462_v47  ;;  %v2487_v34 = vsub.f32 %v6471_v45, %v2462_v47 }
 0x897   :  { %v2488_v15 = vsub.f32 %v6475_v59, %v2462_v47  ;;  %v2489_v16 = vsub.f32 %v6473_v48, %v2462_v47  ;;  %v2490_v28 = vsub.f32 %v6479_v61, %v2462_v47  ;;  %v2491_v30 = vsub.f32 %v5297_v35, %v2462_v47  ;;  %v4288_v48 = vld [vmem:[%s6919_s8 + $0x1] ss:$0 sm:$0xff] }
 0x898   :  { %v2486_v31 = vsub.f32 %v2484_v62, %v2485_v63  ;;  %v2493_v38 = vsub.f32 %v5296_v4, %v2462_v47  ;;  %v2494_v7 = vsub.f32 %v5298_v11, %v2462_v47 }
 0x89a   :  { %v2495_v9 = vadd.f32 1e-05, %v2486_v31 }
 0x89c   :  { %5539 = vrsqrt.f32 %v2495_v9  ;;  %v5499_v9 = vld [vmem:[#allocation10 + $0x90] sm:$0xff]  }
 0x8a6   :  { %v5540_v8 = vpop.eup %5539 }
 0x8a7   :  { %v2502_v13 = vmul.f32 %v5540_v8, %v2492_v0  ;;  %v2497_v5 = vmul.f32 %v5540_v8, %v2487_v34  ;;  %v2498_v45 = vmul.f32 %v5540_v8, %v2488_v15  ;;  %v2499_v55 = vmul.f32 %v5540_v8, %v2489_v16 }
 0x8a8   :  { %v2500_v59 = vmul.f32 %v5540_v8, %v2490_v28  ;;  %v2501_v61 = vmul.f32 %v5540_v8, %v2491_v30  ;;  %v2503_v35 = vmul.f32 %v5540_v8, %v2493_v38  ;;  %v2504_v4 = vmul.f32 %v5540_v8, %v2494_v7  ;;  %v5498_v30 = vld [vmem:[#allocation10 + $0x88] sm:$0xff]  }
 0x8a9   :  { %v2518_v11 = vmul.f32 %v4286_v10, %v2502_v13  ;;  %v2513_v12 = vmul.f32 %v4286_v10, %v2497_v5  ;;  %v2514_v40 = vmul.f32 %v4286_v10, %v2498_v45  ;;  %v2515_v14 = vmul.f32 %v4286_v10, %v2499_v55  ;;  %v5500_v5 = vld [vmem:[#allocation10 + $0x98] sm:$0xff]   ;;  %v5502_v45 = vld [vmem:[#allocation10 + $0xa8] sm:$0xff]   ;;  %v5503_v55 = vld [vmem:[#allocation10 + $0xb0] sm:$0xff]  }
 0x8aa   :  { %v2516_v56 = vmul.f32 %v4286_v10, %v2500_v59  ;;  %v2517_v57 = vmul.f32 %v4286_v10, %v2501_v61  ;;  %v2519_v19 = vmul.f32 %v4286_v10, %v2503_v35  ;;  %v2520_v20 = vmul.f32 %v4286_v10, %v2504_v4  ;;  %v5671_v59 = vld [vmem:[#allocation7] sm:$0xff]  }
 0x8ab   :  { %v2534_v1 = vadd.f32 %v4288_v48, %v2518_v11  ;;  %v2529_v21 = vadd.f32 %v4288_v48, %v2513_v12  ;;  %v2530_v22 = vadd.f32 %v4288_v48, %v2514_v40  ;;  %v2531_v24 = vadd.f32 %v4288_v48, %v2515_v14  ;;  %v5505_v61 = vld [vmem:[#allocation8 + $0x180] sm:$0xff]  }
 0x8ac   :  { %v2532_v25 = vadd.f32 %v4288_v48, %v2516_v56  ;;  %v2533_v27 = vadd.f32 %v4288_v48, %v2517_v57  ;;  %v2535_v32 = vadd.f32 %v4288_v48, %v2519_v19  ;;  %v2536_v17 = vadd.f32 %v4288_v48, %v2520_v20  ;;  %v5504_v48 = vld [vmem:[#allocation10 + $0xb8] sm:$0xff]   ;;  %5092 = vmatprep.subr.bf16.mxu0 %v5505_v61 }
 0x8ad   :  { %v2550_v3 = vmul.f32 0.1, %v2534_v1  ;;  %vm2537_vm9 = vcmp.ge.f32.partialorder %v2529_v21, 0.0  ;;  %vm2538_vm10 = vcmp.ge.f32.partialorder %v2530_v22, 0.0  ;;  %v2545_v43 = vmul.f32 0.1, %v2529_v21 }
 0x8ae   :  { %v2546_v44 = vmul.f32 0.1, %v2530_v22  ;;  %vm2539_vm11 = vcmp.ge.f32.partialorder %v2531_v24, 0.0  ;;  %vm2540_vm12 = vcmp.ge.f32.partialorder %v2532_v25, 0.0  ;;  %v2547_v46 = vmul.f32 0.1, %v2531_v24 }
 0x8af   :  { %v6501_v42 = vsel %vm2537_vm9, %v2529_v21, %v2545_v43  ;;  %v2548_v47 = vmul.f32 0.1, %v2532_v25  ;;  %vm2541_vm13 = vcmp.ge.f32.partialorder %v2533_v27, 0.0  ;;  %vm2542_vm14 = vcmp.ge.f32.partialorder %v2534_v1, 0.0 }
 0x8b0   :  { %v6503_v60 = vsel %vm2538_vm10, %v2530_v22, %v2546_v44  ;;  %v6505_v62 = vsel %vm2539_vm11, %v2531_v24, %v2547_v46  ;;  %v2549_v63 = vmul.f32 0.1, %v2533_v27  ;;  %v6507_v0 = vsel %vm2542_vm14, %v2534_v1, %v2550_v3 }
 0x8b1   :  { %v6511_v34 = vpack.c.bf16 %v6503_v60, %v6501_v42  ;;  %v6513_v15 = vsel %vm2540_vm12, %v2532_v25, %v2548_v47  ;;  %v2551_v38 = vmul.f32 0.1, %v2535_v32  ;;  %v2552_v7 = vmul.f32 0.1, %v2536_v17 }
 0x8b2   :  { %v6517_v16 = vpack.c.bf16 %v6513_v15, %v6505_v62  ;;  %v6519_v28 = vsel %vm2541_vm13, %v2533_v27, %v2549_v63  ;;  %vm2543_vm15 = vcmp.ge.f32.partialorder %v2535_v32, 0.0  ;;  %vm2544_vm1 = vcmp.ge.f32.partialorder %v2536_v17, 0.0 }
 0x8b3   :  { %5036 = vmatprep.mubr.bf16.mxu1 %v6511_v34  ;;  %v6524_v31 = vpack.c.bf16 %v6507_v0, %v6519_v28  ;;  %v6529_v8 = vsel %vm2543_vm15, %v2535_v32, %v2551_v38  ;;  %v6531_v10 = vsel %vm2544_vm1, %v2536_v17, %v2552_v7  ;;  %v5506_v17 = vld [vmem:[#allocation8 + $0x188] sm:$0xff]   ;;  %v5507_v38 = vld [vmem:[#allocation8 + $0x190] sm:$0xff]  }
 0x8b4   :  { %5037 = vmatmul.mubr.bf16.vlgmr.msra.gmra.mrb[40].mxu1 %v6517_v16  ;;  %v6535_v13 = vpack.c.bf16 %v6531_v10, %v6529_v8 }
 0x8b5   :  { %5069 = vmatpush3.bf16.msra.mxu1 %v6465_v29  ;;  %5040 = vmatprep.mubr.bf16.mxu1 %v6524_v31  ;;  %v5501_v29 = vld [vmem:[#allocation10 + $0xa0] sm:$0xff]  }
 0x8b6   :  { %5070 = vmatprep.subr.bf16.mxu1 %v5498_v30 }
 0x8b9   :  { %5071 = vmatpush3.bf16.msra.mxu1 %v5498_v30 }
 0x8ba   :  { %5072 = vmatprep.subr.bf16.mxu1 %v5499_v9 }
 0x8bc   :  { %5041 = vmatmul.mubr.bf16.gmra.mrb[44].mxu1 %v6535_v13 }
 0x8bd   :  { %5073 = vmatpush3.bf16.msra.mxu1 %v5499_v9  ;;  %5084 = vmatprep.mubr.bf16.mxu1 %v6511_v34 }
 0x8be   :  { %5074 = vmatprep.subr.bf16.mxu1 %v5500_v5 }
 0x8c1   :  { %5075 = vmatpush3.bf16.msra.mxu1 %v5500_v5 }
 0x8c2   :  { %5076 = vmatprep.subr.bf16.mxu1 %v5501_v29 }
 0x8c5   :  { %5077 = vmatpush3.bf16.msra.mxu1 %v5501_v29 }
 0x8c6   :  { %5078 = vmatprep.subr.bf16.mxu1 %v5502_v45 }
 0x8c9   :  { %5079 = vmatpush3.bf16.msra.mxu1 %v5502_v45  ;;  %v5508_v45 = vld [vmem:[#allocation8 + $0x198] sm:$0xff]  }
 0x8ca   :  { %5080 = vmatprep.subr.bf16.mxu1 %v5503_v55 }
 0x8cd   :  { %5081 = vmatpush3.bf16.msra.mxu1 %v5503_v55  ;;  %v5509_v55 = vld [vmem:[#allocation8 + $0x1a0] sm:$0xff]  }
 0x8ce   :  { %5082 = vmatprep.subr.bf16.mxu1 %v5504_v48 }
 0x8d1   :  { %5083 = vmatpush3.bf16.msra.mxu1 %v5504_v48  ;;  %v5511_v48 = vld [vmem:[#allocation8 + $0x1b0] sm:$0xff]  }
 0x8d4   :  { %5085 = vmatmul.mubr.bf16.vlgmr.msra.gmra.mrb[48].mxu1 %v6517_v16 }
 0x8d5   :  { %5088 = vmatprep.mubr.bf16.mxu1 %v6524_v31 }
 0x8dc   :  { %5089 = vmatmul.mubr.bf16.gmra.mrb[52].mxu1 %v6535_v13 }
 0x8dd   :  { %5124 = vmatprep.mubr.msk.bf16.mxu1 %vm630_vm0, %v5671_v59  ;;  %v5512_v59 = vld [vmem:[#allocation8 + $0x1b8] sm:$0xff]  }
 0x987   :  { %v5038_v35 = vpop.f32.mrb[40].mxu1 }
 0x988   :  { %v2608_v4 = vadd.f32 %v5038_v35, %v6373_v18  ;;  %v2599_v11 = vpop.f32.mrb[41].mxu1  ;;  %v5514_v35 = vld [vmem:[#allocation8 + $0x208] sm:$0xff]  }
 0x989   :  { %v2600_v12 = vadd.f32 %v6373_v18, %v2599_v11  ;;  %v5039_v40 = vpop.f32.mrb[42].mxu1  ;;  %v5516_v11 = vld [vmem:[#allocation8 + $0x218] sm:$0xff]  }
 0x98a   :  { %v2611_v14 = vadd.f32 %v5039_v40, %v6373_v18  ;;  %v2602_v56 = vpop.f32.mrb[43].mxu1  ;;  %v2632_v19 = vmax.f32 %v2608_v4, 0.0  ;;  %v5515_v4 = vld [vmem:[#allocation8 + $0x210] sm:$0xff]   ;;  %v5518_v40 = vld [vmem:[#allocation8 + $0x228] sm:$0xff]  }
 0x98b   :  { %v2603_v57 = vadd.f32 %v6373_v18, %v2602_v56  ;;  %v2630_v1 = vmax.f32 %v2600_v12, 0.0  ;;  %v5517_v12 = vld [vmem:[#allocation8 + $0x220] sm:$0xff]   ;;  %v5520_v56 = vld [vmem:[#allocation8 + $0x238] sm:$0xff]  }
 0x98c   :  { %v2633_v20 = vmax.f32 %v2611_v14, 0.0  ;;  %v5519_v14 = vld [vmem:[#allocation8 + $0x230] sm:$0xff]  }
 0x98d   :  { %v2631_v21 = vmax.f32 %v2603_v57, 0.0  ;;  %v5672_v57 = vld [vmem:[#allocation11] sm:$0xff]  }
 0x98e   :  { %v2639_v22 = vpack.c.bf16 %v2633_v20, %v2632_v19  ;;  %v5673_v19 = vld [vmem:[#allocation11 + $0x8] sm:$0xff]   ;;  %v5674_v20 = vld [vmem:[#allocation11 + $0x10] sm:$0xff]  }
 0x98f   :  { %v2638_v24 = vpack.c.bf16 %v2631_v21, %v2630_v1  ;;  %v5042_v25 = vpop.f32.mrb[44].mxu1  ;;  %v5675_v1 = vld [vmem:[#allocation11 + $0x18] sm:$0xff]   ;;  %v5676_v21 = vld [vmem:[#allocation11 + $0x20] sm:$0xff]  }
 0x990   :  { %v2624_v27 = vadd.f32 %v5042_v25, %v6373_v18  ;;  %v2615_v32 = vpop.f32.mrb[45].mxu1  ;;  %v5679_v25 = vld [vmem:[#allocation11 + $0x38] sm:$0xff]  }
 0x991   :  { %v2616_v3 = vadd.f32 %v6373_v18, %v2615_v32  ;;  %v5043_v43 = vpop.f32.mrb[46].mxu1  ;;  %5060 = vmatprep.mubr.bf16.mxu0 %v2638_v24  ;;  %v5678_v24 = vld [vmem:[#allocation11 + $0x30] sm:$0xff]  }
 0x992   :  { %v2627_v44 = vadd.f32 %v5043_v43, %v6373_v18  ;;  %v2618_v46 = vpop.f32.mrb[47].mxu1  ;;  %5061 = vmatmul.mubr.bf16.vlgmr.msra.gmra.mrb[48].mxu0 %v2639_v22  ;;  %v2636_v63 = vmax.f32 %v2624_v27, 0.0  ;;  %v5677_v22 = vld [vmem:[#allocation11 + $0x28] sm:$0xff]   ;;  %v6562_v27 = vld [vmem:[%s6923_s12] ss:$0 sm:$0xff] }
 0x993   :  { %v2619_v47 = vadd.f32 %v6373_v18, %v2618_v46  ;;  %5093 = vmatpush3.bf16.msra.mxu0 %v5505_v61  ;;  %v2634_v7 = vmax.f32 %v2616_v3, 0.0  ;;  %v5510_v18 = vld [vmem:[#allocation8 + $0x1a8] sm:$0xff]   ;;  %v5513_v61 = vld [vmem:[#allocation8 + $0x200] sm:$0xff]   ;;  %v6566_v32 = vadd.f32 %v6407_v49, %v6562_v27  ;;  %v6575_v43 = vadd.f32 %v6411_v51, %v6562_v27 }
 0x994   :  { %v2637_v30 = vmax.f32 %v2627_v44, 0.0  ;;  %5094 = vmatprep.subr.bf16.mxu0 %v5506_v17 }
 0x995   :  { %v2635_v9 = vmax.f32 %v2619_v47, 0.0  ;;  %v1612_v3 = vsub.f32 -inf, %v6566_v32  ;;  %v1636_v44 = vsub.f32 %v6566_v32, %v6566_v32 }
 0x996   :  { %v2641_v5 = vpack.c.bf16 %v2637_v30, %v2636_v63  ;;  %v1613_v63 = vsub.f32 -inf, %v6575_v43 }
 0x997   :  { %v2640_v29 = vpack.c.bf16 %v2635_v9, %v2634_v7  ;;  %5095 = vmatpush3.bf16.msra.mxu0 %v5506_v17  ;;  %v6570_v17 = vadd.f32 %v6562_v27, %v6409_v50  ;;  %v1622_v49 = vmul.f32 1.442695, %v1612_v3  ;;  %v1646_v30 = vmul.f32 1.442695, %v1636_v44 }
 0x998   :  { %5096 = vmatprep.subr.bf16.mxu0 %v5507_v38  ;;  %v6585_v50 = vadd.f32 %v6562_v27, %v6413_v52  ;;  %v1624_v51 = vmul.f32 1.442695, %v1613_v63  ;;  %v1637_v9 = vsub.f32 %v6575_v43, %v6575_v43  ;;  %v6598_v52 = vadd.f32 %v6562_v27, %v6417_v58 }
 0x999   :  { %5064 = vmatprep.mubr.bf16.mxu0 %v2640_v29  ;;  %v1610_v46 = vsub.f32 -inf, %v6570_v17  ;;  %v1634_v47 = vsub.f32 %v6570_v17, %v6570_v17  ;;  %5541 = vpow2.f32 %v1622_v49  ;;  %v6592_v29 = vadd.f32 %v6415_v53, %v6562_v27 }
 0x99a   :  { %5065 = vmatmul.mubr.bf16.gmra.mrb[52].mxu0 %v2641_v5  ;;  %5543 = vpow2.f32 %v1646_v30  ;;  %v1611_v5 = vsub.f32 -inf, %v6585_v50  ;;  %v1638_v58 = vsub.f32 %v6598_v52, %v6598_v52 }
 0x99b   :  { %5097 = vmatpush3.bf16.msra.mxu0 %v5507_v38  ;;  %5108 = vmatprep.mubr.bf16.mxu0 %v6511_v34  ;;  %v1618_v38 = vmul.f32 1.442695, %v1610_v46  ;;  %v1642_v7 = vmul.f32 1.442695, %v1634_v47 }
 0x99c   :  { %5098 = vmatprep.subr.bf16.mxu0 %v5508_v45 }
 0x99d   :  { %5545 = vpow2.f32 %v1618_v38 }
 0x99e   :  { %5547 = vpow2.f32 %v1642_v7 }
 0x99f   :  { %5099 = vmatpush3.bf16.msra.mxu0 %v5508_v45  ;;  %v1635_v45 = vsub.f32 %v6585_v50, %v6585_v50  ;;  %5549 = vpow2.f32 %v1624_v51 }
 0x9a0   :  { %5100 = vmatprep.subr.bf16.mxu0 %v5509_v55 }
 0x9a1   :  { %v1644_v53 = vmul.f32 1.442695, %v1635_v45 }
 0x9a3   :  { %5101 = vmatpush3.bf16.msra.mxu0 %v5509_v55  ;;  %v1648_v55 = vmul.f32 1.442695, %v1637_v9 }
 0x9a4   :  { %5102 = vmatprep.subr.bf16.mxu0 %v5510_v18 }
 0x9a5   :  { %5551 = vpow2.f32 %v1648_v55 }
 0x9a7   :  { %5103 = vmatpush3.bf16.msra.mxu0 %v5510_v18  ;;  %v1620_v18 = vmul.f32 1.442695, %v1611_v5 }
 0x9a8   :  { %5104 = vmatprep.subr.bf16.mxu0 %v5511_v48 }
 0x9a9   :  { %5553 = vpow2.f32 %v1620_v18 }
 0x9aa   :  { %5555 = vpow2.f32 %v1644_v53 }
 0x9ab   :  { %5105 = vmatpush3.bf16.msra.mxu0 %v5511_v48  ;;  %v1616_v48 = vsub.f32 -inf, %v6592_v29 }
 0x9ac   :  { %5106 = vmatprep.subr.bf16.mxu0 %v5512_v59 }
 0x9af   :  { %5107 = vmatpush3.bf16.msra.mxu0 %v5512_v59  ;;  %v6603_v59 = vadd.f32 %v6419_v54, %v6562_v27  ;;  %v5542_v54 = vpop.eup %5541 }
 0x9b0   :  { %5172 = vmatprep.subr.bf16.mxu0 %v5513_v61 }
 0x9b2   :  { %5109 = vmatmul.mubr.bf16.vlgmr.msra.gmra.mrb[56].mxu0 %v6517_v16 }
 0x9b3   :  { %5112 = vmatprep.mubr.bf16.mxu0 %v6524_v31  ;;  %5173 = vmatpush3.bf16.msra.mxu0 %v5513_v61  ;;  %v1640_v61 = vsub.f32 %v6592_v29, %v6592_v29 }
 0x9b4   :  { %5174 = vmatprep.subr.bf16.mxu0 %v5514_v35 }
 0x9b7   :  { %5175 = vmatpush3.bf16.msra.mxu0 %v5514_v35  ;;  %v1614_v35 = vsub.f32 -inf, %v6598_v52 }
 0x9b8   :  { %5176 = vmatprep.subr.bf16.mxu0 %v5515_v4 }
 0x9ba   :  { %5113 = vmatmul.mubr.bf16.gmra.mrb[60].mxu0 %v6535_v13 }
 0x9bb   :  { %5177 = vmatpush3.bf16.msra.mxu0 %v5515_v4  ;;  %5188 = vmatprep.mubr.bf16.mxu0 %v6511_v34  ;;  %v6610_v4 = vadd.f32 %v6562_v27, %v6421_v6 }
 0x9bc   :  { %5178 = vmatprep.subr.bf16.mxu0 %v5516_v11 }
 0x9bf   :  { %5179 = vmatpush3.bf16.msra.mxu0 %v5516_v11  ;;  %v1630_v11 = vmul.f32 1.442695, %v1616_v48 }
 0x9c0   :  { %5180 = vmatprep.subr.bf16.mxu0 %v5517_v12 }
 0x9c1   :  { %5557 = vpow2.f32 %v1630_v11 }
 0x9c3   :  { %5181 = vmatpush3.bf16.msra.mxu0 %v5517_v12  ;;  %v1617_v12 = vsub.f32 -inf, %v6603_v59 }
 0x9c4   :  { %5182 = vmatprep.subr.bf16.mxu0 %v5518_v40 }
 0x9c7   :  { %5183 = vmatpush3.bf16.msra.mxu0 %v5518_v40  ;;  %v1654_v40 = vmul.f32 1.442695, %v1640_v61 }
 0x9c8   :  { %5184 = vmatprep.subr.bf16.mxu0 %v5519_v14 }
 0x9c9   :  { %5559 = vpow2.f32 %v1654_v40 }
 0x9cb   :  { %5185 = vmatpush3.bf16.msra.mxu0 %v5519_v14  ;;  %v1641_v14 = vsub.f32 %v6603_v59, %v6603_v59 }
 0x9cc   :  { %5186 = vmatprep.subr.bf16.mxu0 %v5520_v56 }
 0x9cd   :  { %v1656_v3 = vmul.f32 1.442695, %v1641_v14 }
 0x9cf   :  { %5187 = vmatpush3.bf16.msra.mxu0 %v5520_v56  ;;  %v5544_v56 = vpop.eup %5543 }
 0x9d0   :  { %5212 = vmatprep.subr.bf16.mxu0 %v5672_v57  ;;  %v5546_v6 = vpop.eup %5545  ;;  %v1676_v44 = vmul.f32 %v5544_v56, %v6323_v37 }
 0x9d1   :  { %v1658_v46 = vmul.f32 0.0, %v5546_v6 }
 0x9d2   :  { %5189 = vmatmul.mubr.bf16.vlgmr.msra.gmra.mrb[64].mxu0 %v6517_v16 }
 0x9d3   :  { %5192 = vmatprep.mubr.bf16.mxu0 %v6524_v31  ;;  %5213 = vmatpush3.bf16.msra.mxu0 %v5672_v57  ;;  %v1626_v57 = vmul.f32 1.442695, %v1614_v35 }
 0x9d4   :  { %5214 = vmatprep.subr.bf16.mxu0 %v5673_v19 }
 0x9d5   :  { %5561 = vpow2.f32 %v1626_v57 }
 0x9d7   :  { %5215 = vmatpush3.bf16.msra.mxu0 %v5673_v19  ;;  %v1615_v19 = vsub.f32 -inf, %v6610_v4 }
 0x9d8   :  { %5216 = vmatprep.subr.bf16.mxu0 %v5674_v20 }
 0x9d9   :  { %v1628_v47 = vmul.f32 1.442695, %v1615_v19 }
 0x9da   :  { %5193 = vmatmul.mubr.bf16.gmra.mrb[68].mxu0 %v6535_v13 }
 0x9db   :  { %5217 = vmatpush3.bf16.msra.mxu0 %v5674_v20  ;;  %v1650_v20 = vmul.f32 1.442695, %v1638_v58 }
 0x9dc   :  { %5218 = vmatprep.subr.bf16.mxu0 %v5675_v1 }
 0x9dd   :  { %5563 = vpow2.f32 %v1650_v20 }
 0x9df   :  { %5219 = vmatpush3.bf16.msra.mxu0 %v5675_v1  ;;  %v1639_v1 = vsub.f32 %v6610_v4, %v6610_v4 }
 0x9e0   :  { %5220 = vmatprep.subr.bf16.mxu0 %v5676_v21 }
 0x9e1   :  { %v1652_v63 = vmul.f32 1.442695, %v1639_v1 }
 0x9e3   :  { %5221 = vmatpush3.bf16.msra.mxu0 %v5676_v21  ;;  %v5548_v21 = vpop.eup %5547 }
 0x9e4   :  { %5222 = vmatprep.subr.bf16.mxu0 %v5677_v22  ;;  %v1674_v49 = vmul.f32 %v5548_v21, %v6319_v33  ;;  %v6629_v55 = vadd.f32 %v5548_v21, %v1658_v46 }
 0x9e6   :  { %v6634_v53 = vadd.f32 %v1674_v49, %v1658_v46 }
 0x9e7   :  { %5223 = vmatpush3.bf16.msra.mxu0 %v5677_v22  ;;  %v1632_v22 = vmul.f32 1.442695, %v1617_v12 }
 0x9e8   :  { %5224 = vmatprep.subr.bf16.mxu0 %v5678_v24 }
 0x9e9   :  { %5565 = vpow2.f32 %v1632_v22 }
 0x9ea   :  { %5567 = vpow2.f32 %v1656_v3 }
 0x9eb   :  { %5225 = vmatpush3.bf16.msra.mxu0 %v5678_v24  ;;  %v5550_v24 = vpop.eup %5549  ;;  %5569 = vpow2.f32 %v1628_v47 }
 0x9ec   :  { %5226 = vmatprep.subr.bf16.mxu0 %v5679_v25  ;;  %v6622_v30 = vmul.f32 0.0, %v5550_v24  ;;  %v5552_v7 = vpop.eup %5551  ;;  %5571 = vpow2.f32 %v1652_v63 }
 0x9ed   :  { %v5554_v45 = vpop.eup %5553  ;;  %v6644_v12 = vmul.f32 %v5552_v7, %v6331_v41 }
 0x9ee   :  { %v6632_v48 = vpop.eup %5555  ;;  %v6641_v11 = vadd.f32 %v5552_v7, %v6622_v30  ;;  %v6650_v14 = vmul.f32 0.0, %v5554_v45 }
 0x9ef   :  { %5227 = vmatpush3.bf16.msra.mxu0 %v5679_v25  ;;  %v1660_v25 = vmul.f32 0.0, %v5542_v54  ;;  %v5558_v6 = vpop.eup %5557  ;;  %v6660_v41 = vmul.f32 %v6632_v48, %v6321_v36 }
 0x9f0   :  { %v5560_v22 = vpop.eup %5559 }
 0x9f1   :  { %v6624_v51 = vadd.f32 %v5544_v56, %v1660_v25  ;;  %v6627_v37 = vadd.f32 %v1676_v44, %v1660_v25  ;;  %v6671_v44 = vpop.eup %5561  ;;  %v1680_v45 = vmul.f32 %v5560_v22, %v6347_v23 }
 0x9f2   :  { %v6676_v63 = vpop.eup %5563 }
 0xa65   :  { %v5062_v38 = vpop.f32.mrb[48].mxu0 }
 0xa66   :  { %v2685_v9 = vadd.f32 %v5062_v38, %v6562_v27  ;;  %v2676_v5 = vpop.f32.mrb[49].mxu0  ;;  %v1664_v38 = vmul.f32 0.0, %v5558_v6 }
 0xa67   :  { %v2677_v33 = vadd.f32 %v6562_v27, %v2676_v5  ;;  %v5063_v18 = vpop.f32.mrb[50].mxu0  ;;  %v6679_v5 = vpop.eup %5565 }
 0xa68   :  { %v6637_v61 = vmax.f32 %v6566_v32, %v2685_v9  ;;  %v2688_v35 = vadd.f32 %v5063_v18, %v6562_v27  ;;  %v2679_v58 = vpop.f32.mrb[51].mxu0 }
 0xa69   :  { %v6647_v54 = vmax.f32 %v6570_v17, %v2677_v33  ;;  %v2680_v40 = vadd.f32 %v6562_v27, %v2679_v58 }
 0xa6a   :  { %v2717_v56 = vsub.f32 %v6566_v32, %v6637_v61  ;;  %v2741_v57 = vsub.f32 %v2685_v9, %v6637_v61  ;;  %v6656_v19 = vmax.f32 %v6575_v43, %v2688_v35 }
 0xa6b   :  { %v2715_v20 = vsub.f32 %v6570_v17, %v6647_v54  ;;  %v2739_v1 = vsub.f32 %v2677_v33, %v6647_v54  ;;  %v6666_v21 = vmax.f32 %v6585_v50, %v2680_v40 }
 0xa6c   :  { %v2727_v32 = vmul.f32 1.442695, %v2717_v56  ;;  %v2751_v24 = vmul.f32 1.442695, %v2741_v57  ;;  %v2718_v25 = vsub.f32 %v6575_v43, %v6656_v19  ;;  %v2742_v3 = vsub.f32 %v2688_v35, %v6656_v19  ;;  %v6683_v35 = vpop.eup %5567 }
 0xa6d   :  { %v2723_v36 = vmul.f32 1.442695, %v2715_v20  ;;  %v2747_v46 = vmul.f32 1.442695, %v2739_v1  ;;  %v2716_v17 = vsub.f32 %v6585_v50, %v6666_v21  ;;  %v2740_v47 = vsub.f32 %v2680_v40, %v6666_v21  ;;  %v5066_v49 = vpop.f32.mrb[52].mxu0  ;;  %v6689_v6 = vpop.eup %5569 }
 0xa6e   :  { %5573 = vpow2.f32 %v2727_v32  ;;  %v2729_v7 = vmul.f32 1.442695, %v2718_v25  ;;  %v2701_v9 = vadd.f32 %v5066_v49, %v6562_v27  ;;  %v2692_v43 = vpop.f32.mrb[53].mxu0  ;;  %v2753_v33 = vmul.f32 1.442695, %v2742_v3  ;;  %v6695_v32 = vpop.eup %5571 }
 0xa6f   :  { %5575 = vpow2.f32 %v2751_v24  ;;  %v2693_v18 = vadd.f32 %v6562_v27, %v2692_v43  ;;  %v5067_v50 = vpop.f32.mrb[54].mxu0  ;;  %v2725_v58 = vmul.f32 1.442695, %v2716_v17  ;;  %v2749_v20 = vmul.f32 1.442695, %v2740_v47 }
 0xa70   :  { %5577 = vpow2.f32 %v2723_v36  ;;  %v6686_v40 = vmax.f32 %v6592_v29, %v2701_v9  ;;  %v2704_v56 = vadd.f32 %v5067_v50, %v6562_v27  ;;  %v2695_v57 = vpop.f32.mrb[55].mxu0  ;;  %v1667_v50 = vadd.f32 %v6632_v48, %v6650_v14 }
 0xa71   :  { %5579 = vpow2.f32 %v2747_v46  ;;  %v6692_v23 = vmax.f32 %v6598_v52, %v2693_v18  ;;  %v2696_v1 = vadd.f32 %v6562_v27, %v2695_v57  ;;  %v1683_v57 = vadd.f32 %v6660_v41, %v6650_v14 }
 0xa72   :  { %5581 = vpow2.f32 %v2729_v7  ;;  %v2721_v24 = vsub.f32 %v6592_v29, %v6686_v40  ;;  %v2745_v25 = vsub.f32 %v2701_v9, %v6686_v40  ;;  %v6701_v3 = vmax.f32 %v6603_v59, %v2704_v56 }
 0xa73   :  { %5583 = vpow2.f32 %v2753_v33  ;;  %v2719_v36 = vsub.f32 %v6598_v52, %v6692_v23  ;;  %v2743_v46 = vsub.f32 %v2693_v18, %v6692_v23  ;;  %v6707_v17 = vmax.f32 %v6610_v4, %v2696_v1 }
 0xa74   :  { %5585 = vpow2.f32 %v2725_v58  ;;  %v2735_v27 = vmul.f32 1.442695, %v2721_v24  ;;  %v2759_v47 = vmul.f32 1.442695, %v2745_v25  ;;  %v2722_v29 = vsub.f32 %v6603_v59, %v6701_v3 }
 0xa75   :  { %5587 = vpow2.f32 %v2749_v20  ;;  %v2731_v49 = vmul.f32 1.442695, %v2719_v36  ;;  %v2755_v7 = vmul.f32 1.442695, %v2743_v46  ;;  %v2746_v9 = vsub.f32 %v2704_v56, %v6701_v3 }
 0xa76   :  { %5589 = vpow2.f32 %v2735_v27  ;;  %v2737_v43 = vmul.f32 1.442695, %v2722_v29  ;;  %v2720_v52 = vsub.f32 %v6610_v4, %v6707_v17  ;;  %v2744_v33 = vsub.f32 %v2696_v1, %v6707_v17 }
 0xa77   :  { %v1685_v18 = vadd.f32 %v6644_v12, %v6622_v30  ;;  %5591 = vpow2.f32 %v2759_v47  ;;  %v2761_v59 = vmul.f32 1.442695, %v2746_v9  ;;  %v1672_v56 = vadd.f32 %v5560_v22, %v1664_v38 }
 0xa78   :  { %v5574_v58 = vpop.eup %5573  ;;  %5593 = vpow2.f32 %v2731_v49  ;;  %v2733_v20 = vmul.f32 1.442695, %v2720_v52  ;;  %v2757_v25 = vmul.f32 1.442695, %v2744_v33  ;;  %v1688_v12 = vadd.f32 %v1680_v45, %v1664_v38 }
 0xa79   :  { %v5576_v24 = vpop.eup %5575  ;;  %v2765_v4 = vmul.f32 %v5574_v58, %v6624_v51  ;;  %v2781_v1 = vmul.f32 %v5574_v58, %v6627_v37  ;;  %5595 = vpow2.f32 %v2755_v7  ;;  %v1662_v48 = vmul.f32 0.0, %v6671_v44 }
 0xa7a   :  { %v5578_v30 = vpop.eup %5577  ;;  %v2789_v36 = vmul.f32 %v5576_v24, %v6505_v62  ;;  %5597 = vpow2.f32 %v2737_v43  ;;  %v1678_v37 = vmul.f32 %v6676_v63, %v6337_v2 }
 0xa7b   :  { %v5580_v46 = vpop.eup %5579  ;;  %v6725_v27 = vadd.f32 %v5576_v24, %v2765_v4  ;;  %v2763_v14 = vmul.f32 %v5578_v30, %v6629_v55  ;;  %5599 = vpow2.f32 %v2761_v59  ;;  %v2779_v41 = vmul.f32 %v5578_v30, %v6634_v53 }
 0xa7c   :  { %v5582_v51 = vpop.eup %5581  ;;  %v6731_v22 = vadd.f32 %v2789_v36, %v2781_v1  ;;  %5601 = vpow2.f32 %v2733_v20  ;;  %v2787_v44 = vmul.f32 %v5580_v46, %v6501_v42  ;;  %v1670_v29 = vadd.f32 %v6676_v63, %v1662_v48 }
 0xa7d   :  { %v5584_v38 = vpop.eup %5583  ;;  %v6734_v62 = vadd.f32 %v5580_v46, %v2763_v14  ;;  %v2766_v45 = vmul.f32 %v5582_v51, %v6641_v11  ;;  %v2782_v47 = vmul.f32 %v5582_v51, %v1685_v18  ;;  %5603 = vpow2.f32 %v2757_v25 }
 0xa7e   :  { %v5586_v55 = vpop.eup %5585  ;;  %v1665_v53 = vmul.f32 0.0, %v6679_v5  ;;  %v2790_v49 = vmul.f32 %v5584_v38, %v6513_v15  ;;  %v6740_v2 = vadd.f32 %v2787_v44, %v2779_v41  ;;  %v1681_v42 = vmul.f32 %v6683_v35, %v6349_v26 }
 0xa7f   :  { %v5588_v7 = vpop.eup %5587  ;;  %v6744_v9 = vadd.f32 %v5584_v38, %v2766_v45  ;;  %v2764_v43 = vmul.f32 %v5586_v55, %v1667_v50  ;;  %v2780_v52 = vmul.f32 %v5586_v55, %v1683_v57  ;;  %v1686_v33 = vadd.f32 %v1678_v37, %v1662_v48 }
 0xa80   :  { %v5590_v11 = vpop.eup %5589  ;;  %v1663_v18 = vmul.f32 0.0, %v6689_v6  ;;  %v6747_v59 = vadd.f32 %v2790_v49, %v2782_v47  ;;  %v2788_v63 = vmul.f32 %v5588_v7, %v6503_v60  ;;  %v1679_v15 = vmul.f32 %v6695_v32, %v6325_v39 }
 0xa81   :  { %v5592_v5 = vpop.eup %5591  ;;  %v6752_v58 = vadd.f32 %v5588_v7, %v2764_v43  ;;  %v2769_v20 = vmul.f32 %v5590_v11, %v1672_v56  ;;  %v2785_v26 = vmul.f32 %v5590_v11, %v1688_v12  ;;  %v1673_v50 = vadd.f32 %v6683_v35, %v1665_v53 }
 0xa82   :  { %v5594_v24 = vpop.eup %5593  ;;  %v6755_v57 = vadd.f32 %v2788_v63, %v2780_v52  ;;  %v2793_v4 = vmul.f32 %v5592_v5, %v6529_v8  ;;  %v1689_v1 = vadd.f32 %v1681_v42, %v1665_v53  ;;  %v1671_v39 = vadd.f32 %v6695_v32, %v1663_v18 }
 0xa83   :  { %v5596_v6 = vpop.eup %5595  ;;  %v6758_v25 = vadd.f32 %v5592_v5, %v2769_v20  ;;  %v2767_v60 = vmul.f32 %v5594_v24, %v1670_v29  ;;  %v2783_v30 = vmul.f32 %v5594_v24, %v1686_v33  ;;  %v1687_v46 = vadd.f32 %v1679_v15, %v1663_v18  ;;  %v5522_v15 = vld [vmem:[#allocation8 + $0x1c8] sm:$0xff]   ;;  %v5523_v24 = vld [vmem:[#allocation8 + $0x1d0] sm:$0xff]  }
 0xa84   :  { %v5598_v48 = vpop.eup %5597  ;;  %v2791_v36 = vmul.f32 %v5596_v6, %v6519_v28  ;;  %v6762_v56 = vadd.f32 %v2793_v4, %v2785_v26  ;;  %v5680_v20 = vld [vmem:[#allocation7 + $0x8] sm:$0xff]   ;;  %v5681_v26 = vld [vmem:[#allocation7 + $0x10] sm:$0xff]   ;;  %v5682_v4 = vld [vmem:[#allocation7 + $0x18] sm:$0xff]  }
 0xa85   :  { %v5600_v12 = vpop.eup %5599  ;;  %v6764_v35 = vadd.f32 %v5596_v6, %v2767_v60  ;;  %v2770_v14 = vmul.f32 %v5598_v48, %v1673_v50  ;;  %v5110_v41 = vpop.f32.mrb[56].mxu0  ;;  %v2786_v8 = vmul.f32 %v5598_v48, %v1689_v1  ;;  %v5524_v50 = vld [vmem:[#allocation8 + $0x1d8] sm:$0xff]   ;;  %v5525_v1 = vld [vmem:[#allocation8 + $0x1e0] sm:$0xff]  }
 0xa86   :  { %v5602_v51 = vpop.eup %5601  ;;  %v3040_v37 = vpop.f32.mrb[57].mxu0  ;;  %v6766_v44 = vadd.f32 %v2791_v36, %v2783_v30  ;;  %v2794_v38 = vmul.f32 %v5600_v12, %v6531_v10 }
 0xa87   :  { %v5604_v45 = vpop.eup %5603  ;;  %v6769_v47 = vadd.f32 %v5600_v12, %v2770_v14  ;;  %v2768_v32 = vmul.f32 %v5602_v51, %v1671_v39  ;;  %v5111_v28 = vpop.f32.mrb[58].mxu0  ;;  %v2784_v55 = vmul.f32 %v5602_v51, %v1687_v46  ;;  %v5526_v12 = vld [vmem:[#allocation8 + $0x1e8] sm:$0xff]   ;;  %v5527_v14 = vld [vmem:[#allocation8 + $0x1f0] sm:$0xff]  }
 0xa88   :  { %v3072_v29 = vpack.c.bf16 %v5111_v28, %v5110_v41  ;;  %v3043_v53 = vpop.f32.mrb[59].mxu0  ;;  %v2792_v49 = vmul.f32 %v5604_v45, %v6507_v0  ;;  %v6772_v7 = vadd.f32 %v2794_v38, %v2786_v8  ;;  %v5521_v0 = vld [vmem:[#allocation8 + $0x1c0] sm:$0xff]   ;;  %v5528_v38 = vld [vmem:[#allocation8 + $0x1f8] sm:$0xff]  }
 0xa89   :  { %v6774_v42 = vadd.f32 %v5604_v45, %v2768_v32  ;;  %v3071_v43 = vpack.c.bf16 %v3043_v53, %v3040_v37  ;;  %v5683_v45 = vld [vmem:[#allocation7 + $0x20] sm:$0xff]  }
 0xa8a   :  { %v6776_v52 = vadd.f32 %v2792_v49, %v2784_v55 }
 0xa8b   :  { %5116 = vmatprep.subr.bf16.mxu1 %v3071_v43 }
 0xa8c   :  { %5117 = vmatpush3.bf16.msra.mxu1 %v3071_v43 }
 0xa8d   :  { %v5114_v10 = vpop.f32.mrb[60].mxu0  ;;  %5118 = vmatprep.subr.bf16.mxu1 %v3072_v29 }
 0xa8e   :  { %v3056_v11 = vpop.f32.mrb[61].mxu0 }
 0xa8f   :  { %v5115_v33 = vpop.f32.mrb[62].mxu0 }
 0xa90   :  { %v3074_v18 = vpack.c.bf16 %v5115_v33, %v5114_v10  ;;  %v3059_v63 = vpop.f32.mrb[63].mxu0  ;;  %5119 = vmatpush3.bf16.msra.mxu1 %v3072_v29 }
 0xa91   :  { %v3073_v5 = vpack.c.bf16 %v3059_v63, %v3056_v11  ;;  %v5686_v63 = vld [vmem:[#allocation7 + $0x38] sm:$0xff]  }
 0xa93   :  { %5120 = vmatprep.subr.bf16.mxu1 %v3073_v5 }
 0xa94   :  { %5121 = vmatpush3.bf16.msra.mxu1 %v3073_v5  ;;  %v5687_v5 = vld [vmem:[#allocation7 + $0x40] sm:$0xff]  }
 0xa95   :  { %5122 = vmatprep.subr.bf16.mxu1 %v3074_v18 }
 0xa98   :  { %5123 = vmatpush3.bf16.msra.mxu1 %v3074_v18  ;;  %v5685_v18 = vld [vmem:[#allocation7 + $0x30] sm:$0xff]  }
 0xa99   :  { %5132 = vmatprep.subr.bf16.mxu1 %v5521_v0 }
 0xa9b   :  { %5125 = vmatmul.mubr.msk.bf16.vlgmr.msra.gmra.mrb[48].mxu1 %vm630_vm0, %v5680_v20  ;;  %v5690_v20 = vld [vmem:[#allocation7 + $0x50] sm:$0xff]  }
 0xa9c   :  { %5133 = vmatpush3.bf16.msra.mxu1 %v5521_v0  ;;  %5128 = vmatprep.mubr.msk.bf16.mxu1 %vm630_vm0, %v5681_v26  ;;  %v5688_v0 = vld [vmem:[#allocation13] sm:$0xff]   ;;  %v5691_v26 = vld [vmem:[#allocation13 + $0x8] sm:$0xff]  }
 0xa9d   :  { %5134 = vmatprep.subr.bf16.mxu1 %v5522_v15 }
 0xaa0   :  { %5135 = vmatpush3.bf16.msra.mxu1 %v5522_v15  ;;  %v5689_v15 = vld [vmem:[#allocation7 + $0x48] sm:$0xff]  }
 0xaa1   :  { %5136 = vmatprep.subr.bf16.mxu1 %v5523_v24 }
 0xaa3   :  { %5129 = vmatmul.mubr.msk.bf16.gmra.mrb[52].mxu1 %vm630_vm0, %v5682_v4  ;;  %v5694_v4 = vld [vmem:[#allocation13 + $0x18] sm:$0xff]  }
 0xaa4   :  { %5137 = vmatpush3.bf16.msra.mxu1 %v5523_v24  ;;  %5148 = vmatprep.mubr.bf16.mxu1 %v6511_v34  ;;  %v5692_v24 = vld [vmem:[#allocation13 + $0x10] sm:$0xff]  }
 0xaa5   :  { %v5190_v6 = vpop.f32.mrb[64].mxu0  ;;  %5138 = vmatprep.subr.bf16.mxu1 %v5524_v50 }
 0xaa6   :  { %v3454_v60 = vpop.f32.mrb[65].mxu0 }
 0xaa7   :  { %v5191_v30 = vpop.f32.mrb[66].mxu0 }
 0xaa8   :  { %v3486_v48 = vpack.c.bf16 %v5191_v30, %v5190_v6  ;;  %5139 = vmatpush3.bf16.msra.mxu1 %v5524_v50  ;;  %v3457_v39 = vpop.f32.mrb[67].mxu0  ;;  %v5693_v50 = vld [vmem:[#allocation7 + $0x58] sm:$0xff]   ;;  %v5695_v6 = vld [vmem:[#allocation13 + $0x20] sm:$0xff]  }
 0xaa9   :  { %v3485_v36 = vpack.c.bf16 %v3457_v39, %v3454_v60  ;;  %5140 = vmatprep.subr.bf16.mxu1 %v5525_v1  ;;  %v5697_v60 = vld [vmem:[#allocation13 + $0x30] sm:$0xff]   ;;  %v5698_v30 = vld [vmem:[#allocation13 + $0x38] sm:$0xff]  }
 0xaac   :  { %5141 = vmatpush3.bf16.msra.mxu1 %v5525_v1  ;;  %v5696_v1 = vld [vmem:[#allocation13 + $0x28] sm:$0xff]  }
 0xaad   :  { %v5194_v46 = vpop.f32.mrb[68].mxu0  ;;  %5142 = vmatprep.subr.bf16.mxu1 %v5526_v12 }
 0xaae   :  { %v3470_v41 = vpop.f32.mrb[69].mxu0 }
 0xaaf   :  { %v5195_v8 = vpop.f32.mrb[70].mxu0 }
 0xab0   :  { %v3488_v51 = vpack.c.bf16 %v5195_v8, %v5194_v46  ;;  %5143 = vmatpush3.bf16.msra.mxu1 %v5526_v12  ;;  %v3473_v34 = vpop.f32.mrb[71].mxu0 }
 0xab1   :  { %v3487_v37 = vpack.c.bf16 %v3473_v34, %v3470_v41  ;;  %5144 = vmatprep.subr.bf16.mxu1 %v5527_v14 }
 0xab4   :  { %5145 = vmatpush3.bf16.msra.mxu1 %v5527_v14 }
 0xab5   :  { %5146 = vmatprep.subr.bf16.mxu1 %v5528_v38 }
 0xab8   :  { %5147 = vmatpush3.bf16.msra.mxu1 %v5528_v38 }
 0xabb   :  { %5149 = vmatmul.mubr.bf16.vlgmr.msra.gmra.mrb[56].mxu1 %v6517_v16 }
 0xabc   :  { %5152 = vmatprep.mubr.bf16.mxu1 %v6524_v31 }
 0xac3   :  { %5153 = vmatmul.mubr.bf16.gmra.mrb[60].mxu1 %v6535_v13  ;;  %v5684_v13 = vld [vmem:[#allocation7 + $0x28] sm:$0xff]  }
 0xac4   :  { %5164 = vmatprep.mubr.msk.bf16.mxu1 %vm630_vm0, %v5683_v45 }
 0xb8e   :  { %v5150_v32 = vpop.f32.mrb[56].mxu1 }
 0xb8f   :  { %v3247_v28 = vpop.f32.mrb[57].mxu1 }
 0xb90   :  { %v5151_v55 = vpop.f32.mrb[58].mxu1 }
 0xb91   :  { %v3279_v29 = vpack.c.bf16 %v5151_v55, %v5150_v32  ;;  %v3250_v53 = vpop.f32.mrb[59].mxu1 }
 0xb92   :  { %v3278_v49 = vpack.c.bf16 %v3250_v53, %v3247_v28 }
 0xb94   :  { %5156 = vmatprep.subr.bf16.mxu1 %v3278_v49 }
 0xb95   :  { %5157 = vmatpush3.bf16.msra.mxu1 %v3278_v49 }
 0xb96   :  { %v5154_v43 = vpop.f32.mrb[60].mxu1  ;;  %5158 = vmatprep.subr.bf16.mxu1 %v3279_v29 }
 0xb97   :  { %v3263_v10 = vpop.f32.mrb[61].mxu1 }
 0xb98   :  { %v5155_v11 = vpop.f32.mrb[62].mxu1 }
 0xb99   :  { %v3281_v16 = vpack.c.bf16 %v5155_v11, %v5154_v43  ;;  %v3266_v33 = vpop.f32.mrb[63].mxu1  ;;  %5159 = vmatpush3.bf16.msra.mxu1 %v3279_v29 }
 0xb9a   :  { %v3280_v31 = vpack.c.bf16 %v3266_v33, %v3263_v10 }
 0xb9c   :  { %5160 = vmatprep.subr.bf16.mxu1 %v3280_v31 }
 0xb9d   :  { %5161 = vmatpush3.bf16.msra.mxu1 %v3280_v31 }
 0xb9e   :  { %5162 = vmatprep.subr.bf16.mxu1 %v3281_v16 }
 0xba1   :  { %5163 = vmatpush3.bf16.msra.mxu1 %v3281_v16 }
 0xba2   :  { %5196 = vmatprep.subr.bf16.mxu1 %v3485_v36 }
 0xba4   :  { %5165 = vmatmul.mubr.msk.bf16.vlgmr.msra.gmra.mrb[48].mxu1 %vm630_vm0, %v5684_v13 }
 0xba5   :  { %5197 = vmatpush3.bf16.msra.mxu1 %v3485_v36  ;;  %5168 = vmatprep.mubr.msk.bf16.mxu1 %vm630_vm0, %v5685_v18 }
 0xba6   :  { %5198 = vmatprep.subr.bf16.mxu1 %v3486_v48 }
 0xba9   :  { %5199 = vmatpush3.bf16.msra.mxu1 %v3486_v48  ;;  %v4290_v48 = vld [vmem:[%s6917_s6 + $0x2] ss:$0 sm:$0xff] }
 0xbaa   :  { %5200 = vmatprep.subr.bf16.mxu1 %v3487_v37 }
 0xbac   :  { %5169 = vmatmul.mubr.msk.bf16.gmra.mrb[52].mxu1 %vm630_vm0, %v5686_v63 }
 0xbad   :  { %5201 = vmatpush3.bf16.msra.mxu1 %v3487_v37  ;;  %5204 = vmatprep.mubr.msk.bf16.mxu1 %vm630_vm0, %v5687_v5 }
 0xbae   :  { %5202 = vmatprep.subr.bf16.mxu1 %v3488_v51 }
 0xbb1   :  { %5203 = vmatpush3.bf16.msra.mxu1 %v3488_v51 }
 0xbb2   :  { %5236 = vmatprep.subr.bf16.mxu1 %v5688_v0 }
 0xbb4   :  { %5205 = vmatmul.mubr.msk.bf16.vlgmr.msra.gmra.mrb[48].mxu1 %vm630_vm0, %v5689_v15 }
 0xbb5   :  { %5208 = vmatprep.mubr.msk.bf16.mxu1 %vm630_vm0, %v5690_v20  ;;  %5237 = vmatpush3.bf16.msra.mxu1 %v5688_v0 }
 0xbb6   :  { %5238 = vmatprep.subr.bf16.mxu1 %v5691_v26 }
 0xbb9   :  { %5239 = vmatpush3.bf16.msra.mxu1 %v5691_v26 }
 0xbba   :  { %5240 = vmatprep.subr.bf16.mxu1 %v5692_v24 }
 0xbbc   :  { %5209 = vmatmul.mubr.msk.bf16.gmra.mrb[52].mxu1 %vm630_vm0, %v5693_v50 }
 0xbbd   :  { %5241 = vmatpush3.bf16.msra.mxu1 %v5692_v24 }
 0xbbe   :  { %5242 = vmatprep.subr.bf16.mxu1 %v5694_v4 }
 0xbc1   :  { %5243 = vmatpush3.bf16.msra.mxu1 %v5694_v4 }
 0xbc2   :  { %5244 = vmatprep.subr.bf16.mxu1 %v5695_v6 }
 0xbc5   :  { %5245 = vmatpush3.bf16.msra.mxu1 %v5695_v6 }
 0xbc6   :  { %5246 = vmatprep.subr.bf16.mxu1 %v5696_v1 }
 0xbc9   :  { %5247 = vmatpush3.bf16.msra.mxu1 %v5696_v1 }
 0xbca   :  { %5248 = vmatprep.subr.bf16.mxu1 %v5697_v60 }
 0xbcd   :  { %5249 = vmatpush3.bf16.msra.mxu1 %v5697_v60 }
 0xbce   :  { %5250 = vmatprep.subr.bf16.mxu1 %v5698_v30 }
 0xbd1   :  { %5251 = vmatpush3.bf16.msra.mxu1 %v5698_v30 }
 0xc87   :  { %v5206_v39 = vpop.f32.mrb[48].mxu1 }
 0xc88   :  { %v3523_v36 = vpop.f32.mrb[49].mxu1  ;;  %v6798_v41 = vadd.f32 %v5206_v39, %v4290_v48 }
 0xc89   :  { %v6796_v12 = vadd.f32 %v4290_v48, %v3523_v36  ;;  %v5207_v46 = vpop.f32.mrb[50].mxu1 }
 0xc8a   :  { %v3526_v14 = vpop.f32.mrb[51].mxu1  ;;  %v6804_v34 = vadd.f32 %v5207_v46, %v4290_v48  ;;  %v3578_v45 = vmul.f32 %v6798_v41, %v6798_v41 }
 0xc8b   :  { %v6800_v8 = vadd.f32 %v4290_v48, %v3526_v14  ;;  %v3576_v51 = vmul.f32 %v6796_v12, %v6796_v12 }
 0xc8c   :  { %v3579_v53 = vmul.f32 %v6804_v34, %v6804_v34 }
 0xc8d   :  { %v3562_v37 = vadd.f32 %v6800_v8, %v6796_v12  ;;  %v3577_v38 = vmul.f32 %v6800_v8, %v6800_v8 }
 0xc8f   :  { %v3563_v32 = vadd.f32 %v6798_v41, %v3562_v37  ;;  %v3584_v28 = vadd.f32 %v3577_v38, %v3576_v51  ;;  %v5210_v55 = vpop.f32.mrb[52].mxu1 }
 0xc90   :  { %v3539_v29 = vpop.f32.mrb[53].mxu1  ;;  %v5304_v16 = vadd.f32 %v5210_v55, %v4290_v48 }
 0xc91   :  { %v3585_v49 = vadd.f32 %v3584_v28, %v3578_v45  ;;  %v5305_v43 = vadd.f32 %v4290_v48, %v3539_v29  ;;  %v3564_v10 = vadd.f32 %v6804_v34, %v3563_v32  ;;  %v5211_v11 = vpop.f32.mrb[54].mxu1 }
 0xc92   :  { %v3542_v33 = vpop.f32.mrb[55].mxu1  ;;  %v5306_v0 = vadd.f32 %v5211_v11, %v4290_v48  ;;  %v3582_v26 = vmul.f32 %v5304_v16, %v5304_v16 }
 0xc93   :  { %v3565_v31 = vadd.f32 %v5305_v43, %v3564_v10  ;;  %v3580_v13 = vmul.f32 %v5305_v43, %v5305_v43  ;;  %v3586_v18 = vadd.f32 %v3585_v49, %v3579_v53  ;;  %v5307_v63 = vadd.f32 %v4290_v48, %v3542_v33 }
 0xc94   :  { %v3583_v4 = vmul.f32 %v5306_v0, %v5306_v0 }
 0xc95   :  { %v3587_v5 = vadd.f32 %v3586_v18, %v3580_v13  ;;  %v3566_v15 = vadd.f32 %v5307_v63, %v3565_v31  ;;  %v3581_v20 = vmul.f32 %v5307_v63, %v5307_v63 }
 0xc97   :  { %v3567_v24 = vadd.f32 %v5304_v16, %v3566_v15  ;;  %v3588_v50 = vadd.f32 %v3587_v5, %v3581_v20 }
 0xc99   :  { %v3568_v6 = vadd.f32 %v5306_v0, %v3567_v24  ;;  %v3589_v1 = vadd.f32 %v3588_v50, %v3582_v26  ;;  %v4336_v24 = vld [vmem:[%s6918_s7 + $0x2] ss:$0 sm:$0xff] }
 0xc9b   :  { %v3569_v60 = vrot.slane %v3568_v6, 4  ;;  %v3590_v30 = vadd.f32 %v3589_v1, %v3583_v4 }
 0xc9d   :  { %v3570_v39 = vadd.f32 %v3569_v60, %v3568_v6  ;;  %v3591_v36 = vrot.slane %v3590_v30, 4 }
 0xc9f   :  { %v3571_v46 = vrot.slane %v3570_v39, 2  ;;  %v3592_v14 = vadd.f32 %v3591_v36, %v3590_v30 }
 0xca1   :  { %v3572_v51 = vadd.f32 %v3571_v46, %v3570_v39  ;;  %v3593_v37 = vrot.slane %v3592_v14, 2 }
 0xca3   :  { %v3573_v38 = vrot.slane %v3572_v51, 1  ;;  %v3594_v45 = vadd.f32 %v3593_v37, %v3592_v14 }
 0xca5   :  { %v3574_v32 = vadd.f32 %v3573_v38, %v3572_v51  ;;  %v3595_v48 = vrot.slane %v3594_v45, 1 }
 0xca7   :  { %v3575_v28 = vmul.f32 0.015625, %v3574_v32  ;;  %v3596_v55 = vadd.f32 %v3595_v48, %v3594_v45 }
 0xca9   :  { %v3597_v29 = vmul.f32 0.015625, %v3596_v55  ;;  %v3598_v53 = vmul.f32 %v3575_v28, %v3575_v28  ;;  %v3605_v49 = vsub.f32 %v5307_v63, %v3575_v28  ;;  %v3600_v10 = vsub.f32 %v6796_v12, %v3575_v28 }
 0xcaa   :  { %v3601_v11 = vsub.f32 %v6800_v8, %v3575_v28  ;;  %v3602_v33 = vsub.f32 %v6798_v41, %v3575_v28  ;;  %v3603_v31 = vsub.f32 %v6804_v34, %v3575_v28  ;;  %v3604_v13 = vsub.f32 %v5305_v43, %v3575_v28  ;;  %v4338_v41 = vld [vmem:[%s6919_s8 + $0x2] ss:$0 sm:$0xff] }
 0xcab   :  { %v3599_v18 = vsub.f32 %v3597_v29, %v3598_v53  ;;  %v3606_v5 = vsub.f32 %v5304_v16, %v3575_v28  ;;  %v3607_v15 = vsub.f32 %v5306_v0, %v3575_v28 }
 0xcad   :  { %v3608_v20 = vadd.f32 1e-05, %v3599_v18 }
 0xcaf   :  { %5605 = vrsqrt.f32 %v3608_v20 }
 0xcb9   :  { %v5606_v26 = vpop.eup %5605 }
 0xcba   :  { %v3615_v63 = vmul.f32 %v5606_v26, %v3605_v49  ;;  %v3610_v50 = vmul.f32 %v5606_v26, %v3600_v10  ;;  %v3611_v12 = vmul.f32 %v5606_v26, %v3601_v11  ;;  %v3612_v4 = vmul.f32 %v5606_v26, %v3602_v33 }
 0xcbb   :  { %v3613_v8 = vmul.f32 %v5606_v26, %v3603_v31  ;;  %v3614_v34 = vmul.f32 %v5606_v26, %v3604_v13  ;;  %v3616_v43 = vmul.f32 %v5606_v26, %v3606_v5  ;;  %v3617_v16 = vmul.f32 %v5606_v26, %v3607_v15 }
 0xcbc   :  { %v3631_v0 = vmul.f32 %v4336_v24, %v3615_v63  ;;  %v3626_v6 = vmul.f32 %v4336_v24, %v3610_v50  ;;  %v3627_v1 = vmul.f32 %v4336_v24, %v3611_v12  ;;  %v3628_v60 = vmul.f32 %v4336_v24, %v3612_v4 }
 0xcbd   :  { %v3629_v30 = vmul.f32 %v4336_v24, %v3613_v8  ;;  %v3630_v39 = vmul.f32 %v4336_v24, %v3614_v34  ;;  %v3632_v36 = vmul.f32 %v4336_v24, %v3616_v43  ;;  %v3633_v46 = vmul.f32 %v4336_v24, %v3617_v16  ;;  %v5699_v34 = vld [vmem:[%s6921_s10] ss:$0 sm:$0xff] }
 0xcbe   :  { %v3642_v14 = vadd.f32 %v4338_v41, %v3626_v6  ;;  %v3643_v51 = vadd.f32 %v4338_v41, %v3627_v1  ;;  %v3644_v37 = vadd.f32 %v4338_v41, %v3628_v60  ;;  %v3647_v38 = vadd.f32 %v4338_v41, %v3631_v0 }
 0xcbf   :  { %v3645_v45 = vadd.f32 %v4338_v41, %v3629_v30  ;;  %v3646_v32 = vadd.f32 %v4338_v41, %v3630_v39  ;;  %v3648_v48 = vadd.f32 %v4338_v41, %v3632_v36  ;;  %v3649_v28 = vadd.f32 %v4338_v41, %v3633_v46 }
 0xcc0   :  { %vm3650_vm0 = vcmp.ge.f32.partialorder %v3642_v14, 0.0  ;;  %vm3651_vm2 = vcmp.ge.f32.partialorder %v3643_v51, 0.0  ;;  %v3658_v55 = vmul.f32 0.1, %v3642_v14  ;;  %v3659_v29 = vmul.f32 0.1, %v3643_v51 }
 0xcc1   :  { %vm3652_vm3 = vcmp.ge.f32.partialorder %v3644_v37, 0.0  ;;  %vm3653_vm4 = vcmp.ge.f32.partialorder %v3645_v45, 0.0  ;;  %v3660_v53 = vmul.f32 0.1, %v3644_v37  ;;  %v3661_v49 = vmul.f32 0.1, %v3645_v45 }
 0xcc2   :  { %v6826_v10 = vsel %vm3650_vm0, %v3642_v14, %v3658_v55  ;;  %v6828_v11 = vsel %vm3651_vm2, %v3643_v51, %v3659_v29  ;;  %vm3654_vm5 = vcmp.ge.f32.partialorder %v3646_v32, 0.0  ;;  %vm3655_vm6 = vcmp.ge.f32.partialorder %v3647_v38, 0.0 }
 0xcc3   :  { %v3674_v33 = vpack.c.bf16 %v6828_v11, %v6826_v10  ;;  %v6832_v31 = vsel %vm3652_vm3, %v3644_v37, %v3660_v53  ;;  %v6834_v13 = vsel %vm3653_vm4, %v3645_v45, %v3661_v49  ;;  %v3662_v18 = vmul.f32 0.1, %v3646_v32 }
 0xcc4   :  { %v3675_v5 = vpack.c.bf16 %v6834_v13, %v6832_v31  ;;  %v3663_v15 = vmul.f32 0.1, %v3647_v38  ;;  %v3664_v26 = vmul.f32 0.1, %v3648_v48  ;;  %v3665_v24 = vmul.f32 0.1, %v3649_v28 }
 0xcc5   :  { %5228 = vmatprep.mubr.bf16.mxu0 %v3674_v33  ;;  %v6838_v20 = vsel %vm3654_vm5, %v3646_v32, %v3662_v18  ;;  %vm3656_vm7 = vcmp.ge.f32.partialorder %v3648_v48, 0.0  ;;  %vm3657_vm8 = vcmp.ge.f32.partialorder %v3649_v28, 0.0 }
 0xcc6   :  { %5229 = vmatmul.mubr.bf16.vlgmr.msra.gmra.mrb[72].mxu0 %v3675_v5  ;;  %v6840_v63 = vsel %vm3655_vm6, %v3647_v38, %v3663_v15  ;;  %v6844_v12 = vsel %vm3656_vm7, %v3648_v48, %v3664_v26  ;;  %v6846_v4 = vsel %vm3657_vm8, %v3649_v28, %v3665_v24  ;;  %v5529_v24 = vld [vmem:[#allocation14] sm:$0xff]  }
 0xcc7   :  { %v3676_v50 = vpack.c.bf16 %v6840_v63, %v6838_v20  ;;  %v3677_v41 = vpack.c.bf16 %v6846_v4, %v6844_v12  ;;  %5260 = vmatprep.subr.bf16.mxu0 %v5529_v24 }
 0xcc8   :  { %5261 = vmatpush3.bf16.msra.mxu0 %v5529_v24 }
 0xcc9   :  { %5232 = vmatprep.mubr.bf16.mxu0 %v3676_v50  ;;  %v5530_v50 = vld [vmem:[#allocation14 + $0x8] sm:$0xff]  }
 0xcca   :  { %5262 = vmatprep.subr.bf16.mxu0 %v5530_v50 }
 0xccc   :  { %5263 = vmatpush3.bf16.msra.mxu0 %v5530_v50 }
 0xcce   :  { %5233 = vmatmul.mubr.bf16.gmra.mrb[76].mxu0 %v3677_v41  ;;  %v5531_v41 = vld [vmem:[#allocation14 + $0x10] sm:$0xff]  }
 0xccf   :  { %5264 = vmatprep.subr.bf16.mxu0 %v5531_v41 }
 0xcd0   :  { %5265 = vmatpush3.bf16.msra.mxu0 %v5531_v41 }
 0xd99   :  { %v5230_v8 = vpop.f32.mrb[72].mxu0 }
 0xd9a   :  { %v3721_v43 = vadd.f32 %v5699_v34, %v5230_v8  ;;  %v3712_v16 = vpop.f32.mrb[73].mxu0  ;;  %v5532_v8 = vld [vmem:[#allocation14 + $0x18] sm:$0xff]  }
 0xd9b   :  { %v3713_v0 = vadd.f32 %v5699_v34, %v3712_v16  ;;  %v5231_v6 = vpop.f32.mrb[74].mxu0  ;;  %5266 = vmatprep.subr.bf16.mxu0 %v5532_v8  ;;  %v5535_v16 = vld [vmem:[#allocation14 + $0x30] sm:$0xff]  }
 0xd9c   :  { %v3724_v1 = vadd.f32 %v5699_v34, %v5231_v6  ;;  %v3715_v60 = vpop.f32.mrb[75].mxu0  ;;  %v3745_v39 = vmax.f32 %v3721_v43, 0.0  ;;  %5267 = vmatpush3.bf16.msra.mxu0 %v5532_v8  ;;  %v5534_v43 = vld [vmem:[#allocation14 + $0x28] sm:$0xff]  }
 0xd9d   :  { %v3716_v30 = vadd.f32 %v5699_v34, %v3715_v60  ;;  %v3743_v46 = vmax.f32 %v3713_v0, 0.0  ;;  %v5536_v0 = vld [vmem:[#allocation14 + $0x38] sm:$0xff]  }
 0xd9e   :  { %v3746_v36 = vmax.f32 %v3724_v1, 0.0  ;;  %v5700_v1 = vld [vmem:[%s6923_s12] ss:$0 sm:$0xff] }
 0xd9f   :  { %v3744_v14 = vmax.f32 %v3716_v30, 0.0 }
 0xda0   :  { %v3752_v51 = vpack.c.bf16 %v3746_v36, %v3745_v39 }
 0xda1   :  { %v3751_v37 = vpack.c.bf16 %v3744_v14, %v3743_v46  ;;  %v5234_v38 = vpop.f32.mrb[76].mxu0 }
 0xda2   :  { %v3737_v45 = vadd.f32 %v5699_v34, %v5234_v38  ;;  %v3728_v32 = vpop.f32.mrb[77].mxu0 }
 0xda3   :  { %v3729_v48 = vadd.f32 %v5699_v34, %v3728_v32  ;;  %v5235_v28 = vpop.f32.mrb[78].mxu0  ;;  %5252 = vmatprep.mubr.bf16.mxu1 %v3751_v37 }
 0xda4   :  { %v3740_v55 = vadd.f32 %v5699_v34, %v5235_v28  ;;  %v3731_v29 = vpop.f32.mrb[79].mxu0  ;;  %5253 = vmatmul.mubr.bf16.vlgmr.msra.gmra.mrb[64].mxu1 %v3752_v51  ;;  %v3749_v49 = vmax.f32 %v3737_v45, 0.0 }
 0xda5   :  { %v3732_v53 = vadd.f32 %v5699_v34, %v3731_v29  ;;  %v3747_v18 = vmax.f32 %v3729_v48, 0.0  ;;  %v5533_v34 = vld [vmem:[#allocation14 + $0x20] sm:$0xff]  }
 0xda6   :  { %v3750_v33 = vmax.f32 %v3740_v55, 0.0  ;;  %5268 = vmatprep.subr.bf16.mxu0 %v5533_v34 }
 0xda7   :  { %v3748_v5 = vmax.f32 %v3732_v53, 0.0  ;;  %5269 = vmatpush3.bf16.msra.mxu0 %v5533_v34 }
 0xda8   :  { %v3754_v15 = vpack.c.bf16 %v3750_v33, %v3749_v49  ;;  %5270 = vmatprep.subr.bf16.mxu0 %v5534_v43 }
 0xda9   :  { %v3753_v26 = vpack.c.bf16 %v3748_v5, %v3747_v18 }
 0xdab   :  { %5256 = vmatprep.mubr.bf16.mxu1 %v3753_v26  ;;  %5271 = vmatpush3.bf16.msra.mxu0 %v5534_v43 }
 0xdac   :  { %5257 = vmatmul.mubr.bf16.gmra.mrb[68].mxu1 %v3754_v15  ;;  %5272 = vmatprep.subr.bf16.mxu0 %v5535_v16 }
 0xdaf   :  { %5273 = vmatpush3.bf16.msra.mxu0 %v5535_v16 }
 0xdb0   :  { %5274 = vmatprep.subr.bf16.mxu0 %v5536_v0 }
 0xdb3   :  { %5275 = vmatpush3.bf16.msra.mxu0 %v5536_v0 }
 0xe77   :  { %v5254_v6 = vpop.f32.mrb[64].mxu1 }
 0xe78   :  { %v3798_v60 = vadd.f32 %v5700_v1, %v5254_v6  ;;  %v3789_v30 = vpop.f32.mrb[65].mxu1 }
 0xe79   :  { %v3790_v39 = vadd.f32 %v5700_v1, %v3789_v30  ;;  %v5255_v36 = vpop.f32.mrb[66].mxu1 }
 0xe7a   :  { %v3822_v46 = vmax.f32 %v6637_v61, %v3798_v60  ;;  %v3801_v14 = vadd.f32 %v5700_v1, %v5255_v36  ;;  %v3792_v51 = vpop.f32.mrb[67].mxu1 }
 0xe7b   :  { %v3820_v37 = vmax.f32 %v6647_v54, %v3790_v39  ;;  %v3793_v38 = vadd.f32 %v5700_v1, %v3792_v51 }
 0xe7c   :  { %v3830_v45 = vsub.f32 %v6637_v61, %v3822_v46  ;;  %v3854_v32 = vsub.f32 %v3798_v60, %v3822_v46  ;;  %v3823_v48 = vmax.f32 %v6656_v19, %v3801_v14 }
 0xe7d   :  { %v3828_v28 = vsub.f32 %v6647_v54, %v3820_v37  ;;  %v3852_v55 = vsub.f32 %v3790_v39, %v3820_v37  ;;  %v3821_v29 = vmax.f32 %v6666_v21, %v3793_v38 }
 0xe7e   :  { %v3840_v53 = vmul.f32 1.442695, %v3830_v45  ;;  %v3864_v49 = vmul.f32 1.442695, %v3854_v32  ;;  %v3831_v33 = vsub.f32 %v6656_v19, %v3823_v48  ;;  %v3855_v18 = vsub.f32 %v3801_v14, %v3823_v48 }
 0xe7f   :  { %v3836_v5 = vmul.f32 1.442695, %v3828_v28  ;;  %v3860_v15 = vmul.f32 1.442695, %v3852_v55  ;;  %v3829_v26 = vsub.f32 %v6666_v21, %v3821_v29  ;;  %v3853_v24 = vsub.f32 %v3793_v38, %v3821_v29  ;;  %v5258_v50 = vpop.f32.mrb[68].mxu1 }
 0xe80   :  { %5607 = vpow2.f32 %v3840_v53  ;;  %v3842_v61 = vmul.f32 1.442695, %v3831_v33  ;;  %v3814_v41 = vadd.f32 %v5700_v1, %v5258_v50  ;;  %v3805_v8 = vpop.f32.mrb[69].mxu1  ;;  %v3866_v54 = vmul.f32 1.442695, %v3855_v18 }
 0xe81   :  { %5609 = vpow2.f32 %v3864_v49  ;;  %v3806_v34 = vadd.f32 %v5700_v1, %v3805_v8  ;;  %v5259_v43 = vpop.f32.mrb[70].mxu1  ;;  %v3838_v16 = vmul.f32 1.442695, %v3829_v26  ;;  %v3862_v60 = vmul.f32 1.442695, %v3853_v24 }
 0xe82   :  { %5611 = vpow2.f32 %v3836_v5  ;;  %v3826_v0 = vmax.f32 %v6686_v40, %v3814_v41  ;;  %v3817_v19 = vadd.f32 %v5700_v1, %v5259_v43  ;;  %v3808_v6 = vpop.f32.mrb[71].mxu1 }
 0xe83   :  { %5613 = vpow2.f32 %v3860_v15  ;;  %v3824_v21 = vmax.f32 %v6692_v23, %v3806_v34  ;;  %v3809_v30 = vadd.f32 %v5700_v1, %v3808_v6 }
 0xe84   :  { %5615 = vpow2.f32 %v3842_v61  ;;  %v3834_v39 = vsub.f32 %v6686_v40, %v3826_v0  ;;  %v3858_v36 = vsub.f32 %v3814_v41, %v3826_v0  ;;  %v3827_v46 = vmax.f32 %v6701_v3, %v3817_v19 }
 0xe85   :  { %5617 = vpow2.f32 %v3866_v54  ;;  %v3832_v14 = vsub.f32 %v6692_v23, %v3824_v21  ;;  %v3856_v51 = vsub.f32 %v3806_v34, %v3824_v21  ;;  %v3825_v37 = vmax.f32 %v6707_v17, %v3809_v30 }
 0xe86   :  { %5619 = vpow2.f32 %v3838_v16  ;;  %v3848_v38 = vmul.f32 1.442695, %v3834_v39  ;;  %v3872_v45 = vmul.f32 1.442695, %v3858_v36  ;;  %v3835_v32 = vsub.f32 %v6701_v3, %v3827_v46 }
 0xe87   :  { %5621 = vpow2.f32 %v3862_v60  ;;  %v3844_v48 = vmul.f32 1.442695, %v3832_v14  ;;  %v3868_v1 = vmul.f32 1.442695, %v3856_v51  ;;  %v3859_v28 = vsub.f32 %v3817_v19, %v3827_v46 }
 0xe88   :  { %5623 = vpow2.f32 %v3848_v38  ;;  %v3850_v40 = vmul.f32 1.442695, %v3835_v32  ;;  %v3833_v55 = vsub.f32 %v6707_v17, %v3825_v37  ;;  %v3857_v29 = vsub.f32 %v3809_v30, %v3825_v37 }
 0xe89   :  { %5625 = vpow2.f32 %v3872_v45  ;;  %v3874_v53 = vmul.f32 1.442695, %v3859_v28 }
 0xe8a   :  { %v5608_v23 = vpop.eup %5607  ;;  %5627 = vpow2.f32 %v3844_v48  ;;  %v3846_v49 = vmul.f32 1.442695, %v3833_v55  ;;  %v3870_v26 = vmul.f32 1.442695, %v3857_v29 }
 0xe8b   :  { %v5610_v33 = vpop.eup %5609  ;;  %v3878_v18 = vmul.f32 %v5608_v23, %v6725_v27  ;;  %v3894_v5 = vmul.f32 %v5608_v23, %v6731_v22  ;;  %5629 = vpow2.f32 %v3868_v1 }
 0xe8c   :  { %v5612_v3 = vpop.eup %5611  ;;  %v3902_v15 = vmul.f32 %v5610_v33, %v6832_v31  ;;  %5631 = vpow2.f32 %v3850_v40 }
 0xe8d   :  { %v5614_v24 = vpop.eup %5613  ;;  %v3886_v50 = vadd.f32 %v5610_v33, %v3878_v18  ;;  %v3876_v17 = vmul.f32 %v5612_v3, %v6734_v62  ;;  %5633 = vpow2.f32 %v3874_v53  ;;  %v3892_v61 = vmul.f32 %v5612_v3, %v6740_v2 }
 0xe8e   :  { %v5616_v41 = vpop.eup %5615  ;;  %5635 = vpow2.f32 %v3846_v49  ;;  %v3900_v8 = vmul.f32 %v5614_v24, %v6826_v10  ;;  %v3910_v27 = vadd.f32 %v3902_v15, %v3894_v5 }
 0xe8f   :  { %v5618_v54 = vpop.eup %5617  ;;  %5637 = vrcp.f32 %v3886_v50  ;;  %v3884_v22 = vadd.f32 %v5614_v24, %v3876_v17  ;;  %v3879_v34 = vmul.f32 %v5616_v41, %v6744_v9  ;;  %v3895_v31 = vmul.f32 %v5616_v41, %v6747_v59 }
 0xe90   :  { %v5620_v43 = vpop.eup %5619  ;;  %v3903_v16 = vmul.f32 %v5618_v54, %v6834_v13  ;;  %5639 = vpow2.f32 %v3870_v26  ;;  %v3908_v62 = vadd.f32 %v3900_v8, %v3892_v61 }
 0xe91   :  { %v5622_v0 = vpop.eup %5621  ;;  %5641 = vrcp.f32 %v3884_v22  ;;  %v3887_v2 = vadd.f32 %v5618_v54, %v3879_v34  ;;  %v3877_v19 = vmul.f32 %v5620_v43, %v6752_v58  ;;  %v3893_v10 = vmul.f32 %v5620_v43, %v6755_v57 }
 0xe92   :  { %v5624_v6 = vpop.eup %5623  ;;  %v3901_v60 = vmul.f32 %v5622_v0, %v6828_v11  ;;  %v3911_v21 = vadd.f32 %v3903_v16, %v3895_v31 }
 0xe93   :  { %v5626_v30 = vpop.eup %5625  ;;  %5643 = vrcp.f32 %v3887_v2  ;;  %v3885_v9 = vadd.f32 %v5622_v0, %v3877_v19  ;;  %v3882_v59 = vmul.f32 %v5624_v6, %v6758_v25  ;;  %v3898_v13 = vmul.f32 %v5624_v6, %v6762_v56 }
 0xe94   :  { %v5628_v39 = vpop.eup %5627  ;;  %v3909_v36 = vadd.f32 %v3901_v60, %v3893_v10  ;;  %v3906_v46 = vmul.f32 %v5626_v30, %v6844_v12 }
 0xe95   :  { %v5630_v14 = vpop.eup %5629  ;;  %5645 = vrcp.f32 %v3885_v9  ;;  %v3890_v58 = vadd.f32 %v5626_v30, %v3882_v59  ;;  %v3880_v57 = vmul.f32 %v5628_v39, %v6764_v35  ;;  %v3896_v51 = vmul.f32 %v5628_v39, %v6766_v44 }
 0xe96   :  { %v5632_v11 = vpop.eup %5631  ;;  %v3904_v37 = vmul.f32 %v5630_v14, %v6838_v20  ;;  %v3914_v38 = vadd.f32 %v3906_v46, %v3898_v13 }
 0xe97   :  { %v5634_v45 = vpop.eup %5633  ;;  %5647 = vrcp.f32 %v3890_v58  ;;  %v3888_v25 = vadd.f32 %v5630_v14, %v3880_v57  ;;  %v3883_v56 = vmul.f32 %v5632_v11, %v6769_v47  ;;  %v3899_v32 = vmul.f32 %v5632_v11, %v6772_v7 }
 0xe98   :  { %v5636_v48 = vpop.eup %5635  ;;  %v3912_v12 = vadd.f32 %v3904_v37, %v3896_v51  ;;  %v3907_v1 = vmul.f32 %v5634_v45, %v6846_v4 }
 0xe99   :  { %v5638_v28 = vpop.eup %5637  ;;  %5649 = vrcp.f32 %v3888_v25  ;;  %v3891_v35 = vadd.f32 %v5634_v45, %v3883_v56  ;;  %v3881_v44 = vmul.f32 %v5636_v48, %v6774_v42  ;;  %v3897_v40 = vmul.f32 %v5636_v48, %v6776_v52 }
 0xe9a   :  { %v5640_v20 = vpop.eup %5639  ;;  %v3926_v55 = vmul.f32 %v5638_v28, %v3910_v27  ;;  %v3915_v29 = vadd.f32 %v3907_v1, %v3899_v32  ;;  %v4339_v27 = vld [vmem:[%s6925_s14] ss:$0 sm:$0xff]  ;;  %s5921_s14 = smov [#allocation16]  }
 0xe9b   :  { %v5642_v53 = vpop.eup %5641  ;;  %5651 = vrcp.f32 %v3891_v35  ;;  %v3889_v23 = vadd.f32 %v5640_v20, %v3881_v44  ;;  %v3905_v47 = vmul.f32 %v5640_v20, %v6840_v63  ;;  %s4133_s30 = sshll.u32 %s5921_s14, 4  ;;  %s4134_s30 = int_to_ptr.vmem [resolvable:$true] %s4133_s30 }
 0xe9c   :  { %v3924_v7 = vmul.f32 %v5642_v53, %v3908_v62  ;;  %s5877_s2 = scalar_lea.vmem %s4134_s30, 1024  ;;  %p5882_p9 = scmp.lt.s32.totalorder %s4134_s30, %s4134_s30 }
 0xe9d   :  { %v5644_v49 = vpop.eup %5643  ;;  %5653 = vrcp.f32 %v3889_v23  ;;  %v3913_v33 = vadd.f32 %v3905_v47, %v3897_v40  ;;  %p5878_p8 = scmp.ne.s32.totalorder %s4134_s30, %s5877_s2  ;;  %p5883_p10 = scmp.lt.s32.totalorder %s5877_s2, %s5877_s2 }
 0xe9e   :  { %v3927_v4 = vmul.f32 %v5644_v49, %v3911_v21 }
 0xe9f   :  { %v5646_v18 = vpop.eup %5645  ;;  %p5884_p11 = por %p5883_p10, %p5882_p9 }
 0xea0   :  { %v3925_v5 = vmul.f32 %v5646_v18, %v3909_v36  ;;  %v3933_v3 = vpack.c.bf16 %v3927_v4, %v3926_v55 }
 0xea1   :  { %v5648_v15 = vpop.eup %5647  ;;  %p5885_p12 = pnand %p5884_p11, %p5878_p8 }
 0xea2   :  { %v3932_v42 = vpack.c.bf16 %v3925_v5, %v3924_v7  ;;  %v3930_v26 = vmul.f32 %v5648_v15, %v3914_v38 }
 0xea3   :  { %v5650_v52 = vpop.eup %5649 }
 0xea4   :  { %5276 = vmatprep.mubr.bf16.mxu0 %v3932_v42  ;;  %v3928_v24 = vmul.f32 %v5650_v52, %v3912_v12 }
 0xea5   :  { %v5652_v50 = vpop.eup %5651  ;;  %5277 = vmatmul.mubr.bf16.vlgmr.msra.gmra.mrb[80].mxu0 %v3933_v3 }
 0xea6   :  { %v3931_v17 = vmul.f32 %v5652_v50, %v3915_v29 }
 0xea7   :  { %v5654_v61 = vpop.eup %5653 }
 0xea8   :  { %v3929_v41 = vmul.f32 %v5654_v61, %v3913_v33  ;;  %v3935_v63 = vpack.c.bf16 %v3931_v17, %v3930_v26 }
 0xeaa   :  { %v3934_v8 = vpack.c.bf16 %v3929_v41, %v3928_v24 }
 0xeac   :  { %5280 = vmatprep.mubr.bf16.mxu0 %v3934_v8 }
 0xead   :  { %5281 = vmatmul.mubr.bf16.gmra.mrb[84].mxu0 %v3935_v63 }
 0xf78   :  { %v5278_v54 = vpop.f32.mrb[80].mxu0 }
 0xf79   :  { %v4050_v22 = vadd.f32 %v5278_v54, %v4339_v27  ;;  %v4041_v34 = vpop.f32.mrb[81].mxu0 }
 0xf7a   :  { %v4042_v31 = vadd.f32 %v4339_v27, %v4041_v34  ;;  %v5279_v43 = vpop.f32.mrb[82].mxu0 }
 0xf7b   :  { %v4053_v16 = vadd.f32 %v5279_v43, %v4339_v27  ;;  %v4044_v62 = vpop.f32.mrb[83].mxu0  ;;  %v4074_v0 = vmul.f32 %v4050_v22, %v4050_v22 }
 0xf7c   :  { %v4045_v2 = vadd.f32 %v4339_v27, %v4044_v62  ;;  %v4072_v19 = vmul.f32 %v4042_v31, %v4042_v31 }
 0xf7d   :  { %4084 = vadd.xlane.f32.xlu1 %v4074_v0  ;;  %v4075_v10 = vmul.f32 %v4053_v16, %v4053_v16 }
 0xf7e   :  { %4080 = vadd.xlane.f32.xlu0 %v4072_v19  ;;  %v4073_v60 = vmul.f32 %v4045_v2, %v4045_v2 }
 0xf80   :  { %v5282_v6 = vpop.f32.mrb[84].mxu0 }
 0xf81   :  { %4086 = vadd.xlane.f32.xlu1 %v4075_v10  ;;  %v4057_v21 = vpop.f32.mrb[85].mxu0  ;;  %v4066_v13 = vadd.f32 %v5282_v6, %v4339_v27 }
 0xf82   :  { %v4058_v30 = vadd.f32 %v4339_v27, %v4057_v21  ;;  %v5283_v9 = vpop.f32.mrb[86].mxu0  ;;  %4082 = vadd.xlane.f32.xlu0 %v4073_v60 }
 0xf83   :  { %v4060_v59 = vpop.f32.mrb[87].mxu0  ;;  %v4069_v46 = vadd.f32 %v5283_v9, %v4339_v27  ;;  %v4078_v58 = vmul.f32 %v4066_v13, %v4066_v13 }
 0xf84   :  { %v4061_v39 = vadd.f32 %v4339_v27, %v4060_v59  ;;  %v4076_v36 = vmul.f32 %v4058_v30, %v4058_v30 }
 0xf85   :  { %v4079_v57 = vmul.f32 %v4069_v46, %v4069_v46 }
 0xf86   :  { %4088 = vadd.xlane.f32.xlu0 %v4076_v36  ;;  %v4077_v14 = vmul.f32 %v4061_v39, %v4061_v39 }
 0xf88   :  { %4090 = vadd.xlane.f32.xlu1 %v4077_v14 }
 0xf8a   :  { %4092 = vadd.xlane.f32.xlu0 %v4078_v58 }
 0xf8c   :  { %4094 = vadd.xlane.f32.xlu1 %v4079_v57 }
0x100a   :  { %v4085_v51 = vpop.xlane.xlu1 %4084 }
0x100b   :  { %v4098_v11 = vmax.f32 %v4085_v51, 1e-24  ;;  %v4081_v37 = vpop.xlane.xlu0 %4080 }
0x100c   :  { %v4096_v38 = vmax.f32 %v4081_v37, 1e-24 }
0x100d   :  { %5655 = vrsqrt.f32 %v4098_v11 }
0x100e   :  { %5657 = vrsqrt.f32 %v4096_v38  ;;  %v4087_v45 = vpop.xlane.xlu1 %4086 }
0x100f   :  { %v4099_v25 = vmax.f32 %v4087_v45, 1e-24  ;;  %v4083_v56 = vpop.xlane.xlu0 %4082 }
0x1010   :  { %v4097_v32 = vmax.f32 %v4083_v56, 1e-24 }
0x1011   :  { %5659 = vrsqrt.f32 %v4099_v25 }
0x1012   :  { %5661 = vrsqrt.f32 %v4097_v32 }
0x1013   :  { %v4089_v48 = vpop.xlane.xlu0 %4088 }
0x1014   :  { %v4100_v12 = vmax.f32 %v4089_v48, 1e-24 }
0x1015   :  { %v4091_v1 = vpop.xlane.xlu1 %4090 }
0x1016   :  { %5663 = vrsqrt.f32 %v4100_v12  ;;  %v4101_v28 = vmax.f32 %v4091_v1, 1e-24 }
0x1017   :  { %v5656_v35 = vpop.eup %5655  ;;  %v4093_v44 = vpop.xlane.xlu0 %4092 }
0x1018   :  { %v5658_v40 = vpop.eup %5657  ;;  %v4114_v20 = vmul.f32 %v5656_v35, %v4050_v22  ;;  %5665 = vrsqrt.f32 %v4101_v28  ;;  %v4102_v55 = vmax.f32 %v4093_v44, 1e-24 }
0x1019   :  { %v4112_v29 = vmul.f32 %v5658_v40, %v4042_v31  ;;  %v4095_v53 = vpop.xlane.xlu1 %4094 }
0x101a   :  { %4122 = vst [vmem:[#allocation16 + $0x10] sm:$0xff] %v4114_v20  ;;  %5667 = vrsqrt.f32 %v4102_v55  ;;  %v4103_v23 = vmax.f32 %v4095_v53, 1e-24 }
0x101b   :  { %v5660_v47 = vpop.eup %5659  ;;  %4120 = vst [vmem:[#allocation16] sm:$0xff] %v4112_v29 }
0x101c   :  { %v5662_v7 = vpop.eup %5661  ;;  %v4115_v49 = vmul.f32 %v5660_v47, %v4053_v16  ;;  %5669 = vrsqrt.f32 %v4103_v23 }
0x101d   :  { %v4113_v33 = vmul.f32 %v5662_v7, %v4045_v2 }
0x101e   :  { %4123 = vst [vmem:[#allocation16 + $0x18] sm:$0xff] %v4115_v49 }
0x101f   :  { %4121 = vst [vmem:[#allocation16 + $0x8] sm:$0xff] %v4113_v33 }
0x1020   :  { %v5664_v4 = vpop.eup %5663 }
0x1021   :  { %v4116_v18 = vmul.f32 %v5664_v4, %v4058_v30 }
0x1022   :  { %v5666_v5 = vpop.eup %5665 }
0x1023   :  { %4124 = vst [vmem:[#allocation16 + $0x20] sm:$0xff] %v4116_v18  ;;  %v4117_v3 = vmul.f32 %v5666_v5, %v4061_v39 }
0x1024   :  { %v5668_v15 = vpop.eup %5667 }
0x1025   :  { %4125 = vst [vmem:[#allocation16 + $0x28] sm:$0xff] %v4117_v3  ;;  %v4118_v42 = vmul.f32 %v5668_v15, %v4066_v13 }
0x1026   :  { %v5670_v26 = vpop.eup %5669 }
0x1027   :  { %4126 = vst [vmem:[#allocation16 + $0x30] sm:$0xff] %v4118_v42  ;;  %v4119_v52 = vmul.f32 %v5670_v26, %v4069_v46 }
0x1029   :  { %4127 = vst [vmem:[#allocation16 + $0x38] sm:$0xff] %v4119_v52 }
0x102a   :  { %5888 = shalt.err (!%p5885_p12)
}
0x102b   :  { %s5889_s20 = scalar_lea.hbm %s6926_s15, 1024 }
0x102c   :  { %p5890_p13 = scmp.ne.s32.totalorder %s6926_s15, %s5889_s20  ;;  %p5893_p0 = scmp.lt.u32.totalorder %s5889_s20, %s6926_s15 }
0x102e   :  { %p5895_p1 = pnand %p5893_p0, %p5890_p13 }
0x1030   :  { %5898 = shalt.err (!%p5895_p1)
}
0x1031   :  { %s5922_s27 = smov 128   ;;  %s5923_s5 = smov 8  }
0x1032   :  { %4139 = dma.vmem_to_hbm [thread:$0]  %s4134_s30, 1024, %s6926_s15, [#allocation4], %s5922_s27, %s5922_s27, %s5923_s5  }
0x1033   :  { %5909 = dma.done.wait [#allocation4], 1024  }
0x1034   :  { %5910 = vsyncadd [#allocation4], 4294966272 }
0x1035   :  { %4143 = vsyncpa [#allocation3], 1 }
0x1036   :  { %4144 = vsyncpa [#allocation6], 1 }
0x1037   :  { %4145 = vsyncpa [#allocation9], 1 }
0x1038   :  { %4146 = vsyncpa [#allocation12], 1 }
0x1039   :  { %4147 = vsyncpa [#allocation15], 1 }
0x103a   :  { %4148 = vsyncpa [#allocation4], 1 }

</bundles_post_ra>
